<compile_context>
chip_gen: v7x
topology: tpu7x:2x2x1
jax: 0.10.0
libtpu: 0.0.40
codegen_flags: <defaults>
</compile_context>

<pallas_src>
import functools

import jax
import jax.numpy as jnp
from jax.experimental import pallas as pl
from jax.experimental.pallas import tpu as pltpu


def _round_up(x, m):
    return ((x + m - 1) // m) * m


def _vq_kernel(x_ref, w_ref, wt_ref, wsq_ref,      # inputs
               q_ref, counts_ref, sse_ref,          # outputs
               sse_acc_ref,                         # scratch
               *, n_valid, tile_n, apply_row_mask, bf16_distances):
    """One grid step processes a tile of pixels.

    x_ref:       (TN, Dp)  pixel vectors (zero-padded rows/cols)
    w_ref:       (Kp, Dp)  codebook (zero-padded)
    wt_ref:      (Dp, Kp)  codebook, pre-transposed for the distance matmul
    wsq_ref:     (1,  Kp)  ||w_k||^2 (padded codes hold a huge value)
    q_ref:       (TN, Dp)  quantized output tile
    counts_ref:  (1,  Kp)  accumulated one-hot counts (resident across grid)
    sse_ref:     (1,  1)   sum((q - x)^2), written on the last step only
    sse_acc_ref: (1,  Dp)  per-lane SSE partial sums (VMEM scratch)
    """
    i = pl.program_id(0)
    nsteps = pl.num_programs(0)

    x = x_ref[...].astype(jnp.float32)                 # (TN, Dp)
    tn, dp = x.shape
    kp = w_ref.shape[0]

    @pl.when(i == 0)
    def _init():
        counts_ref[...] = jnp.zeros_like(counts_ref)
        sse_acc_ref[...] = jnp.zeros_like(sse_acc_ref)

    # squared distances: ||x||^2 - 2 x.w^T + ||w||^2  ->  (TN, Kp)
    if bf16_distances:
        xw = jnp.dot(x.astype(jnp.bfloat16), wt_ref[...].astype(jnp.bfloat16),
                     preferred_element_type=jnp.float32)
    else:
        xw = jnp.dot(x, wt_ref[...], preferred_element_type=jnp.float32)
    xsq = jnp.sum(x * x, axis=-1, keepdims=True)        # (TN, 1)
    dist = xsq - 2.0 * xw + wsq_ref[...]                 # (TN, Kp)

    # argmin over codes (first occurrence, matching torch.argmax(-d) tie-break)
    min_d = jnp.min(dist, axis=-1, keepdims=True)        # (TN, 1)
    iota_k = jax.lax.broadcasted_iota(jnp.int32, (tn, kp), 1)
    idx = jnp.min(jnp.where(dist == min_d, iota_k, kp), axis=-1, keepdims=True)
    onehot = (iota_k == idx).astype(jnp.float32)         # (TN, Kp)

    if apply_row_mask:
        row = jax.lax.broadcasted_iota(jnp.int32, (tn, 1), 0) + i * tile_n
        onehot = onehot * (row < n_valid).astype(jnp.float32)

    # gather codebook rows via one-hot matmul (MXU); padded rows -> 0
    q = jnp.dot(onehot, w_ref[...], preferred_element_type=jnp.float32)  # (TN, Dp)
    q_ref[...] = q.astype(q_ref.dtype)

    counts_ref[...] += jnp.sum(onehot, axis=0, keepdims=True)            # (1, Kp)

    diff = q - x                                       # padded rows/cols are 0
    sse_acc_ref[...] += jnp.sum(diff * diff, axis=0, keepdims=True)      # (1, Dp)

    @pl.when(i == nsteps - 1)
    def _final():
        sse_ref[...] = jnp.sum(sse_acc_ref[...]).reshape(1, 1)


def vector_quantizer_forward(inputs, codebook, commitment_cost=0.25,
                             tile_n=None, bf16_distances=False):
    """Forward pass of VectorQuantizer.

    inputs:   (B, C, H, W) float32, C == embedding_dim  (NCHW, like PyTorch)
    codebook: (K, D) float32, K == num_embeddings, D == embedding_dim
    returns:  (output_quantized (B,C,H,W), loss scalar, perplexity scalar)
    """
    B, C, H, W = inputs.shape
    K, D = codebook.shape
    assert C == D
    N = B * H * W

    f32 = jnp.float32
    K_pad = _round_up(K, 128)
    D_pad = _round_up(D, 128)

    # Pixel-tile size: large enough to fill the MXU M dim and amortize per-step
    # grid overhead, capped so the (TN, K_pad) f32 distance intermediate stays
    # ~<= 4 MiB (comfortable even inside v7x's 64 MiB VMEM).
    if tile_n is None:
        tn_cap = max(256, (4 * 1024 * 1024) // (4 * K_pad))
        tile_n = min(512, tn_cap)
    tile_n = max(8, (tile_n // 8) * 8)
    tile_n = min(tile_n, _round_up(N, 8))
    N_pad = _round_up(N, tile_n)

    # NCHW -> (N, D), then zero-pad to lane-dense (N_pad, D_pad).
    # TODO(synk): if the surrounding model can carry NHWC / (N, D) activations,
    #             these full-tensor transposes can be dropped entirely.
    x_flat = jnp.transpose(inputs, (0, 2, 3, 1)).reshape(N, D).astype(f32)
    if (N_pad, D_pad) != (N, D):
        x_in = jnp.pad(x_flat, ((0, N_pad - N), (0, D_pad - D)))
    else:
        x_in = x_flat

    wf = codebook.astype(f32)
    if (K_pad, D_pad) != (K, D):
        w_pad = jnp.pad(wf, ((0, K_pad - K), (0, D_pad - D)))
    else:
        w_pad = wf
    wt_pad = w_pad.T                                    # (D_pad, K_pad), built once

    wsq = jnp.sum(w_pad * w_pad, axis=-1)               # (K_pad,)
    wsq = jnp.where(jnp.arange(K_pad) < K, wsq, jnp.float32(1e30)).reshape(1, K_pad)

    grid = (N_pad // tile_n,)

    # Explicit VMEM budget (generous 2x headroom, capped at v7x's 64 MiB).
    vmem_est = 4 * (
        4 * tile_n * D_pad          # x, q tiles, double-buffered
        + 4 * K_pad * D_pad         # w and w_t, double-buffered
        + 2 * 8 * K_pad             # wsq
        + 8 * D_pad + 8 * K_pad     # sse_acc scratch + counts output
        + 6 * tile_n * K_pad        # dist / one-hot / iota intermediates
    )
    vmem_limit = int(min(64 * 1024 * 1024, max(32 * 1024 * 1024, 2 * vmem_est)))

    kernel = functools.partial(
        _vq_kernel,
        n_valid=N, tile_n=tile_n,
        apply_row_mask=(N_pad != N),
        bf16_distances=bf16_distances)

    q_pad, counts, sse = pl.pallas_call(
        kernel,
        out_shape=(
            jax.ShapeDtypeStruct((N_pad, D_pad), f32),
            jax.ShapeDtypeStruct((1, K_pad), f32),
            jax.ShapeDtypeStruct((1, 1), f32),
        ),
        grid_spec=pltpu.PrefetchScalarGridSpec(
            num_scalar_prefetch=0,
            grid=grid,
            in_specs=[
                pl.BlockSpec((tile_n, D_pad), lambda i: (i, 0)),
                pl.BlockSpec((K_pad, D_pad), lambda i: (0, 0)),
                pl.BlockSpec((D_pad, K_pad), lambda i: (0, 0)),
                pl.BlockSpec((1, K_pad), lambda i: (0, 0)),
            ],
            out_specs=[
                pl.BlockSpec((tile_n, D_pad), lambda i: (i, 0)),
                pl.BlockSpec((1, K_pad), lambda i: (0, 0)),
                pl.BlockSpec((1, 1), lambda i: (0, 0)),
            ],
            scratch_shapes=[pltpu.VMEM((1, D_pad), jnp.float32)],
        ),
        compiler_params=pltpu.CompilerParams(
            dimension_semantics=("arbitrary",),
            vmem_limit_bytes=vmem_limit),
    )(x_in, w_pad, wt_pad, wsq)

    # (N_pad, D_pad) -> (N, D) -> NCHW
    q_flat = q_pad[:N, :D]
    quantized = jnp.transpose(q_flat.reshape(B, H, W, D), (0, 3, 1, 2))

    # output_quantized = inputs + stop_grad(quantized - inputs)  (== quantized in value)
    output_quantized = inputs + jax.lax.stop_gradient(quantized - inputs)

    # e_latent_loss == q_latent_loss in value -> loss = (1 + cc) * mse
    mse = sse[0, 0] / (N * D)
    loss = (1.0 + commitment_cost) * mse

    avg_probs = counts[0, :K] / N
    perplexity = jnp.exp(-jnp.sum(avg_probs * jnp.log(avg_probs + 1e-10)))

    return output_quantized, loss, perplexity


if __name__ == "__main__":
    # Small, deterministic config consistent with the module.  Chosen so the
    # kernel exercises multiple grid steps, row masking (N not a multiple of
    # the tile), and K / D lane padding (64 -> 128, 32 -> 128).
    embedding_dim = 32
    num_embeddings = 64
    commitment_cost = 0.25
    B, H, W = 2, 20, 20

    key = jax.random.PRNGKey(0)
    k_x, k_w = jax.random.split(key)
    x = jax.random.normal(k_x, (B, embedding_dim, H, W), dtype=jnp.float32)
    # nn.Embedding default init ~ N(0, 1)
    codebook = jax.random.normal(k_w, (num_embeddings, embedding_dim),
                                 dtype=jnp.float32)

    fwd = jax.jit(functools.partial(vector_quantizer_forward,
                                    commitment_cost=commitment_cost))
    out_q, loss, perplexity = fwd(x, codebook)
    jax.block_until_ready((out_q, loss, perplexity))

    # Lightweight pure-JAX reference check.
    d = jnp.sum((x[:, None, :, :, :] -
                 codebook.reshape(1, num_embeddings, embedding_dim, 1, 1)) ** 2,
                axis=2)                                         # (B, K, H, W)
    idx = jnp.argmax(-d, axis=1)                                # (B, H, W)
    q_ref = jnp.transpose(codebook[idx], (0, 3, 1, 2))          # (B, C, H, W)
    mse_ref = jnp.mean((q_ref - x) ** 2)
    loss_ref = (1.0 + commitment_cost) * mse_ref
    onehot = jax.nn.one_hot(idx.reshape(-1), num_embeddings)
    p = jnp.mean(onehot, axis=0)
    perp_ref = jnp.exp(-jnp.sum(p * jnp.log(p + 1e-10)))

    assert jnp.allclose(out_q, q_ref, atol=1e-4), "quantized mismatch"
    assert jnp.allclose(loss, loss_ref, atol=1e-5), "loss mismatch"
    assert jnp.allclose(perplexity, perp_ref, atol=1e-4), "perplexity mismatch"

    print("KERNEL_OK")
</pallas_src>

<mosaic_0001>
module attributes {stable_mosaic.version = 11 : i64} {
  func.func @_vq_kernel(%arg0: i32, %arg1: memref<512x128xf32, #tpu.memory_space<vmem>>, %arg2: memref<128x128xf32, #tpu.memory_space<vmem>>, %arg3: memref<128x128xf32, #tpu.memory_space<vmem>>, %arg4: memref<1x128xf32, #tpu.memory_space<vmem>>, %arg5: memref<512x128xf32, #tpu.memory_space<vmem>>, %arg6: memref<1x128xf32, #tpu.memory_space<vmem>>, %arg7: memref<1x1xf32, #tpu.memory_space<vmem>>, %arg8: memref<1x128xf32, #tpu.memory_space<vmem>>) attributes {dimension_semantics = [#tpu.dimension_semantics<arbitrary>], iteration_bounds = array<i64: 2>, scalar_prefetch = 0 : i64, scratch_operands = 1 : i64, tpu.core_type = #tpu.core_type<tc>, window_params = [{transform_indices = @transform_0, window_bounds = array<i64: 512, 128>}, {pipeline_mode = #tpu.pipeline_mode<synchronous>, transform_indices = @transform_1, window_bounds = array<i64: 128, 128>}, {pipeline_mode = #tpu.pipeline_mode<synchronous>, transform_indices = @transform_2, window_bounds = array<i64: 128, 128>}, {pipeline_mode = #tpu.pipeline_mode<synchronous>, transform_indices = @transform_3, window_bounds = array<i64: 1, 128>}, {transform_indices = @transform_4, window_bounds = array<i64: 512, 128>}, {pipeline_mode = #tpu.pipeline_mode<synchronous>, transform_indices = @transform_5, window_bounds = array<i64: 1, 128>}, {pipeline_mode = #tpu.pipeline_mode<synchronous>, transform_indices = @transform_6, window_bounds = array<i64: 1, 1>}]} {
    %c0 = arith.constant 0 : index
    %c0_0 = arith.constant 0 : index
    %0 = vector.load %arg1[%c0, %c0_0] : memref<512x128xf32, #tpu.memory_space<vmem>>, vector<512x128xf32>
    %c0_i32 = arith.constant 0 : i32
    %1 = arith.cmpi eq, %arg0, %c0_i32 : i32
    %2 = arith.extui %1 : i1 to i32
    %c0_i32_1 = arith.constant 0 : i32
    %3 = arith.cmpi ne, %2, %c0_i32_1 : i32
    scf.if %3 {
      %cst_26 = arith.constant 0.000000e+00 : f32
      %57 = vector.broadcast %cst_26 : f32 to vector<1x128xf32>
      %c0_27 = arith.constant 0 : index
      %c0_28 = arith.constant 0 : index
      %58 = vector.load %arg6[%c0_27, %c0_28] : memref<1x128xf32, #tpu.memory_space<vmem>>, vector<1x128xf32>
      tpu.vector_store %arg6[%c0_27, %c0_28], %57 {strides = array<i32>} : memref<1x128xf32, #tpu.memory_space<vmem>>, vector<1x128xf32>,
      %cst_29 = arith.constant 0.000000e+00 : f32
      %59 = vector.broadcast %cst_29 : f32 to vector<1x128xf32>
      %c0_30 = arith.constant 0 : index
      %c0_31 = arith.constant 0 : index
      %60 = vector.load %arg8[%c0_30, %c0_31] : memref<1x128xf32, #tpu.memory_space<vmem>>, vector<1x128xf32>
      tpu.vector_store %arg8[%c0_30, %c0_31], %59 {strides = array<i32>} : memref<1x128xf32, #tpu.memory_space<vmem>>, vector<1x128xf32>,
    } else {
    }
    %c0_2 = arith.constant 0 : index
    %c0_3 = arith.constant 0 : index
    %4 = vector.load %arg3[%c0_2, %c0_3] : memref<128x128xf32, #tpu.memory_space<vmem>>, vector<128x128xf32>
    %cst = arith.constant dense<0.000000e+00> : vector<512x128xf32>
    %5 = tpu.matmul %0, %4, %cst {dimension_numbers = #tpu.dot_dimension_numbers<[1], [0], [0], [1], [0, 0, 1, 1], [], []>} : vector<512x128xf32>, vector<128x128xf32>, vector<512x128xf32> -> vector<512x128xf32>
    %6 = arith.mulf %0, %0 : vector<512x128xf32>
    %cst_4 = arith.constant dense<0.000000e+00> : vector<512xf32>
    %7 = vector.multi_reduction <add>, %6, %cst_4 [1] : vector<512x128xf32> to vector<512xf32>
    %8 = vector.shape_cast %7 : vector<512xf32> to vector<512x1xf32>
    %cst_5 = arith.constant 2.000000e+00 : f32
    %9 = vector.broadcast %cst_5 : f32 to vector<512x128xf32>
    %10 = arith.mulf %9, %5 : vector<512x128xf32>
    %11 = vector.broadcast %8 : vector<512x1xf32> to vector<512x128xf32>
    %12 = arith.subf %11, %10 : vector<512x128xf32>
    %c0_6 = arith.constant 0 : index
    %c0_7 = arith.constant 0 : index
    %13 = vector.load %arg4[%c0_6, %c0_7] : memref<1x128xf32, #tpu.memory_space<vmem>>, vector<1x128xf32>
    %14 = vector.broadcast %13 : vector<1x128xf32> to vector<512x128xf32>
    %15 = arith.addf %12, %14 : vector<512x128xf32>
    %cst_8 = arith.constant dense<0x7F800000> : vector<512xf32>
    %16 = vector.multi_reduction <minimumf>, %15, %cst_8 [1] : vector<512x128xf32> to vector<512xf32>
    %17 = vector.shape_cast %16 : vector<512xf32> to vector<512x1xf32>
    %18 = tpu.iota {dimensions = array<i32: 1>} : vector<512x128xi32>
    %19 = vector.broadcast %17 : vector<512x1xf32> to vector<512x128xf32>
    %20 = arith.cmpf oeq, %15, %19 : vector<512x128xf32>
    %c128_i32 = arith.constant 128 : i32
    %21 = vector.broadcast %c128_i32 : i32 to vector<512x128xi32>
    %22 = arith.select %20, %18, %21 : vector<512x128xi1>, vector<512x128xi32>
    %cst_9 = arith.constant dense<2147483647> : vector<512xi32>
    %23 = vector.multi_reduction <minsi>, %22, %cst_9 [1] : vector<512x128xi32> to vector<512xi32>
    %24 = vector.shape_cast %23 : vector<512xi32> to vector<512x1xi32>
    %25 = vector.broadcast %24 : vector<512x1xi32> to vector<512x128xi32>
    %26 = arith.cmpi eq, %18, %25 : vector<512x128xi32>
    %27 = arith.extui %26 : vector<512x128xi1> to vector<512x128xi32>
    %28 = arith.sitofp %27 : vector<512x128xi32> to vector<512x128xf32>
    %29 = tpu.iota {dimensions = array<i32: 0>} : vector<512x1xi32>
    %c512_i32 = arith.constant 512 : i32
    %30 = arith.muli %arg0, %c512_i32 : i32
    %31 = vector.broadcast %30 : i32 to vector<512x1xi32>
    %32 = arith.addi %29, %31 : vector<512x1xi32>
    %c800_i32 = arith.constant 800 : i32
    %33 = vector.broadcast %c800_i32 : i32 to vector<512x1xi32>
    %34 = arith.cmpi slt, %32, %33 : vector<512x1xi32>
    %35 = arith.extui %34 : vector<512x1xi1> to vector<512x1xi32>
    %36 = arith.sitofp %35 : vector<512x1xi32> to vector<512x1xf32>
    %37 = vector.broadcast %36 : vector<512x1xf32> to vector<512x128xf32>
    %38 = arith.mulf %28, %37 : vector<512x128xf32>
    %c0_10 = arith.constant 0 : index
    %c0_11 = arith.constant 0 : index
    %39 = vector.load %arg2[%c0_10, %c0_11] : memref<128x128xf32, #tpu.memory_space<vmem>>, vector<128x128xf32>
    %cst_12 = arith.constant dense<0.000000e+00> : vector<512x128xf32>
    %40 = tpu.matmul %38, %39, %cst_12 {dimension_numbers = #tpu.dot_dimension_numbers<[1], [0], [0], [1], [0, 0, 1, 1], [], []>} : vector<512x128xf32>, vector<128x128xf32>, vector<512x128xf32> -> vector<512x128xf32>
    %c0_13 = arith.constant 0 : index
    %c0_14 = arith.constant 0 : index
    %41 = vector.load %arg5[%c0_13, %c0_14] : memref<512x128xf32, #tpu.memory_space<vmem>>, vector<512x128xf32>
    tpu.vector_store %arg5[%c0_13, %c0_14], %40 {strides = array<i32>} : memref<512x128xf32, #tpu.memory_space<vmem>>, vector<512x128xf32>,
    %c0_15 = arith.constant 0 : index
    %c0_16 = arith.constant 0 : index
    %42 = vector.load %arg6[%c0_15, %c0_16] : memref<1x128xf32, #tpu.memory_space<vmem>>, vector<1x128xf32>
    %cst_17 = arith.constant dense<0.000000e+00> : vector<128xf32>
    %43 = vector.multi_reduction <add>, %38, %cst_17 [0] : vector<512x128xf32> to vector<128xf32>
    %44 = vector.shape_cast %43 : vector<128xf32> to vector<1x128xf32>
    %45 = arith.addf %42, %44 : vector<1x128xf32>
    %c0_18 = arith.constant 0 : index
    %c0_19 = arith.constant 0 : index
    %46 = vector.load %arg6[%c0_18, %c0_19] : memref<1x128xf32, #tpu.memory_space<vmem>>, vector<1x128xf32>
    tpu.vector_store %arg6[%c0_18, %c0_19], %45 {strides = array<i32>} : memref<1x128xf32, #tpu.memory_space<vmem>>, vector<1x128xf32>,
    %47 = arith.subf %40, %0 : vector<512x128xf32>
    %c0_20 = arith.constant 0 : index
    %c0_21 = arith.constant 0 : index
    %48 = vector.load %arg8[%c0_20, %c0_21] : memref<1x128xf32, #tpu.memory_space<vmem>>, vector<1x128xf32>
    %49 = arith.mulf %47, %47 : vector<512x128xf32>
    %cst_22 = arith.constant dense<0.000000e+00> : vector<128xf32>
    %50 = vector.multi_reduction <add>, %49, %cst_22 [0] : vector<512x128xf32> to vector<128xf32>
    %51 = vector.shape_cast %50 : vector<128xf32> to vector<1x128xf32>
    %52 = arith.addf %48, %51 : vector<1x128xf32>
    %c0_23 = arith.constant 0 : index
    %c0_24 = arith.constant 0 : index
    %53 = vector.load %arg8[%c0_23, %c0_24] : memref<1x128xf32, #tpu.memory_space<vmem>>, vector<1x128xf32>
    tpu.vector_store %arg8[%c0_23, %c0_24], %52 {strides = array<i32>} : memref<1x128xf32, #tpu.memory_space<vmem>>, vector<1x128xf32>,
    %c1_i32 = arith.constant 1 : i32
    %54 = arith.cmpi eq, %arg0, %c1_i32 : i32
    %55 = arith.extui %54 : i1 to i32
    %c0_i32_25 = arith.constant 0 : i32
    %56 = arith.cmpi ne, %55, %c0_i32_25 : i32
    scf.if %56 {
      %c0_26 = arith.constant 0 : index
      %c0_27 = arith.constant 0 : index
      %57 = vector.load %arg8[%c0_26, %c0_27] : memref<1x128xf32, #tpu.memory_space<vmem>>, vector<1x128xf32>
      %58 = vector.shape_cast %57 : vector<1x128xf32> to vector<1x1x128xf32>
      %cst_28 = arith.constant dense<0.000000e+00> : vector<1xf32>
      %59 = vector.multi_reduction <add>, %58, %cst_28 [1, 2] : vector<1x1x128xf32> to vector<1xf32>
      %60 = vector.shape_cast %59 : vector<1xf32> to vector<1x1x1xf32>
      %61 = vector.extract %60[0, 0, 0] : f32 from vector<1x1x1xf32>
      %62 = vector.broadcast %61 : f32 to vector<1x1xf32>
      %c0_29 = arith.constant 0 : index
      %c0_30 = arith.constant 0 : index
      %63 = vector.load %arg7[%c0_29, %c0_30] : memref<1x1xf32, #tpu.memory_space<vmem>>, vector<1x1xf32>
      tpu.vector_store %arg7[%c0_29, %c0_30], %62 {strides = array<i32>} : memref<1x1xf32, #tpu.memory_space<vmem>>, vector<1x1xf32>,
    } else {
    }
    return
  }
  func.func @transform_0(%arg0: i32) -> (i32, i32) {
    %c0_i32 = arith.constant 0 : i32
    %c0_i32_0 = arith.constant 0 : i32
    return %arg0, %c0_i32 : i32, i32
  }
  func.func @transform_1(%arg0: i32) -> (i32, i32) {
    %c0_i32 = arith.constant 0 : i32
    %c0_i32_0 = arith.constant 0 : i32
    %c0_i32_1 = arith.constant 0 : i32
    return %c0_i32, %c0_i32_0 : i32, i32
  }
  func.func @transform_2(%arg0: i32) -> (i32, i32) {
    %c0_i32 = arith.constant 0 : i32
    %c0_i32_0 = arith.constant 0 : i32
    %c0_i32_1 = arith.constant 0 : i32
    return %c0_i32, %c0_i32_0 : i32, i32
  }
  func.func @transform_3(%arg0: i32) -> (i32, i32) {
    %c0_i32 = arith.constant 0 : i32
    %c0_i32_0 = arith.constant 0 : i32
    %c0_i32_1 = arith.constant 0 : i32
    return %c0_i32, %c0_i32_0 : i32, i32
  }
  func.func @transform_4(%arg0: i32) -> (i32, i32) {
    %c0_i32 = arith.constant 0 : i32
    %c0_i32_0 = arith.constant 0 : i32
    return %arg0, %c0_i32 : i32, i32
  }
  func.func @transform_5(%arg0: i32) -> (i32, i32) {
    %c0_i32 = arith.constant 0 : i32
    %c0_i32_0 = arith.constant 0 : i32
    %c0_i32_1 = arith.constant 0 : i32
    return %c0_i32, %c0_i32_0 : i32, i32
  }
  func.func @transform_6(%arg0: i32) -> (i32, i32) {
    %c0_i32 = arith.constant 0 : i32
    %c0_i32_0 = arith.constant 0 : i32
    %c0_i32_1 = arith.constant 0 : i32
    return %c0_i32, %c0_i32_0 : i32, i32
  }
}

</mosaic_0001>

<bundles_post_ra>
// kernel: vector_quantizer_forward.1
= control target key start
LH: loop header
LB: loop body
LE: loop exit
PB: predicated region body
PF: predicated region fallthrough
CT: control target
= control target key end

     0   :  { %12 = vsyncpa [#allocation4], 0  ;;  %s4408_s21 = smov 0   ;;  %s7312_s0 = inlined_call_operand.vmem [shape: f32[1024,128], index: 0, kind: input, shape index: {}]   ;;  %s7313_s1 = inlined_call_operand.vmem [shape: f32[128,128], index: 1, kind: input, shape index: {}]   ;;  %s7314_s2 = inlined_call_operand.vmem [shape: f32[128,128], index: 2, kind: input, shape index: {}]   ;;  %s7315_s3 = inlined_call_operand.vmem [shape: f32[1,128], index: 3, kind: input, shape index: {}]   ;;  %s7316_s4 = inlined_call_operand.vmem [shape: f32[1024,128], index: 4, kind: output, shape index: {0}]   ;;  %s7317_s5 = inlined_call_operand.vmem [shape: f32[1,128], index: 5, kind: output, shape index: {1}]   ;;  %s7318_s6 = inlined_call_operand.hbm [shape: f32[1,1], index: 6, kind: output, shape index: {2}]  }
   0x1 LB: > { %s4414_s22 = sadd.s32 4294967295, %s4368_s21   ;;  %p3692_p0 = scmp.ge.s32.totalorder %s4368_s21, 1  ;;  %s4368_s21 = sphi %s4408_s21, %s18_s21  }
   0x2   : > { %p209_p1 = scmp.lt.s32.totalorder %s4368_s21, 3 }
   0x4   : > { %p210_p2 = pnand %p3692_p0, %p209_p1 }
   0x6   : > { %213 = sbr.rel (%p210_p2) target bundleno = 1400 (0x578), region = 36 }
   0xd   : > { %s3693_s23 = sshll.u32 %s4414_s22, 6  ;;  %p3697_p4 = scmp.ne.s32.totalorder %s4414_s22, 0 }
   0xe   : > { %p240_p3 = scmp.lt.s32.totalorder %s3693_s23, 127 }
  0x10   : > { %s8007_s23 = smov (!%p240_p3, %s3693_s23), 127 }
  0x11   : > { %s3694_s24 = sshll.u32 %s8007_s23, 3 }
  0x12   : > { %s4422_s27 = scalar_lea.vmem %s7312_s0, %s3694_s24  ;;  %s4427_s30 = scalar_lea.vmem %s7316_s4, %s3694_s24 }
  0x13   : > { %v4430_v0 = vld [vmem:[%s4422_s27] sm:$0xff]  ;;  %v4433_v1 = vld [vmem:[%s4422_s27 + $0x8] sm:$0xff]  ;;  %v4436_v2 = vld [vmem:[%s4422_s27 + $0x10] sm:$0xff] }
  0x14   : > { %7522 = vst [vmem:[#allocation6_spill] sm:$0xff] %v4430_v0  ;;  %7523 = vst [vmem:[#allocation7_spill] sm:$0xff] %v4433_v1  ;;  %v4439_v3 = vld [vmem:[%s4422_s27 + $0x18] sm:$0xff]  ;;  %v4442_v4 = vld [vmem:[%s4422_s27 + $0x20] sm:$0xff] }
  0x15   : > { %7524 = vst [vmem:[#allocation8_spill] sm:$0xff] %v4436_v2  ;;  %7525 = vst [vmem:[#allocation9_spill] sm:$0xff] %v4439_v3  ;;  %v4445_v5 = vld [vmem:[%s4422_s27 + $0x28] sm:$0xff]  ;;  %v4448_v6 = vld [vmem:[%s4422_s27 + $0x30] sm:$0xff] }
  0x16   : > { %7526 = vst [vmem:[#allocation10_spill] sm:$0xff] %v4442_v4  ;;  %7527 = vst [vmem:[#allocation11_spill] sm:$0xff] %v4445_v5  ;;  %v4451_v7 = vld [vmem:[%s4422_s27 + $0x38] sm:$0xff]  ;;  %v4454_v8 = vld [vmem:[%s4422_s27 + $0x40] sm:$0xff] }
  0x17   : > { %7528 = vst [vmem:[#allocation12_spill] sm:$0xff] %v4448_v6  ;;  %7529 = vst [vmem:[#allocation13_spill] sm:$0xff] %v4451_v7  ;;  %v4457_v9 = vld [vmem:[%s4422_s27 + $0x48] sm:$0xff]  ;;  %v4460_v10 = vld [vmem:[%s4422_s27 + $0x50] sm:$0xff] }
  0x18   : > { %7530 = vst [vmem:[#allocation14_spill] sm:$0xff] %v4454_v8  ;;  %7531 = vst [vmem:[#allocation15_spill] sm:$0xff] %v4457_v9  ;;  %v4463_v11 = vld [vmem:[%s4422_s27 + $0x58] sm:$0xff]  ;;  %v4466_v12 = vld [vmem:[%s4422_s27 + $0x60] sm:$0xff] }
  0x19   : > { %7532 = vst [vmem:[#allocation16_spill] sm:$0xff] %v4460_v10  ;;  %7533 = vst [vmem:[#allocation17_spill] sm:$0xff] %v4463_v11  ;;  %v4469_v13 = vld [vmem:[%s4422_s27 + $0x68] sm:$0xff]  ;;  %v4472_v14 = vld [vmem:[%s4422_s27 + $0x70] sm:$0xff] }
  0x1a   : > { %7534 = vst [vmem:[#allocation18_spill] sm:$0xff] %v4466_v12  ;;  %7535 = vst [vmem:[#allocation19_spill] sm:$0xff] %v4469_v13  ;;  %v4475_v15 = vld [vmem:[%s4422_s27 + $0x78] sm:$0xff]  ;;  %v4478_v16 = vld [vmem:[%s4422_s27 + $0x80] sm:$0xff] }
  0x1b   : > { %7536 = vst [vmem:[#allocation20_spill] sm:$0xff] %v4472_v14  ;;  %7537 = vst [vmem:[#allocation21_spill] sm:$0xff] %v4475_v15  ;;  %v4481_v17 = vld [vmem:[%s4422_s27 + $0x88] sm:$0xff]  ;;  %v4484_v18 = vld [vmem:[%s4422_s27 + $0x90] sm:$0xff] }
  0x1c   : > { %7538 = vst [vmem:[#allocation22_spill] sm:$0xff] %v4478_v16  ;;  %7539 = vst [vmem:[#allocation23_spill] sm:$0xff] %v4481_v17  ;;  %v4487_v19 = vld [vmem:[%s4422_s27 + $0x98] sm:$0xff]  ;;  %v4490_v20 = vld [vmem:[%s4422_s27 + $0xa0] sm:$0xff] }
  0x1d   : > { %7540 = vst [vmem:[#allocation24_spill] sm:$0xff] %v4484_v18  ;;  %7541 = vst [vmem:[#allocation25_spill] sm:$0xff] %v4487_v19  ;;  %v4493_v21 = vld [vmem:[%s4422_s27 + $0xa8] sm:$0xff]  ;;  %v4496_v22 = vld [vmem:[%s4422_s27 + $0xb0] sm:$0xff] }
  0x1e   : > { %7542 = vst [vmem:[#allocation26_spill] sm:$0xff] %v4490_v20  ;;  %7543 = vst [vmem:[#allocation27_spill] sm:$0xff] %v4493_v21  ;;  %v4499_v23 = vld [vmem:[%s4422_s27 + $0xb8] sm:$0xff]  ;;  %v4502_v24 = vld [vmem:[%s4422_s27 + $0xc0] sm:$0xff] }
  0x1f   : > { %7544 = vst [vmem:[#allocation28_spill] sm:$0xff] %v4496_v22  ;;  %7545 = vst [vmem:[#allocation29_spill] sm:$0xff] %v4499_v23  ;;  %v4505_v25 = vld [vmem:[%s4422_s27 + $0xc8] sm:$0xff]  ;;  %v4508_v26 = vld [vmem:[%s4422_s27 + $0xd0] sm:$0xff] }
  0x20   : > { %7546 = vst [vmem:[#allocation30_spill] sm:$0xff] %v4502_v24  ;;  %7547 = vst [vmem:[#allocation31_spill] sm:$0xff] %v4505_v25  ;;  %v4511_v27 = vld [vmem:[%s4422_s27 + $0xd8] sm:$0xff]  ;;  %v4514_v28 = vld [vmem:[%s4422_s27 + $0xe0] sm:$0xff] }
  0x21   : > { %7548 = vst [vmem:[#allocation32_spill] sm:$0xff] %v4508_v26  ;;  %7549 = vst [vmem:[#allocation33_spill] sm:$0xff] %v4511_v27  ;;  %v4517_v29 = vld [vmem:[%s4422_s27 + $0xe8] sm:$0xff]  ;;  %v4520_v30 = vld [vmem:[%s4422_s27 + $0xf0] sm:$0xff] }
  0x22   : > { %7550 = vst [vmem:[#allocation34_spill] sm:$0xff] %v4514_v28  ;;  %7551 = vst [vmem:[#allocation35_spill] sm:$0xff] %v4517_v29  ;;  %v4523_v31 = vld [vmem:[%s4422_s27 + $0xf8] sm:$0xff]  ;;  %v4526_v32 = vld [vmem:[%s4422_s27 + $0x100] sm:$0xff] }
  0x23   : > { %7552 = vst [vmem:[#allocation36_spill] sm:$0xff] %v4520_v30  ;;  %7553 = vst [vmem:[#allocation37_spill] sm:$0xff] %v4523_v31  ;;  %v4529_v33 = vld [vmem:[%s4422_s27 + $0x108] sm:$0xff]  ;;  %v4532_v34 = vld [vmem:[%s4422_s27 + $0x110] sm:$0xff] }
  0x24   : > { %7554 = vst [vmem:[#allocation38_spill] sm:$0xff] %v4526_v32  ;;  %7555 = vst [vmem:[#allocation39_spill] sm:$0xff] %v4529_v33  ;;  %v4535_v35 = vld [vmem:[%s4422_s27 + $0x118] sm:$0xff]  ;;  %v4538_v36 = vld [vmem:[%s4422_s27 + $0x120] sm:$0xff] }
  0x25   : > { %7556 = vst [vmem:[#allocation40_spill] sm:$0xff] %v4532_v34  ;;  %7557 = vst [vmem:[#allocation41_spill] sm:$0xff] %v4535_v35  ;;  %v4541_v37 = vld [vmem:[%s4422_s27 + $0x128] sm:$0xff]  ;;  %v4544_v38 = vld [vmem:[%s4422_s27 + $0x130] sm:$0xff] }
  0x26   : > { %7558 = vst [vmem:[#allocation42_spill] sm:$0xff] %v4538_v36  ;;  %7559 = vst [vmem:[#allocation43_spill] sm:$0xff] %v4541_v37  ;;  %v4547_v39 = vld [vmem:[%s4422_s27 + $0x138] sm:$0xff]  ;;  %v4550_v40 = vld [vmem:[%s4422_s27 + $0x140] sm:$0xff] }
  0x27   : > { %7560 = vst [vmem:[#allocation44_spill] sm:$0xff] %v4544_v38  ;;  %7561 = vst [vmem:[#allocation45_spill] sm:$0xff] %v4547_v39  ;;  %v4553_v41 = vld [vmem:[%s4422_s27 + $0x148] sm:$0xff]  ;;  %v4556_v42 = vld [vmem:[%s4422_s27 + $0x150] sm:$0xff] }
  0x28   : > { %7562 = vst [vmem:[#allocation46_spill] sm:$0xff] %v4550_v40  ;;  %7563 = vst [vmem:[#allocation47_spill] sm:$0xff] %v4553_v41  ;;  %v4559_v43 = vld [vmem:[%s4422_s27 + $0x158] sm:$0xff]  ;;  %v4562_v44 = vld [vmem:[%s4422_s27 + $0x160] sm:$0xff] }
  0x29   : > { %7564 = vst [vmem:[#allocation48_spill] sm:$0xff] %v4556_v42  ;;  %7565 = vst [vmem:[#allocation49_spill] sm:$0xff] %v4559_v43  ;;  %v4565_v45 = vld [vmem:[%s4422_s27 + $0x168] sm:$0xff]  ;;  %v4568_v46 = vld [vmem:[%s4422_s27 + $0x170] sm:$0xff] }
  0x2a   : > { %7566 = vst [vmem:[#allocation50_spill] sm:$0xff] %v4562_v44  ;;  %7567 = vst [vmem:[#allocation51_spill] sm:$0xff] %v4565_v45  ;;  %v4571_v47 = vld [vmem:[%s4422_s27 + $0x178] sm:$0xff]  ;;  %v4574_v48 = vld [vmem:[%s4422_s27 + $0x180] sm:$0xff] }
  0x2b   : > { %7568 = vst [vmem:[#allocation52_spill] sm:$0xff] %v4568_v46  ;;  %7569 = vst [vmem:[#allocation53_spill] sm:$0xff] %v4571_v47  ;;  %v4577_v49 = vld [vmem:[%s4422_s27 + $0x188] sm:$0xff]  ;;  %v4580_v50 = vld [vmem:[%s4422_s27 + $0x190] sm:$0xff] }
  0x2c   : > { %7570 = vst [vmem:[#allocation54_spill] sm:$0xff] %v4574_v48  ;;  %7571 = vst [vmem:[#allocation55_spill] sm:$0xff] %v4577_v49  ;;  %v4583_v51 = vld [vmem:[%s4422_s27 + $0x198] sm:$0xff]  ;;  %v4586_v52 = vld [vmem:[%s4422_s27 + $0x1a0] sm:$0xff] }
  0x2d   : > { %7572 = vst [vmem:[#allocation56_spill] sm:$0xff] %v4580_v50  ;;  %7573 = vst [vmem:[#allocation57_spill] sm:$0xff] %v4583_v51  ;;  %v4589_v53 = vld [vmem:[%s4422_s27 + $0x1a8] sm:$0xff]  ;;  %v4592_v54 = vld [vmem:[%s4422_s27 + $0x1b0] sm:$0xff]  ;;  %318 = sbr.rel (%p3697_p4) target bundleno = 53 (0x35), region = 40 }
  0x2e   : > { %7574 = vst [vmem:[#allocation58_spill] sm:$0xff] %v4586_v52  ;;  %7575 = vst [vmem:[#allocation59_spill] sm:$0xff] %v4589_v53  ;;  %v4595_v55 = vld [vmem:[%s4422_s27 + $0x1b8] sm:$0xff]  ;;  %v4598_v56 = vld [vmem:[%s4422_s27 + $0x1c0] sm:$0xff] }
  0x2f   : > { %7576 = vst [vmem:[#allocation60_spill] sm:$0xff] %v4592_v54  ;;  %7577 = vst [vmem:[#allocation61_spill] sm:$0xff] %v4595_v55  ;;  %v4601_v57 = vld [vmem:[%s4422_s27 + $0x1c8] sm:$0xff]  ;;  %v4604_v58 = vld [vmem:[%s4422_s27 + $0x1d0] sm:$0xff]  ;;  %v4370_v55 = vmov (!%p3697_p4), 0.0  }
  0x30   : > { %7578 = vst [vmem:[#allocation62_spill] sm:$0xff] %v4598_v56  ;;  %7579 = vst [vmem:[#allocation63_spill] sm:$0xff] %v4601_v57  ;;  %v4607_v59 = vld [vmem:[%s4422_s27 + $0x1d8] sm:$0xff]  ;;  %v4610_v60 = vld [vmem:[%s4422_s27 + $0x1e0] sm:$0xff] }
  0x31   : > { %7580 = vst [vmem:[#allocation64_spill] sm:$0xff] %v4604_v58  ;;  %7581 = vst [vmem:[#allocation65_spill] sm:$0xff] %v4607_v59  ;;  %v4613_v61 = vld [vmem:[%s4422_s27 + $0x1e8] sm:$0xff]  ;;  %v4616_v62 = vld [vmem:[%s4422_s27 + $0x1f0] sm:$0xff] }
  0x32   : > { %7582 = vst [vmem:[#allocation66_spill] sm:$0xff] %v4610_v60  ;;  %7583 = vst [vmem:[#allocation67_spill] sm:$0xff] %v4613_v61  ;;  %v4619_v63 = vld [vmem:[%s4422_s27 + $0x1f8] sm:$0xff] }
  0x33   : > { %7584 = vst [vmem:[#allocation68_spill] sm:$0xff] %v4616_v62  ;;  %7585 = vst [vmem:[#allocation69_spill] sm:$0xff] %v4619_v63 }
  0x34   : > { %319 = vst [vmem:[%s7317_s5] sm:$0x1] %v4370_v55  ;;  %320 = vst [vmem:[#allocation2] sm:$0x1] %v4370_v55 }
  0x35 PF: > { %v321_v60 = vld [vmem:[%s7314_s2] sm:$0xff]  ;;  %v322_v62 = vld [vmem:[%s7314_s2 + $0x8] sm:$0xff]  ;;  %v323_v63 = vld [vmem:[%s7314_s2 + $0x10] sm:$0xff]  ;;  %4025 = vmatprep.mubr.f32.mxu0 %v4430_v0  ;;  %v722_v61 = vmul.f32 %v4430_v0, %v4430_v0  ;;  %v723_v54 = vmul.f32 %v4433_v1, %v4433_v1  ;;  %s3763_s12 = sshll.u32 %s4414_s22, 9  ;;  %p3828_p5 = scmp.ne.s32.totalorder %s4414_s22, 1 }
  0x36   : > { %v4249_v59 = vpack.c.bf16 %v322_v62, %v321_v60  ;;  %v324_v55 = vld [vmem:[%s7314_s2 + $0x18] sm:$0xff]  ;;  %v325_v57 = vld [vmem:[%s7314_s2 + $0x20] sm:$0xff]  ;;  %v326_v56 = vld [vmem:[%s7314_s2 + $0x28] sm:$0xff]  ;;  %v724_v60 = vmul.f32 %v4436_v2, %v4436_v2 }
  0x37   : > { %v4253_v58 = vpack.c.bf16 %v324_v55, %v323_v63  ;;  %786 = vadd.xlane.f32.xlu0 %v722_v61  ;;  %v4257_v62 = vpack.c.bf16 %v326_v56, %v325_v57  ;;  %v327_v63 = vld [vmem:[%s7314_s2 + $0x30] sm:$0xff]  ;;  %v328_v55 = vld [vmem:[%s7314_s2 + $0x38] sm:$0xff]  ;;  %v726_v61 = vmul.f32 %v4442_v4, %v4442_v4  ;;  %v329_v56 = vld [vmem:[%s7314_s2 + $0x40] sm:$0xff] }
  0x38   : > { %4250 = vmatprep.subr.bf16.mxu0 %v4249_v59  ;;  %790 = vadd.xlane.f32.xlu1 %v724_v60  ;;  %v4261_v0 = vpack.c.bf16 %v328_v55, %v327_v63  ;;  %v330_v57 = vld [vmem:[%s7314_s2 + $0x48] sm:$0xff]  ;;  %v727_v60 = vmul.f32 %v4445_v5, %v4445_v5  ;;  %v331_v63 = vld [vmem:[%s7314_s2 + $0x50] sm:$0xff]  ;;  %v332_v55 = vld [vmem:[%s7314_s2 + $0x58] sm:$0xff] }
  0x39   : > { %4252 = vmatpush3.bf16.msra.mxu0 %v4249_v59  ;;  %v725_v59 = vmul.f32 %v4439_v3, %v4439_v3 }
  0x3a   : > { %4254 = vmatprep.subr.bf16.mxu0 %v4253_v58 }
  0x3b   : > { %788 = vadd.xlane.f32.xlu0 %v723_v54  ;;  %v728_v54 = vmul.f32 %v4448_v6, %v4448_v6 }
  0x3c   : > { %792 = vadd.xlane.f32.xlu1 %v725_v59  ;;  %v729_v59 = vmul.f32 %v4451_v7, %v4451_v7 }
  0x3d   : > { %4256 = vmatpush3.bf16.msra.mxu0 %v4253_v58  ;;  %v4265_v58 = vpack.c.bf16 %v330_v57, %v329_v56  ;;  %v333_v56 = vld [vmem:[%s7314_s2 + $0x60] sm:$0xff]  ;;  %v334_v57 = vld [vmem:[%s7314_s2 + $0x68] sm:$0xff] }
  0x3e   : > { %4258 = vmatprep.subr.bf16.mxu0 %v4257_v62 }
  0x3f   : > { %794 = vadd.xlane.f32.xlu0 %v726_v61  ;;  %v730_v61 = vmul.f32 %v4454_v8, %v4454_v8 }
  0x40   : > { %796 = vadd.xlane.f32.xlu1 %v727_v60  ;;  %v731_v60 = vmul.f32 %v4457_v9, %v4457_v9 }
  0x41   : > { %4260 = vmatpush3.bf16.msra.mxu0 %v4257_v62  ;;  %v4269_v62 = vpack.c.bf16 %v332_v55, %v331_v63  ;;  %v335_v63 = vld [vmem:[%s7314_s2 + $0x70] sm:$0xff]  ;;  %v336_v55 = vld [vmem:[%s7314_s2 + $0x78] sm:$0xff] }
  0x42   : > { %4262 = vmatprep.subr.bf16.mxu0 %v4261_v0 }
  0x43   : > { %798 = vadd.xlane.f32.xlu0 %v728_v54  ;;  %v732_v54 = vmul.f32 %v4460_v10, %v4460_v10 }
  0x44   : > { %800 = vadd.xlane.f32.xlu1 %v729_v59  ;;  %v733_v59 = vmul.f32 %v4463_v11, %v4463_v11 }
  0x45   : > { %4264 = vmatpush3.bf16.msra.mxu0 %v4261_v0  ;;  %v4273_v0 = vpack.c.bf16 %v334_v57, %v333_v56  ;;  %v736_v56 = vmul.f32 %v4472_v14, %v4472_v14  ;;  %v735_v57 = vmul.f32 %v4469_v13, %v4469_v13 }
  0x46   : > { %4266 = vmatprep.subr.bf16.mxu0 %v4265_v58 }
  0x47   : > { %802 = vadd.xlane.f32.xlu0 %v730_v61  ;;  %v734_v61 = vmul.f32 %v4466_v12, %v4466_v12 }
  0x48   : > { %804 = vadd.xlane.f32.xlu1 %v731_v60  ;;  %v740_v60 = vmul.f32 %v4484_v18, %v4484_v18 }
  0x49   : > { %4268 = vmatpush3.bf16.msra.mxu0 %v4265_v58  ;;  %v4277_v58 = vpack.c.bf16 %v336_v55, %v335_v63  ;;  %v739_v63 = vmul.f32 %v4481_v17, %v4481_v17  ;;  %v741_v55 = vmul.f32 %v4487_v19, %v4487_v19 }
  0x4a   : > { %4270 = vmatprep.subr.bf16.mxu0 %v4269_v62 }
  0x4b   : > { %806 = vadd.xlane.f32.xlu0 %v732_v54  ;;  %v738_v54 = vmul.f32 %v4478_v16, %v4478_v16 }
  0x4c   : > { %808 = vadd.xlane.f32.xlu1 %v733_v59  ;;  %v743_v59 = vmul.f32 %v4493_v21, %v4493_v21 }
  0x4d   : > { %4272 = vmatpush3.bf16.msra.mxu0 %v4269_v62  ;;  %v737_v62 = vmul.f32 %v4475_v15, %v4475_v15 }
  0x4e   : > { %4274 = vmatprep.subr.bf16.mxu0 %v4273_v0 }
  0x4f   : > { %810 = vadd.xlane.f32.xlu0 %v734_v61  ;;  %v744_v61 = vmul.f32 %v4496_v22, %v4496_v22 }
  0x50   : > { %812 = vadd.xlane.f32.xlu1 %v735_v57  ;;  %v748_v57 = vmul.f32 %v4508_v26, %v4508_v26 }
  0x51   : > { %4276 = vmatpush3.bf16.msra.mxu0 %v4273_v0  ;;  %v742_v0 = vmul.f32 %v4490_v20, %v4490_v20 }
  0x52   : > { %4278 = vmatprep.subr.bf16.mxu0 %v4277_v58 }
  0x53   : > { %814 = vadd.xlane.f32.xlu0 %v736_v56  ;;  %v745_v56 = vmul.f32 %v4499_v23, %v4499_v23 }
  0x54   : > { %816 = vadd.xlane.f32.xlu1 %v737_v62  ;;  %v750_v62 = vmul.f32 %v4514_v28, %v4514_v28 }
  0x55   : > { %4280 = vmatpush3.bf16.msra.mxu0 %v4277_v58  ;;  %v746_v58 = vmul.f32 %v4502_v24, %v4502_v24 }
  0x57   : > { %818 = vadd.xlane.f32.xlu0 %v738_v54  ;;  %v747_v54 = vmul.f32 %v4505_v25, %v4505_v25 }
  0x58   : > { %4026 = vmatmul.mubr.f32.vlgmr.msra.gmra.mrb[0].mxu0 %v4433_v1  ;;  %820 = vadd.xlane.f32.xlu1 %v739_v63  ;;  %v752_v63 = vmul.f32 %v4520_v30, %v4520_v30 }
  0x59   : > { %4028 = vmatprep.mubr.f32.mxu0 %v4436_v2 }
  0x5b   : > { %822 = vadd.xlane.f32.xlu0 %v740_v60  ;;  %v749_v60 = vmul.f32 %v4511_v27, %v4511_v27 }
  0x5c   : > { %4029 = vmatmul.mubr.f32.gmra.mrb[2].mxu0 %v4439_v3  ;;  %824 = vadd.xlane.f32.xlu1 %v741_v55  ;;  %v754_v55 = vmul.f32 %v4526_v32, %v4526_v32 }
  0x5d   : > { %4031 = vmatprep.mubr.f32.mxu0 %v4442_v4 }
  0x5f   : > { %826 = vadd.xlane.f32.xlu0 %v742_v0  ;;  %v751_v0 = vmul.f32 %v4517_v29, %v4517_v29 }
  0x60   : > { %4032 = vmatmul.mubr.f32.gmra.mrb[4].mxu0 %v4445_v5  ;;  %828 = vadd.xlane.f32.xlu1 %v743_v59  ;;  %v756_v59 = vmul.f32 %v4532_v34, %v4532_v34 }
  0x61   : > { %4034 = vmatprep.mubr.f32.mxu0 %v4448_v6 }
  0x63   : > { %830 = vadd.xlane.f32.xlu0 %v744_v61  ;;  %v753_v61 = vmul.f32 %v4523_v31, %v4523_v31 }
  0x64   : > { %4035 = vmatmul.mubr.f32.gmra.mrb[6].mxu0 %v4451_v7  ;;  %832 = vadd.xlane.f32.xlu1 %v745_v56  ;;  %v758_v56 = vmul.f32 %v4538_v36, %v4538_v36 }
  0x65   : > { %4037 = vmatprep.mubr.f32.mxu0 %v4454_v8 }
  0x67   : > { %834 = vadd.xlane.f32.xlu0 %v746_v58  ;;  %v755_v58 = vmul.f32 %v4529_v33, %v4529_v33 }
  0x68   : > { %4038 = vmatmul.mubr.f32.gmra.mrb[8].mxu0 %v4457_v9  ;;  %836 = vadd.xlane.f32.xlu1 %v747_v54  ;;  %v760_v54 = vmul.f32 %v4544_v38, %v4544_v38 }
  0x69   : > { %4040 = vmatprep.mubr.f32.mxu0 %v4460_v10 }
  0x6b   : > { %838 = vadd.xlane.f32.xlu0 %v748_v57  ;;  %v757_v57 = vmul.f32 %v4535_v35, %v4535_v35 }
  0x6c   : > { %4041 = vmatmul.mubr.f32.gmra.mrb[10].mxu0 %v4463_v11  ;;  %840 = vadd.xlane.f32.xlu1 %v749_v60  ;;  %v761_v60 = vmul.f32 %v4547_v39, %v4547_v39 }
  0x6d   : > { %4043 = vmatprep.mubr.f32.mxu0 %v4466_v12 }
  0x6f   : > { %842 = vadd.xlane.f32.xlu0 %v750_v62  ;;  %v759_v62 = vmul.f32 %v4541_v37, %v4541_v37 }
  0x70   : > { %4044 = vmatmul.mubr.f32.gmra.mrb[12].mxu0 %v4469_v13  ;;  %844 = vadd.xlane.f32.xlu1 %v751_v0  ;;  %v763_v0 = vmul.f32 %v4553_v41, %v4553_v41 }
  0x71   : > { %4046 = vmatprep.mubr.f32.mxu0 %v4472_v14 }
  0x73   : > { %846 = vadd.xlane.f32.xlu0 %v752_v63  ;;  %v762_v63 = vmul.f32 %v4550_v40, %v4550_v40 }
  0x74   : > { %4047 = vmatmul.mubr.f32.gmra.mrb[14].mxu0 %v4475_v15  ;;  %848 = vadd.xlane.f32.xlu1 %v753_v61  ;;  %v765_v61 = vmul.f32 %v4559_v43, %v4559_v43 }
  0x75   : > { %4049 = vmatprep.mubr.f32.mxu0 %v4478_v16 }
  0x77   : > { %850 = vadd.xlane.f32.xlu0 %v754_v55  ;;  %v764_v55 = vmul.f32 %v4556_v42, %v4556_v42 }
  0x78   : > { %4050 = vmatmul.mubr.f32.gmra.mrb[16].mxu0 %v4481_v17  ;;  %852 = vadd.xlane.f32.xlu1 %v755_v58  ;;  %v767_v58 = vmul.f32 %v4565_v45, %v4565_v45 }
  0x79   : > { %4052 = vmatprep.mubr.f32.mxu0 %v4484_v18 }
  0x7b   : > { %854 = vadd.xlane.f32.xlu0 %v756_v59  ;;  %v766_v59 = vmul.f32 %v4562_v44, %v4562_v44 }
  0x7c   : > { %4053 = vmatmul.mubr.f32.gmra.mrb[18].mxu0 %v4487_v19  ;;  %856 = vadd.xlane.f32.xlu1 %v757_v57  ;;  %v769_v57 = vmul.f32 %v4571_v47, %v4571_v47 }
  0x7d   : > { %4055 = vmatprep.mubr.f32.mxu0 %v4490_v20 }
  0x7f   : > { %858 = vadd.xlane.f32.xlu0 %v758_v56  ;;  %v768_v56 = vmul.f32 %v4568_v46, %v4568_v46 }
  0x80   : > { %4056 = vmatmul.mubr.f32.gmra.mrb[20].mxu0 %v4493_v21  ;;  %860 = vadd.xlane.f32.xlu1 %v759_v62  ;;  %v771_v62 = vmul.f32 %v4577_v49, %v4577_v49 }
  0x81   : > { %4058 = vmatprep.mubr.f32.mxu0 %v4496_v22 }
  0x83   : > { %862 = vadd.xlane.f32.xlu0 %v760_v54  ;;  %v770_v54 = vmul.f32 %v4574_v48, %v4574_v48 }
  0x84   : > { %4059 = vmatmul.mubr.f32.gmra.mrb[22].mxu0 %v4499_v23 }
  0x85   : > { %4061 = vmatprep.mubr.f32.mxu0 %v4502_v24 }
  0x87   : > { %864 = vadd.xlane.f32.xlu0 %v761_v60  ;;  %v772_v60 = vmul.f32 %v4580_v50, %v4580_v50 }
  0x88   : > { %4062 = vmatmul.mubr.f32.gmra.mrb[24].mxu0 %v4505_v25 }
  0x89   : > { %4064 = vmatprep.mubr.f32.mxu0 %v4508_v26 }
  0x8b   : > { %866 = vadd.xlane.f32.xlu0 %v762_v63  ;;  %v773_v63 = vmul.f32 %v4583_v51, %v4583_v51 }
  0x8c   : > { %4065 = vmatmul.mubr.f32.gmra.mrb[26].mxu0 %v4511_v27 }
  0x8d   : > { %4067 = vmatprep.mubr.f32.mxu0 %v4514_v28 }
  0x8f   : > { %868 = vadd.xlane.f32.xlu0 %v763_v0  ;;  %v774_v0 = vmul.f32 %v4586_v52, %v4586_v52 }
  0x90   : > { %4068 = vmatmul.mubr.f32.gmra.mrb[28].mxu0 %v4517_v29 }
  0x91   : > { %4070 = vmatprep.mubr.f32.mxu0 %v4520_v30 }
  0x93   : > { %870 = vadd.xlane.f32.xlu0 %v764_v55  ;;  %v775_v55 = vmul.f32 %v4589_v53, %v4589_v53 }
  0x94   : > { %4071 = vmatmul.mubr.f32.gmra.mrb[30].mxu0 %v4523_v31 }
  0x95   : > { %4073 = vmatprep.mubr.f32.mxu0 %v4526_v32 }
  0x97   : > { %872 = vadd.xlane.f32.xlu0 %v765_v61  ;;  %v7586_v61 = vld [vmem:[#allocation60_spill] sm:$0xff] }
  0x98   : > { %4074 = vmatmul.mubr.f32.gmra.mrb[32].mxu0 %v4529_v33 }
  0x99   : > { %4076 = vmatprep.mubr.f32.mxu0 %v4532_v34 }
  0x9b   : > { %874 = vadd.xlane.f32.xlu0 %v766_v59  ;;  %v776_v59 = vmul.f32 %v7586_v61, %v7586_v61 }
  0x9c   : > { %4077 = vmatmul.mubr.f32.gmra.mrb[34].mxu0 %v4535_v35 }
  0x9d   : > { %4079 = vmatprep.mubr.f32.mxu0 %v4538_v36 }
  0x9f   : > { %876 = vadd.xlane.f32.xlu0 %v767_v58  ;;  %v7587_v58 = vld [vmem:[#allocation61_spill] sm:$0xff] }
  0xa0   : > { %4080 = vmatmul.mubr.f32.gmra.mrb[36].mxu0 %v4541_v37  ;;  %v4912_v37 = vld [vmem:[%s7315_s3] ss:$0 sm:$0xff] }
  0xa1   : > { %4082 = vmatprep.mubr.f32.mxu0 %v4544_v38 }
  0xa3   : > { %878 = vadd.xlane.f32.xlu0 %v768_v56  ;;  %v777_v56 = vmul.f32 %v7587_v58, %v7587_v58 }
  0xa4   : > { %4083 = vmatmul.mubr.f32.gmra.mrb[38].mxu0 %v4547_v39 }
  0xa5   : > { %4085 = vmatprep.mubr.f32.mxu0 %v4550_v40 }
  0xa7   : > { %880 = vadd.xlane.f32.xlu0 %v769_v57 }
  0xa8   : > { %4086 = vmatmul.mubr.f32.gmra.mrb[40].mxu0 %v4553_v41 }
  0xa9   : > { %4088 = vmatprep.mubr.f32.mxu0 %v4556_v42 }
  0xab   : > { %882 = vadd.xlane.f32.xlu0 %v770_v54  ;;  %v7588_v54 = vld [vmem:[#allocation62_spill] sm:$0xff] }
  0xac   : > { %4089 = vmatmul.mubr.f32.gmra.mrb[42].mxu0 %v4559_v43 }
  0xad   : > { %4091 = vmatprep.mubr.f32.mxu0 %v4562_v44 }
  0xaf   : > { %884 = vadd.xlane.f32.xlu0 %v771_v62  ;;  %v778_v62 = vmul.f32 %v7588_v54, %v7588_v54 }
  0xb0   : > { %4092 = vmatmul.mubr.f32.gmra.mrb[44].mxu0 %v4565_v45 }
  0xb1   : > { %4094 = vmatprep.mubr.f32.mxu0 %v4568_v46 }
  0xb3   : > { %886 = vadd.xlane.f32.xlu0 %v772_v60  ;;  %v7589_v60 = vld [vmem:[#allocation63_spill] sm:$0xff] }
  0xb4   : > { %4095 = vmatmul.mubr.f32.gmra.mrb[46].mxu0 %v4571_v47 }
  0xb5   : > { %4097 = vmatprep.mubr.f32.mxu0 %v4574_v48 }
  0xb7   : > { %888 = vadd.xlane.f32.xlu0 %v773_v63 }
  0xb8   : > { %4098 = vmatmul.mubr.f32.gmra.mrb[48].mxu0 %v4577_v49 }
  0xb9   : > { %4100 = vmatprep.mubr.f32.mxu0 %v4580_v50 }
  0xbb   : > { %890 = vadd.xlane.f32.xlu0 %v774_v0  ;;  %v7590_v0 = vld [vmem:[#allocation64_spill] sm:$0xff] }
  0xbc   : > { %4101 = vmatmul.mubr.f32.gmra.mrb[50].mxu0 %v4583_v51 }
  0xbd   : > { %4103 = vmatprep.mubr.f32.mxu0 %v4586_v52 }
  0xbf   : > { %892 = vadd.xlane.f32.xlu0 %v775_v55  ;;  %v779_v55 = vmul.f32 %v7589_v60, %v7589_v60 }
  0xc0   : > { %4104 = vmatmul.mubr.f32.gmra.mrb[52].mxu0 %v4589_v53  ;;  %v7594_v53 = vld [vmem:[#allocation68_spill] sm:$0xff] }
  0xc1   : > { %4106 = vmatprep.mubr.f32.mxu0 %v7586_v61 }
  0xc3   : > { %894 = vadd.xlane.f32.xlu0 %v776_v59  ;;  %v7591_v59 = vld [vmem:[#allocation65_spill] sm:$0xff] }
  0xc4   : > { %4107 = vmatmul.mubr.f32.gmra.mrb[54].mxu0 %v7587_v58  ;;  %v4841_v57 = vpop.xlane.xlu0 %786  ;;  %v7592_v58 = vld [vmem:[#allocation66_spill] sm:$0xff] }
  0xc5   : > { %4109 = vmatprep.mubr.f32.mxu0 %v7588_v54  ;;  %v7593_v54 = vld [vmem:[#allocation67_spill] sm:$0xff]  ;;  %v791_v43 = vpop.xlane.xlu1 %790 }
  0xc7   : > { %896 = vadd.xlane.f32.xlu0 %v777_v56  ;;  %v780_v56 = vmul.f32 %v7590_v0, %v7590_v0 }
  0xc8   : > { %4110 = vmatmul.mubr.f32.gmra.mrb[56].mxu0 %v7589_v60  ;;  %v789_v63 = vpop.xlane.xlu0 %788  ;;  %v7595_v60 = vld [vmem:[#allocation69_spill] sm:$0xff] }
  0xc9   : > { %4112 = vmatprep.mubr.f32.mxu0 %v7590_v0  ;;  %v783_v0 = vmul.f32 %v7593_v54, %v7593_v54  ;;  %v793_v32 = vpop.xlane.xlu1 %792 }
  0xcb   : > { %898 = vadd.xlane.f32.xlu0 %v778_v62  ;;  %v781_v62 = vmul.f32 %v7591_v59, %v7591_v59 }
  0xcc   : > { %4113 = vmatmul.mubr.f32.gmra.mrb[58].mxu0 %v7591_v59  ;;  %v4851_v61 = vpop.xlane.xlu0 %794 }
  0xcd   : > { %4115 = vmatprep.mubr.f32.mxu0 %v7592_v58 }
  0xcf   : > { %900 = vadd.xlane.f32.xlu0 %v779_v55  ;;  %v782_v55 = vmul.f32 %v7592_v58, %v7592_v58 }
  0xd0   : > { %4116 = vmatmul.mubr.f32.gmra.mrb[60].mxu0 %v7593_v54  ;;  %v4857_v52 = vpop.xlane.xlu0 %798 }
  0xd1   : > { %4118 = vmatprep.mubr.f32.mxu0 %v7594_v53 }
  0xd3   : > { %902 = vadd.xlane.f32.xlu0 %v780_v56  ;;  %v784_v56 = vmul.f32 %v7594_v53, %v7594_v53 }
  0xd4   : > { %4119 = vmatmul.mubr.f32.gmra.mrb[62].mxu0 %v7595_v60  ;;  %v4863_v50 = vpop.xlane.xlu0 %802 }
  0xd7   : > { %904 = vadd.xlane.f32.xlu0 %v781_v62  ;;  %v785_v62 = vmul.f32 %v7595_v60, %v7595_v60 }
  0xd8   : > { %v4867_v51 = vpop.xlane.xlu0 %806 }
  0xdb   : > { %906 = vadd.xlane.f32.xlu0 %v782_v55 }
  0xdc   : > { %v4871_v48 = vpop.xlane.xlu0 %810 }
  0xdf   : > { %908 = vadd.xlane.f32.xlu0 %v783_v0 }
  0xe0   : > { %v4875_v59 = vpop.xlane.xlu0 %814 }
  0xe3   : > { %910 = vadd.xlane.f32.xlu0 %v784_v56 }
  0xe4   : > { %v4879_v49 = vpop.xlane.xlu0 %818 }
  0xe7   : > { %912 = vadd.xlane.f32.xlu0 %v785_v62 }
  0xe8   : > { %v4881_v58 = vpop.xlane.xlu0 %822 }
  0xec   : > { %v4883_v55 = vpop.xlane.xlu0 %826 }
  0xf0   : > { %v4885_v54 = vpop.xlane.xlu0 %830 }
  0xf4   : > { %v4887_v46 = vpop.xlane.xlu0 %834 }
  0xf8   : > { %v4889_v0 = vpop.xlane.xlu0 %838 }
  0xfc   : > { %v4891_v53 = vpop.xlane.xlu0 %842 }
 0x100   : > { %v4893_v47 = vpop.xlane.xlu0 %846 }
 0x104   : > { %v4895_v56 = vpop.xlane.xlu0 %850 }
 0x108   : > { %v4897_v60 = vpop.xlane.xlu0 %854 }
 0x10c   : > { %v4899_v44 = vpop.xlane.xlu0 %858 }
 0x110   : > { %v4901_v62 = vpop.xlane.xlu0 %862 }
 0x114   : > { %v4903_v45 = vpop.xlane.xlu0 %864 }
 0x118   : > { %v4905_v42 = vpop.xlane.xlu0 %866 }
 0x11c   : > { %v4907_v40 = vpop.xlane.xlu0 %868 }
 0x120   : > { %v4918_v29 = vpop.xlane.xlu0 %870 }
 0x12b   : > { %v4027_v41 = vpop.f32.mrb[0].mxu0 }
 0x12c   : > { %v915_v38 = vmul.f32 2.0, %v4027_v41  ;;  %v403_v39 = vpop.f32.mrb[1].mxu0 }
 0x12d   : > { %v914_v36 = vmul.f32 2.0, %v403_v39 }
 0x12e   : > { %v979_v34 = vsub.f32 %v789_v63, %v915_v38 }
 0x12f   : > { %v4030_v35 = vpop.f32.mrb[2].mxu0  ;;  %v978_v33 = vsub.f32 %v4841_v57, %v914_v36  ;;  %v4928_v36 = vpop.xlane.xlu0 %872 }
 0x130   : > { %v917_v30 = vmul.f32 2.0, %v4030_v35  ;;  %v413_v31 = vpop.f32.mrb[3].mxu0  ;;  %v4916_v28 = vadd.f32 %v4912_v37, %v979_v34  ;;  %v797_v57 = vpop.xlane.xlu1 %796 }
 0x131   : > { %v916_v26 = vmul.f32 2.0, %v413_v31  ;;  %v4922_v24 = vadd.f32 %v4912_v37, %v978_v33 }
 0x132   : > { %1115 = vmin.xlane.f32.xlu1 %v4916_v28  ;;  %v981_v39 = vsub.f32 %v793_v32, %v917_v30 }
 0x133   : > { %v4033_v41 = vpop.f32.mrb[4].mxu0  ;;  %v980_v63 = vsub.f32 %v791_v43, %v916_v26 }
 0x134   : > { %v423_v27 = vpop.f32.mrb[5].mxu0  ;;  %v919_v38 = vmul.f32 2.0, %v4033_v41  ;;  %v4926_v35 = vadd.f32 %v4912_v37, %v981_v39  ;;  %v4934_v41 = vpop.xlane.xlu0 %874 }
 0x135   : > { %v918_v32 = vmul.f32 2.0, %v423_v27  ;;  %v4932_v33 = vadd.f32 %v4912_v37, %v980_v63  ;;  %v801_v26 = vpop.xlane.xlu1 %800 }
 0x136   : > { %1113 = vmin.xlane.f32.xlu1 %v4922_v24  ;;  %v983_v30 = vsub.f32 %v797_v57, %v919_v38 }
 0x137   : > { %v4036_v34 = vpop.f32.mrb[6].mxu0  ;;  %v982_v43 = vsub.f32 %v4851_v61, %v918_v32 }
 0x138   : > { %v433_v25 = vpop.f32.mrb[7].mxu0  ;;  %v921_v23 = vmul.f32 2.0, %v4036_v34  ;;  %v4938_v39 = vadd.f32 %v4912_v37, %v983_v30  ;;  %v4942_v38 = vpop.xlane.xlu0 %876 }
 0x139   : > { %v920_v63 = vmul.f32 2.0, %v433_v25  ;;  %v4945_v34 = vadd.f32 %v4912_v37, %v982_v43  ;;  %v805_v61 = vpop.xlane.xlu1 %804 }
 0x13a   : > { %1119 = vmin.xlane.f32.xlu1 %v4926_v35  ;;  %v985_v27 = vsub.f32 %v801_v26, %v921_v23 }
 0x13b   : > { %v4039_v31 = vpop.f32.mrb[8].mxu0  ;;  %v984_v32 = vsub.f32 %v4857_v52, %v920_v63 }
 0x13c   : > { %v443_v22 = vpop.f32.mrb[9].mxu0  ;;  %v923_v19 = vmul.f32 2.0, %v4039_v31  ;;  %v4949_v30 = vadd.f32 %v4912_v37, %v985_v27  ;;  %v4952_v23 = vpop.xlane.xlu0 %878 }
 0x13d   : > { %v922_v14 = vmul.f32 2.0, %v443_v22  ;;  %v4958_v31 = vadd.f32 %v4912_v37, %v984_v32  ;;  %v809_v12 = vpop.xlane.xlu1 %808 }
 0x13e   : > { %1117 = vmin.xlane.f32.xlu1 %v4932_v33  ;;  %v987_v25 = vsub.f32 %v805_v61, %v923_v19 }
 0x13f   : > { %v4042_v20 = vpop.f32.mrb[10].mxu0  ;;  %v986_v19 = vsub.f32 %v4863_v50, %v922_v14 }
 0x140   : > { %v453_v21 = vpop.f32.mrb[11].mxu0  ;;  %v925_v15 = vmul.f32 2.0, %v4042_v20  ;;  %v4962_v27 = vadd.f32 %v4912_v37, %v987_v25  ;;  %v4964_v52 = vpop.xlane.xlu0 %880 }
 0x141   : > { %v924_v20 = vmul.f32 2.0, %v453_v21  ;;  %v4977_v25 = vadd.f32 %v4912_v37, %v986_v19  ;;  %v813_v8 = vpop.xlane.xlu1 %812 }
 0x142   : > { %1123 = vmin.xlane.f32.xlu1 %v4938_v39  ;;  %v989_v22 = vsub.f32 %v809_v12, %v925_v15 }
 0x143   : > { %v4045_v57 = vpop.f32.mrb[12].mxu0  ;;  %v988_v12 = vsub.f32 %v4867_v51, %v924_v20 }
 0x144   : > { %v463_v18 = vpop.f32.mrb[13].mxu0  ;;  %v4979_v10 = vpop.xlane.xlu0 %882  ;;  %v927_v11 = vmul.f32 2.0, %v4045_v57  ;;  %v4983_v14 = vadd.f32 %v4912_v37, %v989_v22 }
 0x145   : > { %v926_v57 = vmul.f32 2.0, %v463_v18  ;;  %v4998_v22 = vadd.f32 %v4912_v37, %v988_v12  ;;  %v817_v4 = vpop.xlane.xlu1 %816 }
 0x146   : > { %1121 = vmin.xlane.f32.xlu1 %v4945_v34  ;;  %7596 = vst [vmem:[#allocation70_spill] sm:$0xff] %v4983_v14  ;;  %v991_v21 = vsub.f32 %v813_v8, %v927_v11 }
 0x147   : > { %v4048_v16 = vpop.f32.mrb[14].mxu0  ;;  %7597 = vst [vmem:[#allocation71_spill] sm:$0xff] %v4998_v22  ;;  %v990_v8 = vsub.f32 %v4871_v48, %v926_v57 }
 0x148   : > { %v473_v17 = vpop.f32.mrb[15].mxu0  ;;  %v4991_v19 = vpop.xlane.xlu0 %884  ;;  %v929_v7 = vmul.f32 2.0, %v4048_v16  ;;  %v5002_v51 = vadd.f32 %v4912_v37, %v991_v21 }
 0x149   : > { %v928_v3 = vmul.f32 2.0, %v473_v17  ;;  %v5014_v21 = vadd.f32 %v4912_v37, %v990_v8 }
 0x14a   : > { %1127 = vmin.xlane.f32.xlu1 %v4949_v30  ;;  %v993_v2 = vsub.f32 %v817_v4, %v929_v7 }
 0x14b   : > { %v4051_v26 = vpop.f32.mrb[16].mxu0 }
 0x14c   : > { %v4955_v43 = vpop.f32.mrb[17].mxu0  ;;  %v5007_v5 = vpop.xlane.xlu0 %886  ;;  %v931_v48 = vmul.f32 2.0, %v4051_v26  ;;  %v5021_v57 = vadd.f32 %v4912_v37, %v993_v2 }
 0x14e   : > { %1125 = vmin.xlane.f32.xlu1 %v4958_v31 }
 0x14f   : > { %v4966_v63 = vpop.f32.mrb[18].mxu0 }
 0x150   : > { %v4969_v61 = vpop.f32.mrb[19].mxu0  ;;  %v5023_v4 = vpop.xlane.xlu0 %888 }
 0x152   : > { %1131 = vmin.xlane.f32.xlu1 %v4962_v27 }
 0x153   : > { %v4972_v32 = vpop.f32.mrb[20].mxu0 }
 0x154   : > { %v4974_v13 = vpop.f32.mrb[21].mxu0 }
 0x156   : > { %1129 = vmin.xlane.f32.xlu1 %v4977_v25 }
 0x157   : > { %v4985_v50 = vpop.f32.mrb[22].mxu0 }
 0x158   : > { %v4988_v15 = vpop.f32.mrb[23].mxu0 }
 0x15a   : > { %1135 = vmin.xlane.f32.xlu1 %v4983_v14 }
 0x15b   : > { %v4993_v9 = vpop.f32.mrb[24].mxu0 }
 0x15c   : > { %v4995_v6 = vpop.f32.mrb[25].mxu0 }
 0x15e   : > { %1133 = vmin.xlane.f32.xlu1 %v4998_v22 }
 0x15f   : > { %v5004_v20 = vpop.f32.mrb[26].mxu0 }
 0x160   : > { %v533_v11 = vpop.f32.mrb[27].mxu0 }
 0x161   : > { %v940_v18 = vmul.f32 2.0, %v533_v11 }
 0x162   : > { %1139 = vmin.xlane.f32.xlu1 %v5002_v51 }
 0x163   : > { %v1004_v12 = vsub.f32 %v4889_v0, %v940_v18  ;;  %v5011_v16 = vpop.f32.mrb[28].mxu0  ;;  %v821_v0 = vpop.xlane.xlu1 %820 }
 0x164   : > { %v543_v1 = vpop.f32.mrb[29].mxu0  ;;  %v995_v2 = vsub.f32 %v821_v0, %v931_v48  ;;  %v933_v48 = vmul.f32 2.0, %v4966_v63 }
 0x165   : > { %v942_v14 = vmul.f32 2.0, %v543_v1  ;;  %v5017_v22 = vadd.f32 %v4912_v37, %v1004_v12  ;;  %v992_v1 = vsub.f32 %v4875_v59, %v928_v3  ;;  %v5042_v3 = vpop.xlane.xlu0 %890 }
 0x166   : > { %1137 = vmin.xlane.f32.xlu1 %v5014_v21 }
 0x167   : > { %7598 = vst [vmem:[#allocation72_spill] sm:$0xff] %v5017_v22  ;;  %v1006_v7 = vsub.f32 %v4891_v53, %v942_v14  ;;  %1165 = vmin.xlane.f32.xlu0 %v5017_v22  ;;  %v5027_v17 = vpop.f32.mrb[30].mxu0  ;;  %v930_v14 = vmul.f32 2.0, %v4955_v43  ;;  %v5040_v22 = vadd.f32 %v4912_v37, %v992_v1  ;;  %v825_v1 = vpop.xlane.xlu1 %824 }
 0x168   : > { %v553_v8 = vpop.f32.mrb[31].mxu0  ;;  %v997_v63 = vsub.f32 %v825_v1, %v933_v48  ;;  %v935_v48 = vmul.f32 2.0, %v4972_v32 }
 0x169   : > { %v944_v11 = vmul.f32 2.0, %v553_v8  ;;  %v5031_v26 = vadd.f32 %v4912_v37, %v1006_v7  ;;  %v994_v8 = vsub.f32 %v4879_v49, %v930_v14 }
 0x16a   : > { %1143 = vmin.xlane.f32.xlu1 %v5021_v57 }
 0x16b   : > { %7599 = vst [vmem:[#allocation73_spill] sm:$0xff] %v5031_v26  ;;  %v1008_v18 = vsub.f32 %v4893_v47, %v944_v11  ;;  %1169 = vmin.xlane.f32.xlu0 %v5031_v26  ;;  %v5036_v53 = vpop.f32.mrb[32].mxu0  ;;  %v5050_v47 = vadd.f32 %v4912_v37, %v995_v2  ;;  %v5061_v26 = vpop.xlane.xlu0 %892  ;;  %v5069_v49 = vadd.f32 %v4912_v37, %v994_v8 }
 0x16c   : > { %v563_v12 = vpop.f32.mrb[33].mxu0 }
 0x16d   : > { %v946_v59 = vmul.f32 2.0, %v563_v12  ;;  %v5045_v7 = vadd.f32 %v4912_v37, %v1008_v18 }
 0x16e   : > { %1141 = vmin.xlane.f32.xlu1 %v5040_v22 }
 0x16f   : > { %7600 = vst [vmem:[#allocation74_spill] sm:$0xff] %v5045_v7  ;;  %v1010_v0 = vsub.f32 %v4895_v56, %v946_v59  ;;  %1173 = vmin.xlane.f32.xlu0 %v5045_v7  ;;  %v5054_v43 = vpop.f32.mrb[34].mxu0  ;;  %v932_v59 = vmul.f32 2.0, %v4969_v61 }
 0x170   : > { %v573_v11 = vpop.f32.mrb[35].mxu0 }
 0x171   : > { %v948_v12 = vmul.f32 2.0, %v573_v11  ;;  %v5058_v18 = vadd.f32 %v4912_v37, %v1010_v0  ;;  %v829_v11 = vpop.xlane.xlu1 %828  ;;  %v996_v8 = vsub.f32 %v4881_v58, %v932_v59 }
 0x172   : > { %1147 = vmin.xlane.f32.xlu1 %v5050_v47 }
 0x173   : > { %7601 = vst [vmem:[#allocation75_spill] sm:$0xff] %v5058_v18  ;;  %v1012_v2 = vsub.f32 %v4897_v60, %v948_v12  ;;  %1177 = vmin.xlane.f32.xlu0 %v5058_v18  ;;  %v5065_v56 = vpop.f32.mrb[36].mxu0  ;;  %v5077_v60 = vadd.f32 %v4912_v37, %v997_v63  ;;  %v5084_v12 = vpop.xlane.xlu0 %894  ;;  %v999_v63 = vsub.f32 %v829_v11, %v935_v48 }
 0x174   : > { %v583_v7 = vpop.f32.mrb[37].mxu0  ;;  %v5096_v58 = vadd.f32 %v4912_v37, %v996_v8 }
 0x175   : > { %v950_v14 = vmul.f32 2.0, %v583_v7  ;;  %v5072_v0 = vadd.f32 %v4912_v37, %v1012_v2  ;;  %7603 = vst [vmem:[#allocation77_spill] sm:$0xff] %v5077_v60 }
 0x176   : > { %1145 = vmin.xlane.f32.xlu1 %v5069_v49 }
 0x177   : > { %7602 = vst [vmem:[#allocation76_spill] sm:$0xff] %v5072_v0  ;;  %v1014_v1 = vsub.f32 %v4899_v44, %v950_v14  ;;  %1181 = vmin.xlane.f32.xlu0 %v5072_v0  ;;  %v5081_v61 = vpop.f32.mrb[38].mxu0  ;;  %v934_v14 = vmul.f32 2.0, %v4974_v13  ;;  %v5106_v48 = vpop.xlane.xlu0 %896 }
 0x178   : > { %v593_v7 = vpop.f32.mrb[39].mxu0 }
 0x179   : > { %v952_v2 = vmul.f32 2.0, %v593_v7  ;;  %v5087_v32 = vadd.f32 %v4912_v37, %v1014_v1  ;;  %v833_v1 = vpop.xlane.xlu1 %832 }
 0x17a   : > { %1151 = vmin.xlane.f32.xlu1 %v5077_v60  ;;  %v937_v60 = vmul.f32 2.0, %v4985_v50 }
 0x17b   : > { %7604 = vst [vmem:[#allocation78_spill] sm:$0xff] %v5087_v32  ;;  %v1016_v18 = vsub.f32 %v4901_v62, %v952_v2  ;;  %1185 = vmin.xlane.f32.xlu0 %v5087_v32  ;;  %v5092_v44 = vpop.f32.mrb[40].mxu0  ;;  %v5104_v62 = vadd.f32 %v4912_v37, %v999_v63 }
 0x17c   : > { %v603_v0 = vpop.f32.mrb[41].mxu0  ;;  %v1001_v63 = vsub.f32 %v833_v1, %v937_v60  ;;  %v939_v60 = vmul.f32 2.0, %v4993_v9 }
 0x17d   : > { %v954_v59 = vmul.f32 2.0, %v603_v0  ;;  %v5099_v7 = vadd.f32 %v4912_v37, %v1016_v18  ;;  %7606 = vst [vmem:[#allocation80_spill] sm:$0xff] %v5104_v62  ;;  %v998_v0 = vsub.f32 %v4883_v55, %v934_v14  ;;  %v837_v50 = vpop.xlane.xlu1 %836  ;;  %v5125_v14 = vpop.xlane.xlu0 %898 }
 0x17e   : > { %1149 = vmin.xlane.f32.xlu1 %v5096_v58  ;;  %v1003_v9 = vsub.f32 %v837_v50, %v939_v60  ;;  %v941_v50 = vmul.f32 2.0, %v5004_v20 }
 0x17f   : > { %7605 = vst [vmem:[#allocation79_spill] sm:$0xff] %v5099_v7  ;;  %v1018_v13 = vsub.f32 %v4905_v42, %v954_v59  ;;  %1189 = vmin.xlane.f32.xlu0 %v5099_v7  ;;  %v5110_v11 = vpop.f32.mrb[42].mxu0  ;;  %v936_v59 = vmul.f32 2.0, %v4988_v15  ;;  %v5123_v55 = vadd.f32 %v4912_v37, %v998_v0 }
 0x180   : > { %v613_v18 = vpop.f32.mrb[43].mxu0 }
 0x181   : > { %v956_v8 = vmul.f32 2.0, %v613_v18  ;;  %v5114_v2 = vadd.f32 %v4912_v37, %v1018_v13  ;;  %v1000_v0 = vsub.f32 %v4885_v54, %v936_v59 }
 0x182   : > { %1155 = vmin.xlane.f32.xlu1 %v5104_v62  ;;  %v841_v62 = vpop.xlane.xlu1 %840 }
 0x183   : > { %7607 = vst [vmem:[#allocation81_spill] sm:$0xff] %v5114_v2  ;;  %v1020_v32 = vsub.f32 %v4918_v29, %v956_v8  ;;  %1193 = vmin.xlane.f32.xlu0 %v5114_v2  ;;  %v5119_v42 = vpop.f32.mrb[44].mxu0  ;;  %v5133_v29 = vadd.f32 %v4912_v37, %v1001_v63  ;;  %v5144_v2 = vpop.xlane.xlu0 %900  ;;  %v5152_v59 = vadd.f32 %v4912_v37, %v1000_v0 }
 0x184   : > { %v623_v7 = vpop.f32.mrb[45].mxu0 }
 0x185   : > { %v958_v13 = vmul.f32 2.0, %v623_v7  ;;  %v5128_v18 = vadd.f32 %v4912_v37, %v1020_v32  ;;  %7610 = vst [vmem:[#allocation84_spill] sm:$0xff] %v5152_v59 }
 0x186   : > { %1153 = vmin.xlane.f32.xlu1 %v5123_v55 }
 0x187   : > { %7608 = vst [vmem:[#allocation82_spill] sm:$0xff] %v5128_v18  ;;  %v1022_v15 = vsub.f32 %v4934_v41, %v958_v13  ;;  %1197 = vmin.xlane.f32.xlu0 %v5128_v18  ;;  %v5137_v1 = vpop.f32.mrb[46].mxu0  ;;  %v845_v13 = vpop.xlane.xlu1 %844  ;;  %v938_v18 = vmul.f32 2.0, %v4995_v6 }
 0x188   : > { %v633_v7 = vpop.f32.mrb[47].mxu0 }
 0x189   : > { %v960_v8 = vmul.f32 2.0, %v633_v7  ;;  %v5141_v32 = vadd.f32 %v4912_v37, %v1022_v15  ;;  %v1002_v0 = vsub.f32 %v4887_v46, %v938_v18 }
 0x18a   : > { %1159 = vmin.xlane.f32.xlu1 %v5133_v29 }
 0x18b   : > { %7609 = vst [vmem:[#allocation83_spill] sm:$0xff] %v5141_v32  ;;  %v1024_v63 = vsub.f32 %v4952_v23, %v960_v8  ;;  %1201 = vmin.xlane.f32.xlu0 %v5141_v32  ;;  %v5148_v41 = vpop.f32.mrb[48].mxu0  ;;  %v5160_v23 = vadd.f32 %v4912_v37, %v1003_v9  ;;  %v849_v20 = vpop.xlane.xlu1 %848  ;;  %v1005_v9 = vsub.f32 %v841_v62, %v941_v50 }
 0x18c   : > { %v643_v54 = vpop.f32.mrb[49].mxu0  ;;  %v5177_v46 = vadd.f32 %v4912_v37, %v1002_v0 }
 0x18d   : > { %v962_v15 = vmul.f32 2.0, %v643_v54  ;;  %v5155_v7 = vadd.f32 %v4912_v37, %v1024_v63  ;;  %v903_v54 = vpop.xlane.xlu0 %902  ;;  %v5185_v62 = vadd.f32 %v4912_v37, %v1005_v9 }
 0x18e   : > { %1157 = vmin.xlane.f32.xlu1 %v5152_v59  ;;  %v943_v59 = vmul.f32 2.0, %v5011_v16  ;;  %7613 = vst [vmem:[#allocation87_spill] sm:$0xff] %v5177_v46 }
 0x18f   : > { %7611 = vst [vmem:[#allocation85_spill] sm:$0xff] %v5155_v7  ;;  %v1026_v60 = vsub.f32 %v4979_v10, %v962_v15  ;;  %1205 = vmin.xlane.f32.xlu0 %v5155_v7  ;;  %v5164_v6 = vpop.f32.mrb[50].mxu0 }
 0x190   : > { %v653_v8 = vpop.f32.mrb[51].mxu0  ;;  %v1007_v16 = vsub.f32 %v845_v13, %v943_v59 }
 0x191   : > { %v964_v32 = vmul.f32 2.0, %v653_v8  ;;  %v5168_v63 = vadd.f32 %v4912_v37, %v1026_v60  ;;  %v945_v8 = vmul.f32 2.0, %v5027_v17  ;;  %v947_v17 = vmul.f32 2.0, %v5036_v53 }
 0x192   : > { %1163 = vmin.xlane.f32.xlu1 %v5160_v23  ;;  %v5199_v59 = vadd.f32 %v4912_v37, %v1007_v16  ;;  %v949_v53 = vmul.f32 2.0, %v5054_v43 }
 0x193   : > { %7612 = vst [vmem:[#allocation86_spill] sm:$0xff] %v5168_v63  ;;  %v1028_v10 = vsub.f32 %v5007_v5, %v964_v32  ;;  %1209 = vmin.xlane.f32.xlu0 %v5168_v63  ;;  %v5174_v15 = vpop.f32.mrb[52].mxu0  ;;  %v5187_v5 = vpop.xlane.xlu0 %904  ;;  %v1009_v13 = vsub.f32 %v849_v20, %v945_v8 }
 0x194   : > { %v663_v7 = vpop.f32.mrb[53].mxu0 }
 0x195   : > { %v966_v18 = vmul.f32 2.0, %v663_v7  ;;  %v5180_v60 = vadd.f32 %v4912_v37, %v1028_v10  ;;  %v853_v7 = vpop.xlane.xlu1 %852  ;;  %v5211_v8 = vadd.f32 %v4912_v37, %v1009_v13 }
 0x196   : > { %1161 = vmin.xlane.f32.xlu1 %v5177_v46  ;;  %v1011_v20 = vsub.f32 %v853_v7, %v947_v17 }
 0x197   : > { %7614 = vst [vmem:[#allocation88_spill] sm:$0xff] %v5180_v60  ;;  %v1030_v32 = vsub.f32 %v5042_v3, %v966_v18  ;;  %1213 = vmin.xlane.f32.xlu0 %v5180_v60  ;;  %v5191_v50 = vpop.f32.mrb[54].mxu0  ;;  %v907_v60 = vpop.xlane.xlu0 %906  ;;  %7617 = vst [vmem:[#allocation91_spill] sm:$0xff] %v5211_v8 }
 0x198   : > { %v673_v0 = vpop.f32.mrb[55].mxu0  ;;  %v5225_v17 = vadd.f32 %v4912_v37, %v1011_v20  ;;  %v953_v20 = vmul.f32 2.0, %v5081_v61 }
 0x199   : > { %v968_v10 = vmul.f32 2.0, %v673_v0  ;;  %v5194_v63 = vadd.f32 %v4912_v37, %v1030_v32  ;;  %v857_v46 = vpop.xlane.xlu1 %856 }
 0x19a   : > { %1167 = vmin.xlane.f32.xlu1 %v5185_v62  ;;  %v1013_v43 = vsub.f32 %v857_v46, %v949_v53 }
 0x19b   : > { %7615 = vst [vmem:[#allocation89_spill] sm:$0xff] %v5194_v63  ;;  %v1032_v3 = vsub.f32 %v5084_v12, %v968_v10  ;;  %1217 = vmin.xlane.f32.xlu0 %v5194_v63  ;;  %v5203_v9 = vpop.f32.mrb[56].mxu0  ;;  %v951_v63 = vmul.f32 2.0, %v5065_v56  ;;  %v5222_v7 = vpop.xlane.xlu0 %908 }
 0x19c   : > { %v683_v18 = vpop.f32.mrb[57].mxu0  ;;  %v5234_v56 = vadd.f32 %v4912_v37, %v1013_v43 }
 0x19d   : > { %v970_v0 = vmul.f32 2.0, %v683_v18  ;;  %v5206_v32 = vadd.f32 %v4912_v37, %v1032_v3 }
 0x19e   : > { %1171 = vmin.xlane.f32.xlu1 %v5199_v59 }
 0x19f   : > { %7616 = vst [vmem:[#allocation90_spill] sm:$0xff] %v5206_v32  ;;  %v1034_v12 = vsub.f32 %v5125_v14, %v970_v0  ;;  %1221 = vmin.xlane.f32.xlu0 %v5206_v32  ;;  %v5215_v16 = vpop.f32.mrb[58].mxu0  ;;  %v861_v0 = vpop.xlane.xlu1 %860 }
 0x1a0   : > { %v693_v10 = vpop.f32.mrb[59].mxu0  ;;  %v1015_v46 = vsub.f32 %v861_v0, %v951_v63  ;;  %v1017_v63 = vsub.f32 %v4903_v45, %v953_v20  ;;  %v957_v0 = vmul.f32 2.0, %v5110_v11  ;;  %v7416_v20 = vlaneseq }
 0x1a1   : > { %v972_v18 = vmul.f32 2.0, %v693_v10  ;;  %v5218_v3 = vadd.f32 %v4912_v37, %v1034_v12 }
 0x1a2   : > { %1175 = vmin.xlane.f32.xlu1 %v5211_v8  ;;  %v1021_v45 = vsub.f32 %v4928_v36, %v957_v0  ;;  %v963_v36 = vmul.f32 2.0, %v5148_v41 }
 0x1a3   : > { %7618 = vst [vmem:[#allocation92_spill] sm:$0xff] %v5218_v3  ;;  %v1036_v14 = vsub.f32 %v903_v54, %v972_v18  ;;  %1225 = vmin.xlane.f32.xlu0 %v5218_v3  ;;  %v5228_v13 = vpop.f32.mrb[60].mxu0  ;;  %v911_v3 = vpop.xlane.xlu0 %910 }
 0x1a4   : > { %v703_v10 = vpop.f32.mrb[61].mxu0  ;;  %v5271_v11 = vadd.f32 %v4912_v37, %v1021_v45 }
 0x1a5   : > { %v974_v32 = vmul.f32 2.0, %v703_v10  ;;  %v5231_v12 = vadd.f32 %v4912_v37, %v1036_v14  ;;  %v5245_v14 = vadd.f32 %v4912_v37, %v1015_v46  ;;  %v5259_v46 = vadd.f32 %v4912_v37, %v1017_v63 }
 0x1a6   : > { %1179 = vmin.xlane.f32.xlu1 %v5225_v17 }
 0x1a7   : > { %v1038_v53 = vsub.f32 %v907_v60, %v974_v32  ;;  %1229 = vmin.xlane.f32.xlu0 %v5231_v12  ;;  %v5238_v54 = vpop.f32.mrb[62].mxu0  ;;  %v955_v60 = vmul.f32 2.0, %v5092_v44  ;;  %v959_v44 = vmul.f32 2.0, %v5119_v42 }
 0x1a8   : > { %v713_v18 = vpop.f32.mrb[63].mxu0 }
 0x1a9   : > { %v976_v8 = vmul.f32 2.0, %v713_v18  ;;  %v5242_v10 = vadd.f32 %v4912_v37, %v1038_v53  ;;  %v1019_v32 = vsub.f32 %v4907_v40, %v955_v60  ;;  %v961_v40 = vmul.f32 2.0, %v5137_v1 }
 0x1aa   : > { %1183 = vmin.xlane.f32.xlu1 %v5234_v56  ;;  %v965_v1 = vmul.f32 2.0, %v5164_v6  ;;  %v967_v60 = vmul.f32 2.0, %v5174_v15 }
 0x1ab   : > { %v1040_v43 = vsub.f32 %v911_v3, %v976_v8  ;;  %1233 = vmin.xlane.f32.xlu0 %v5242_v10  ;;  %v5265_v8 = vadd.f32 %v4912_v37, %v1019_v32  ;;  %v1023_v3 = vsub.f32 %v4942_v38, %v959_v44  ;;  %v1025_v53 = vsub.f32 %v4964_v52, %v961_v40 }
 0x1ac   : > { %v1027_v38 = vsub.f32 %v4991_v19, %v963_v36  ;;  %v5287_v52 = vand.u32 127, %v7416_v20  ;;  %v1029_v63 = vsub.f32 %v5023_v4, %v965_v1  ;;  %v1031_v45 = vsub.f32 %v5061_v26, %v967_v60 }
 0x1ad   : > { %v5252_v61 = vadd.f32 %v4912_v37, %v1040_v43  ;;  %v5277_v42 = vadd.f32 %v4912_v37, %v1023_v3  ;;  %v5283_v43 = vadd.f32 %v4912_v37, %v1025_v53  ;;  %v969_v44 = vmul.f32 2.0, %v5191_v50 }
 0x1ae   : > { %1187 = vmin.xlane.f32.xlu1 %v5245_v14  ;;  %7619 = vst [vmem:[#allocation93_spill] sm:$0xff] %v5287_v52  ;;  %v5293_v32 = vadd.f32 %v4912_v37, %v1027_v38  ;;  %v5303_v4 = vadd.f32 %v4912_v37, %v1029_v63  ;;  %v971_v40 = vmul.f32 2.0, %v5203_v9  ;;  %v5313_v26 = vadd.f32 %v4912_v37, %v1031_v45 }
 0x1af   : > { %1237 = vmin.xlane.f32.xlu0 %v5252_v61  ;;  %v1033_v3 = vsub.f32 %v5106_v48, %v969_v44  ;;  %v973_v1 = vmul.f32 2.0, %v5215_v16  ;;  %v975_v63 = vmul.f32 2.0, %v5228_v13  ;;  %v977_v60 = vmul.f32 2.0, %v5238_v54  ;;  %v913_v44 = vpop.xlane.xlu0 %912 }
 0x1b0   : > { %v1035_v38 = vsub.f32 %v5144_v2, %v971_v40 }
 0x1b1   : > { %v5323_v48 = vadd.f32 %v4912_v37, %v1033_v3  ;;  %v1041_v54 = vsub.f32 %v913_v44, %v977_v60  ;;  %v7620_v44 = vld [vmem:[#allocation71_spill] sm:$0xff] }
 0x1b2   : > { %1191 = vmin.xlane.f32.xlu1 %v5259_v46  ;;  %v5333_v2 = vadd.f32 %v4912_v37, %v1035_v38 }
 0x1b6   : > { %1195 = vmin.xlane.f32.xlu1 %v5265_v8 }
 0x1ba   : > { %1199 = vmin.xlane.f32.xlu1 %v5271_v11 }
 0x1be   : > { %1203 = vmin.xlane.f32.xlu1 %v5277_v42 }
 0x1bf   : > { %v1116_v18 = vpop.xlane.xlu1 %1115 }
 0x1c0   : > { %vm1244_vm3 = vcmp.eq.f32.partialorder %v4916_v28, %v1116_v18  ;;  %v5363_v18 = vadd.f32 %v4912_v37, %v1041_v54 }
 0x1c2   : > { %1207 = vmin.xlane.f32.xlu1 %v5283_v43 }
 0x1c3   : > { %v1114_v41 = vpop.xlane.xlu1 %1113 }
 0x1c4   : > { %vm1243_vm0 = vcmp.eq.f32.partialorder %v4922_v24, %v1114_v41  ;;  %v1037_v41 = vsub.f32 %v5187_v5, %v973_v1  ;;  %v1039_v5 = vsub.f32 %v5222_v7, %v975_v63  ;;  %v5355_v7 = vsel %vm1244_vm3, %v5287_v52, 128 }
 0x1c5   : > { %v5296_v19 = vsel %vm1243_vm0, %v5287_v52, 128  ;;  %v1386_v38 = vshra.s32 %v5355_v7, 16 }
 0x1c6   : > { %v1372_v6 = vshra.s32 %v5296_v19, 16  ;;  %1211 = vmin.xlane.f32.xlu1 %v5293_v32  ;;  %v5343_v13 = vadd.f32 %v4912_v37, %v1037_v41  ;;  %v5351_v3 = vadd.f32 %v4912_v37, %v1039_v5 }
 0x1c7   : > { %v1120_v0 = vpop.xlane.xlu1 %1119 }
 0x1c8   : > { %v5305_v15 = vcvt.s32.f32 %v1372_v6  ;;  %vm1246_vm5 = vcmp.eq.f32.partialorder %v4926_v35, %v1120_v0  ;;  %v5377_v0 = vcvt.s32.f32 %v1386_v38 }
 0x1ca   : > { %1215 = vmin.xlane.f32.xlu1 %v5303_v4  ;;  %1375 = vmin.xlane.f32.xlu0 %v5305_v15 }
 0x1cb   : > { %v1118_v24 = vpop.xlane.xlu1 %1117 }
 0x1cc   : > { %vm1245_vm1 = vcmp.eq.f32.partialorder %v4932_v33, %v1118_v24 }
 0x1cd   : > { %v5316_v50 = vsel %vm1245_vm1, %v5287_v52, 128 }
 0x1ce   : > { %v1400_v53 = vshra.s32 %v5316_v50, 16  ;;  %1219 = vmin.xlane.f32.xlu1 %v5313_v26 }
 0x1cf   : > { %v1124_v36 = vpop.xlane.xlu1 %1123 }
 0x1d0   : > { %v5325_v9 = vcvt.s32.f32 %v1400_v53  ;;  %vm1248_vm6 = vcmp.eq.f32.partialorder %v4938_v39, %v1124_v36 }
 0x1d2   : > { %1223 = vmin.xlane.f32.xlu1 %v5323_v48  ;;  %1403 = vmin.xlane.f32.xlu0 %v5325_v9 }
 0x1d3   : > { %v1122_v33 = vpop.xlane.xlu1 %1121 }
 0x1d4   : > { %vm1247_vm2 = vcmp.eq.f32.partialorder %v4945_v34, %v1122_v33  ;;  %v5380_v33 = vsel %vm1248_vm6, %v5287_v52, 128 }
 0x1d5   : > { %v5336_v16 = vsel %vm1247_vm2, %v5287_v52, 128  ;;  %v1442_v63 = vshra.s32 %v5380_v33, 16 }
 0x1d6   : > { %v1428_v6 = vshra.s32 %v5336_v16, 16  ;;  %1227 = vmin.xlane.f32.xlu1 %v5333_v2 }
 0x1d7   : > { %v1128_v45 = vpop.xlane.xlu1 %1127  ;;  %v5401_v5 = vcvt.s32.f32 %v1442_v63 }
 0x1d8   : > { %v5345_v34 = vcvt.s32.f32 %v1428_v6  ;;  %vm1250_vm8 = vcmp.eq.f32.partialorder %v4949_v30, %v1128_v45 }
 0x1d9   : > { %v5394_v6 = vsel %vm1250_vm8, %v5287_v52, 128 }
 0x1da   : > { %1231 = vmin.xlane.f32.xlu1 %v5343_v13  ;;  %1431 = vmin.xlane.f32.xlu0 %v5345_v34  ;;  %v1470_v45 = vshra.s32 %v5394_v6, 16 }
 0x1db   : > { %v1126_v24 = vpop.xlane.xlu1 %1125 }
 0x1dc   : > { %vm1249_vm4 = vcmp.eq.f32.partialorder %v4958_v31, %v1126_v24  ;;  %v5370_v31 = vsel %vm1246_vm5, %v5287_v52, 128 }
 0x1dd   : > { %v5358_v40 = vsel %vm1249_vm4, %v5287_v52, 128  ;;  %v1414_v37 = vshra.s32 %v5370_v31, 16 }
 0x1de   : > { %v1456_v28 = vshra.s32 %v5358_v40, 16  ;;  %1235 = vmin.xlane.f32.xlu1 %v5351_v3 }
 0x1df   : > { %v1132_v53 = vpop.xlane.xlu1 %1131  ;;  %v5389_v60 = vcvt.s32.f32 %v1414_v37 }
 0x1e0   : > { %v5367_v1 = vcvt.s32.f32 %v1456_v28  ;;  %vm1252_vm9 = vcmp.eq.f32.partialorder %v4962_v27, %v1132_v53  ;;  %v7621_v28 = vld [vmem:[#allocation70_spill] sm:$0xff] }
 0x1e1   : > { %v5404_v54 = vsel %vm1252_vm9, %v5287_v52, 128 }
 0x1e2   : > { %1239 = vmin.xlane.f32.xlu1 %v5363_v18  ;;  %1459 = vmin.xlane.f32.xlu0 %v5367_v1  ;;  %v1498_v38 = vshra.s32 %v5404_v54, 16 }
 0x1e3   : > { %v1130_v35 = vpop.xlane.xlu1 %1129 }
 0x1e4   : > { %vm1251_vm7 = vcmp.eq.f32.partialorder %v4977_v25, %v1130_v35  ;;  %v5413_v35 = vcvt.s32.f32 %v1470_v45 }
 0x1e5   : > { %v5383_v41 = vsel %vm1251_vm7, %v5287_v52, 128 }
 0x1e6   : > { %v1484_v39 = vshra.s32 %v5383_v41, 16  ;;  %1389 = vmin.xlane.f32.xlu1 %v5377_v0 }
 0x1e7   : > { %v1136_v36 = vpop.xlane.xlu1 %1135 }
 0x1e8   : > { %v5391_v25 = vcvt.s32.f32 %v1484_v39  ;;  %vm1254_vm11 = vcmp.eq.f32.partialorder %v7621_v28, %v1136_v36 }
 0x1e9   : > { %v5418_v39 = vsel %vm1254_vm11, %v5287_v52, 128 }
 0x1ea   : > { %1417 = vmin.xlane.f32.xlu1 %v5389_v60  ;;  %1487 = vmin.xlane.f32.xlu0 %v5391_v25  ;;  %v1526_v63 = vshra.s32 %v5418_v39, 16 }
 0x1eb   : > { %v1134_v30 = vpop.xlane.xlu1 %1133 }
 0x1ec   : > { %vm1253_vm10 = vcmp.eq.f32.partialorder %v7620_v44, %v1134_v30  ;;  %v5425_v30 = vcvt.s32.f32 %v1498_v38 }
 0x1ed   : > { %v5407_v24 = vsel %vm1253_vm10, %v5287_v52, 128 }
 0x1ee   : > { %v1512_v27 = vshra.s32 %v5407_v24, 16  ;;  %1445 = vmin.xlane.f32.xlu1 %v5401_v5 }
 0x1ef   : > { %v1140_v53 = vpop.xlane.xlu1 %1139 }
 0x1f0   : > { %v5415_v37 = vcvt.s32.f32 %v1512_v27  ;;  %vm1256_vm12 = vcmp.eq.f32.partialorder %v5002_v51, %v1140_v53  ;;  %v5437_v53 = vcvt.s32.f32 %v1526_v63 }
 0x1f1   : > { %v5428_v45 = vsel %vm1256_vm12, %v5287_v52, 128 }
 0x1f2   : > { %7622 = vst [vmem:[#allocation71_spill] sm:$0xff] %v5415_v37  ;;  %1473 = vmin.xlane.f32.xlu1 %v5413_v35  ;;  %1515 = vmin.xlane.f32.xlu0 %v5415_v37  ;;  %7623 = vst [vmem:[#allocation70_spill] sm:$0xff] %v5428_v45  ;;  %v1554_v27 = vshra.s32 %v5428_v45, 16 }
 0x1f3   : > { %v1138_v36 = vpop.xlane.xlu1 %1137 }
 0x1f4   : > { %vm1255_vm13 = vcmp.eq.f32.partialorder %v5014_v21, %v1138_v36  ;;  %v5446_v36 = vpop.xlane.xlu0 %1165  ;;  %v5450_v45 = vcvt.s32.f32 %v1554_v27 }
 0x1f5   : > { %v5431_v44 = vsel %vm1255_vm13, %v5287_v52, 128 }
 0x1f6   : > { %7624 = vst [vmem:[#allocation94_spill] sm:$0xff] %v5431_v44  ;;  %v1540_v28 = vshra.s32 %v5431_v44, 16  ;;  %1501 = vmin.xlane.f32.xlu1 %v5425_v30 }
 0x1f7   : > { %v1144_v51 = vpop.xlane.xlu1 %1143 }
 0x1f8   : > { %vm1258_vm14 = vcmp.eq.f32.partialorder %v5021_v57, %v1144_v51  ;;  %v5439_v21 = vcvt.s32.f32 %v1540_v28  ;;  %v5462_v37 = vpop.xlane.xlu0 %1169 }
 0x1f9   : > { %v5442_v38 = vsel %vm1258_vm14, %v5287_v52, 128 }
 0x1fa   : > { %7625 = vst [vmem:[#allocation95_spill] sm:$0xff] %v5439_v21  ;;  %7626 = vst [vmem:[#allocation96_spill] sm:$0xff] %v5442_v38  ;;  %1529 = vmin.xlane.f32.xlu1 %v5437_v53  ;;  %1543 = vmin.xlane.f32.xlu0 %v5439_v21  ;;  %v1582_v44 = vshra.s32 %v5442_v38, 16 }
 0x1fb   : > { %v1142_v20 = vpop.xlane.xlu1 %1141 }
 0x1fc   : > { %vm1257_vm15 = vcmp.eq.f32.partialorder %v5040_v22, %v1142_v20  ;;  %v5458_v51 = vcvt.s32.f32 %v1582_v44 }
 0x1fd   : > { %v5453_v57 = vsel %vm1257_vm15, %v5287_v52, 128 }
 0x1fe   : > { %7627 = vst [vmem:[#allocation97_spill] sm:$0xff] %v5453_v57  ;;  %v1568_v63 = vshra.s32 %v5453_v57, 16  ;;  %1557 = vmin.xlane.f32.xlu1 %v5450_v45  ;;  %7628 = vst [vmem:[#allocation98_spill] sm:$0xff] %v5458_v51 }
 0x1ff   : > { %v1148_v28 = vpop.xlane.xlu1 %1147 }
 0x200   : > { %vm1260_vm0 = vcmp.eq.f32.partialorder %v5050_v47, %v1148_v28  ;;  %v5460_v21 = vcvt.s32.f32 %v1568_v63  ;;  %v5478_v63 = vpop.xlane.xlu0 %1173 }
 0x201   : > { %v5465_v22 = vsel %vm1260_vm0, %v5287_v52, 128 }
 0x202   : > { %7629 = vst [vmem:[#allocation99_spill] sm:$0xff] %v5460_v21  ;;  %7630 = vst [vmem:[#allocation100_spill] sm:$0xff] %v5465_v22  ;;  %v1610_v20 = vshra.s32 %v5465_v22, 16  ;;  %1585 = vmin.xlane.f32.xlu1 %v5458_v51  ;;  %1571 = vmin.xlane.f32.xlu0 %v5460_v21  ;;  %v7633_v22 = vld [vmem:[#allocation77_spill] sm:$0xff] }
 0x203   : > { %v1146_v27 = vpop.xlane.xlu1 %1145 }
 0x204   : > { %vm1259_vm1 = vcmp.eq.f32.partialorder %v5069_v49, %v1146_v27  ;;  %v5471_v57 = vcvt.s32.f32 %v1610_v20 }
 0x205   : > { %v5474_v47 = vsel %vm1259_vm1, %v5287_v52, 128 }
 0x206   : > { %7631 = vst [vmem:[#allocation101_spill] sm:$0xff] %v5471_v57  ;;  %7632 = vst [vmem:[#allocation102_spill] sm:$0xff] %v5474_v47  ;;  %v1596_v44 = vshra.s32 %v5474_v47, 16  ;;  %1613 = vmin.xlane.f32.xlu1 %v5471_v57  ;;  %v5491_v57 = vpop.xlane.xlu0 %1177 }
 0x207   : > { %v1152_v28 = vpop.xlane.xlu1 %1151 }
 0x208   : > { %vm1262_vm2 = vcmp.eq.f32.partialorder %v7633_v22, %v1152_v28  ;;  %v5481_v51 = vcvt.s32.f32 %v1596_v44  ;;  %v7638_v28 = vld [vmem:[#allocation80_spill] sm:$0xff] }
 0x209   : > { %v5484_v21 = vsel %vm1262_vm2, %v5287_v52, 128 }
 0x20a   : > { %7634 = vst [vmem:[#allocation77_spill] sm:$0xff] %v5481_v51  ;;  %7635 = vst [vmem:[#allocation103_spill] sm:$0xff] %v5484_v21  ;;  %v1638_v49 = vshra.s32 %v5484_v21, 16  ;;  %1599 = vmin.xlane.f32.xlu0 %v5481_v51 }
 0x20b   : > { %v1150_v20 = vpop.xlane.xlu1 %1149 }
 0x20c   : > { %vm1261_vm3 = vcmp.eq.f32.partialorder %v5096_v58, %v1150_v20  ;;  %v5489_v27 = vcvt.s32.f32 %v1638_v49  ;;  %v5506_v49 = vpop.xlane.xlu0 %1181 }
 0x20d   : > { %v5494_v47 = vsel %vm1261_vm3, %v5287_v52, 128 }
 0x20e   : > { %7636 = vst [vmem:[#allocation104_spill] sm:$0xff] %v5489_v27  ;;  %7637 = vst [vmem:[#allocation105_spill] sm:$0xff] %v5494_v47  ;;  %v1624_v22 = vshra.s32 %v5494_v47, 16  ;;  %1641 = vmin.xlane.f32.xlu1 %v5489_v27 }
 0x20f   : > { %v1156_v44 = vpop.xlane.xlu1 %1155 }
 0x210   : > { %vm1264_vm4 = vcmp.eq.f32.partialorder %v7638_v28, %v1156_v44  ;;  %v5499_v21 = vcvt.s32.f32 %v1624_v22 }
 0x211   : > { %v5502_v51 = vsel %vm1264_vm4, %v5287_v52, 128 }
 0x212   : > { %7639 = vst [vmem:[#allocation80_spill] sm:$0xff] %v5499_v21  ;;  %7640 = vst [vmem:[#allocation106_spill] sm:$0xff] %v5502_v51  ;;  %v1666_v58 = vshra.s32 %v5502_v51, 16  ;;  %1627 = vmin.xlane.f32.xlu0 %v5499_v21  ;;  %v5519_v21 = vpop.xlane.xlu0 %1185 }
 0x213   : > { %v1154_v20 = vpop.xlane.xlu1 %1153 }
 0x214   : > { %vm1263_vm5 = vcmp.eq.f32.partialorder %v5123_v55, %v1154_v20  ;;  %v5509_v47 = vcvt.s32.f32 %v1666_v58  ;;  %v7645_v20 = vld [vmem:[#allocation84_spill] sm:$0xff] }
 0x215   : > { %v5512_v27 = vsel %vm1263_vm5, %v5287_v52, 128 }
 0x216   : > { %7641 = vst [vmem:[#allocation107_spill] sm:$0xff] %v5509_v47  ;;  %7642 = vst [vmem:[#allocation108_spill] sm:$0xff] %v5512_v27  ;;  %v1652_v22 = vshra.s32 %v5512_v27, 16  ;;  %1669 = vmin.xlane.f32.xlu1 %v5509_v47 }
 0x217   : > { %v1160_v44 = vpop.xlane.xlu1 %1159 }
 0x218   : > { %vm1266_vm6 = vcmp.eq.f32.partialorder %v5133_v29, %v1160_v44  ;;  %v5517_v28 = vcvt.s32.f32 %v1652_v22  ;;  %v5534_v22 = vpop.xlane.xlu0 %1189 }
 0x219   : > { %v5522_v51 = vsel %vm1266_vm6, %v5287_v52, 128 }
 0x21a   : > { %7643 = vst [vmem:[#allocation109_spill] sm:$0xff] %v5517_v28  ;;  %7644 = vst [vmem:[#allocation110_spill] sm:$0xff] %v5522_v51  ;;  %v1694_v55 = vshra.s32 %v5522_v51, 16  ;;  %1655 = vmin.xlane.f32.xlu0 %v5517_v28 }
 0x21b   : > { %v1158_v58 = vpop.xlane.xlu1 %1157 }
 0x21c   : > { %vm1265_vm7 = vcmp.eq.f32.partialorder %v7645_v20, %v1158_v58  ;;  %v5527_v27 = vcvt.s32.f32 %v1694_v55  ;;  %v7650_v55 = vld [vmem:[#allocation72_spill] sm:$0xff] }
 0x21d   : > { %v5530_v47 = vsel %vm1265_vm7, %v5287_v52, 128  ;;  %vm1269_vm9 = vcmp.eq.f32.partialorder %v7650_v55, %v5446_v36 }
 0x21e   : > { %7646 = vst [vmem:[#allocation84_spill] sm:$0xff] %v5527_v27  ;;  %7647 = vst [vmem:[#allocation111_spill] sm:$0xff] %v5530_v47  ;;  %v1680_v29 = vshra.s32 %v5530_v47, 16  ;;  %1697 = vmin.xlane.f32.xlu1 %v5527_v27  ;;  %v7651_v47 = vld [vmem:[#allocation87_spill] sm:$0xff]  ;;  %v5550_v38 = vsel %vm1269_vm9, %v5287_v52, 128 }
 0x21f   : > { %v1164_v44 = vpop.xlane.xlu1 %1163  ;;  %7653 = vst [vmem:[#allocation87_spill] sm:$0xff] %v5550_v38 }
 0x220   : > { %vm1268_vm8 = vcmp.eq.f32.partialorder %v5160_v23, %v1164_v44  ;;  %v5537_v51 = vcvt.s32.f32 %v1680_v29  ;;  %v5552_v23 = vpop.xlane.xlu0 %1193  ;;  %v7655_v44 = vld [vmem:[#allocation73_spill] sm:$0xff] }
 0x221   : > { %v5540_v28 = vsel %vm1268_vm8, %v5287_v52, 128  ;;  %vm1271_vm11 = vcmp.eq.f32.partialorder %v7655_v44, %v5462_v37 }
 0x222   : > { %7648 = vst [vmem:[#allocation112_spill] sm:$0xff] %v5537_v51  ;;  %7649 = vst [vmem:[#allocation113_spill] sm:$0xff] %v5540_v28  ;;  %v1722_v58 = vshra.s32 %v5540_v28, 16  ;;  %1683 = vmin.xlane.f32.xlu0 %v5537_v51  ;;  %v7659_v28 = vld [vmem:[#allocation74_spill] sm:$0xff] }
 0x223   : > { %v1162_v20 = vpop.xlane.xlu1 %1161  ;;  %vm1273_vm13 = vcmp.eq.f32.partialorder %v7659_v28, %v5478_v63  ;;  %v7662_v28 = vld [vmem:[#allocation75_spill] sm:$0xff] }
 0x224   : > { %vm1267_vm10 = vcmp.eq.f32.partialorder %v7651_v47, %v1162_v20  ;;  %v5547_v27 = vcvt.s32.f32 %v1722_v58  ;;  %v1736_v47 = vshra.s32 %v5550_v38, 16  ;;  %v5566_v20 = vsel %vm1271_vm11, %v5287_v52, 128  ;;  %v5575_v44 = vpop.xlane.xlu0 %1197 }
 0x225   : > { %v5555_v29 = vsel %vm1267_vm10, %v5287_v52, 128  ;;  %7657 = vst [vmem:[#allocation115_spill] sm:$0xff] %v5566_v20  ;;  %vm1275_vm15 = vcmp.eq.f32.partialorder %v7662_v28, %v5491_v57  ;;  %v7667_v28 = vld [vmem:[#allocation76_spill] sm:$0xff] }
 0x226   : > { %7652 = vst [vmem:[#allocation72_spill] sm:$0xff] %v5547_v27  ;;  %7654 = vst [vmem:[#allocation114_spill] sm:$0xff] %v5555_v29  ;;  %v1708_v36 = vshra.s32 %v5555_v29, 16  ;;  %1725 = vmin.xlane.f32.xlu1 %v5547_v27  ;;  %v5584_v29 = vsel %vm1273_vm13, %v5287_v52, 128  ;;  %vm1277_vm1 = vcmp.eq.f32.partialorder %v7667_v28, %v5506_v49  ;;  %v7671_v28 = vld [vmem:[#allocation78_spill] sm:$0xff] }
 0x227   : > { %v1168_v55 = vpop.xlane.xlu1 %1167  ;;  %vm1279_vm3 = vcmp.eq.f32.partialorder %v7671_v28, %v5519_v21  ;;  %v7674_v28 = vld [vmem:[#allocation79_spill] sm:$0xff] }
 0x228   : > { %vm1270_vm12 = vcmp.eq.f32.partialorder %v5185_v62, %v1168_v55  ;;  %v5563_v58 = vcvt.s32.f32 %v1708_v36  ;;  %v1764_v62 = vshra.s32 %v5566_v20, 16  ;;  %v5581_v55 = vcvt.s32.f32 %v1736_v47  ;;  %v7663_v47 = vld [vmem:[#allocation91_spill] sm:$0xff]  ;;  %v5603_v38 = vpop.xlane.xlu0 %1201 }
 0x229   : > { %v5569_v51 = vsel %vm1270_vm12, %v5287_v52, 128  ;;  %v5601_v20 = vsel %vm1275_vm15, %v5287_v52, 128  ;;  %vm1281_vm5 = vcmp.eq.f32.partialorder %v7674_v28, %v5534_v22  ;;  %v7678_v28 = vld [vmem:[#allocation81_spill] sm:$0xff] }
 0x22a   : > { %7656 = vst [vmem:[#allocation73_spill] sm:$0xff] %v5563_v58  ;;  %7658 = vst [vmem:[#allocation116_spill] sm:$0xff] %v5569_v51  ;;  %v1750_v37 = vshra.s32 %v5569_v51, 16  ;;  %1711 = vmin.xlane.f32.xlu0 %v5563_v58  ;;  %v5598_v51 = vcvt.s32.f32 %v1764_v62  ;;  %v1820_v62 = vshra.s32 %v5601_v20, 16  ;;  %vm1283_vm7 = vcmp.eq.f32.partialorder %v7678_v28, %v5552_v23  ;;  %v7682_v28 = vld [vmem:[#allocation82_spill] sm:$0xff] }
 0x22b   : > { %v1172_v27 = vpop.xlane.xlu1 %1171  ;;  %7661 = vst [vmem:[#allocation117_spill] sm:$0xff] %v5581_v55  ;;  %vm1285_vm9 = vcmp.eq.f32.partialorder %v7682_v28, %v5575_v44  ;;  %v7685_v28 = vld [vmem:[#allocation83_spill] sm:$0xff] }
 0x22c   : > { %vm1272_vm14 = vcmp.eq.f32.partialorder %v5199_v59, %v1172_v27  ;;  %v5579_v36 = vcvt.s32.f32 %v1750_v37  ;;  %v1792_v27 = vshra.s32 %v5584_v29, 16  ;;  %7665 = vst [vmem:[#allocation91_spill] sm:$0xff] %v5598_v51  ;;  %vm1287_vm11 = vcmp.eq.f32.partialorder %v7685_v28, %v5603_v38  ;;  %v7689_v28 = vld [vmem:[#allocation85_spill] sm:$0xff] }
 0x22d   : > { %v5587_v63 = vsel %vm1272_vm14, %v5287_v52, 128 }
 0x22e   : > { %7660 = vst [vmem:[#allocation74_spill] sm:$0xff] %v5579_v36  ;;  %v1778_v58 = vshra.s32 %v5587_v63, 16  ;;  %1753 = vmin.xlane.f32.xlu1 %v5579_v36  ;;  %1739 = vmin.xlane.f32.xlu0 %v5581_v55  ;;  %v5620_v36 = vsel %vm1277_vm1, %v5287_v52, 128 }
 0x22f   : > { %v1176_v59 = vpop.xlane.xlu1 %1175 }
 0x230   : > { %vm1274_vm0 = vcmp.eq.f32.partialorder %v7663_v47, %v1176_v59  ;;  %v5596_v37 = vcvt.s32.f32 %v1778_v58  ;;  %v5617_v47 = vcvt.s32.f32 %v1792_v27  ;;  %v1848_v27 = vshra.s32 %v5620_v36, 16 }
 0x231   : > { %v5606_v57 = vsel %vm1274_vm0, %v5287_v52, 128 }
 0x232   : > { %7664 = vst [vmem:[#allocation75_spill] sm:$0xff] %v5596_v37  ;;  %7666 = vst [vmem:[#allocation118_spill] sm:$0xff] %v5606_v57  ;;  %v1806_v55 = vshra.s32 %v5606_v57, 16  ;;  %1781 = vmin.xlane.f32.xlu1 %v5596_v37  ;;  %1767 = vmin.xlane.f32.xlu0 %v5598_v51  ;;  %v5636_v37 = vcvt.s32.f32 %v1820_v62  ;;  %v5639_v57 = vsel %vm1279_vm3, %v5287_v52, 128 }
 0x233   : > { %v1180_v58 = vpop.xlane.xlu1 %1179  ;;  %7669 = vst [vmem:[#allocation119_spill] sm:$0xff] %v5617_v47 }
 0x234   : > { %vm1276_vm2 = vcmp.eq.f32.partialorder %v5225_v17, %v1180_v58  ;;  %v5615_v59 = vcvt.s32.f32 %v1806_v55  ;;  %v5630_v17 = vpop.xlane.xlu0 %1205  ;;  %7673 = vst [vmem:[#allocation121_spill] sm:$0xff] %v5636_v37 }
 0x235   : > { %v5623_v49 = vsel %vm1276_vm2, %v5287_v52, 128  ;;  %vm1289_vm13 = vcmp.eq.f32.partialorder %v7689_v28, %v5630_v17  ;;  %v7693_v28 = vld [vmem:[#allocation86_spill] sm:$0xff] }
 0x236   : > { %7668 = vst [vmem:[#allocation76_spill] sm:$0xff] %v5615_v59  ;;  %7670 = vst [vmem:[#allocation120_spill] sm:$0xff] %v5623_v49  ;;  %v1834_v51 = vshra.s32 %v5623_v49, 16  ;;  %1809 = vmin.xlane.f32.xlu1 %v5615_v59  ;;  %1795 = vmin.xlane.f32.xlu0 %v5617_v47  ;;  %v5656_v59 = vsel %vm1281_vm5, %v5287_v52, 128 }
 0x237   : > { %v1184_v55 = vpop.xlane.xlu1 %1183 }
 0x238   : > { %vm1278_vm4 = vcmp.eq.f32.partialorder %v5234_v56, %v1184_v55  ;;  %v5634_v58 = vcvt.s32.f32 %v1834_v51  ;;  %v1876_v51 = vshra.s32 %v5639_v57, 16  ;;  %v5653_v55 = vcvt.s32.f32 %v1848_v27  ;;  %v1210_v49 = vpop.xlane.xlu0 %1209 }
 0x239   : > { %v5642_v21 = vsel %vm1278_vm4, %v5287_v52, 128  ;;  %vm1291_vm15 = vcmp.eq.f32.partialorder %v7693_v28, %v1210_v49  ;;  %v7696_v28 = vld [vmem:[#allocation88_spill] sm:$0xff] }
 0x23a   : > { %7672 = vst [vmem:[#allocation78_spill] sm:$0xff] %v5634_v58  ;;  %v1862_v47 = vshra.s32 %v5642_v21, 16  ;;  %1837 = vmin.xlane.f32.xlu1 %v5634_v58  ;;  %1823 = vmin.xlane.f32.xlu0 %v5636_v37  ;;  %7676 = vst [vmem:[#allocation122_spill] sm:$0xff] %v5653_v55  ;;  %v5673_v58 = vsel %vm1283_vm7, %v5287_v52, 128 }
 0x23b   : > { %v1188_v56 = vpop.xlane.xlu1 %1187 }
 0x23c   : > { %vm1280_vm6 = vcmp.eq.f32.partialorder %v5245_v14, %v1188_v56  ;;  %v5651_v62 = vcvt.s32.f32 %v1862_v47  ;;  %v1904_v47 = vshra.s32 %v5656_v59, 16  ;;  %v5670_v56 = vcvt.s32.f32 %v1876_v51 }
 0x23d   : > { %v5659_v22 = vsel %vm1280_vm6, %v5287_v52, 128  ;;  %v1932_v51 = vshra.s32 %v5673_v58, 16 }
 0x23e   : > { %7675 = vst [vmem:[#allocation79_spill] sm:$0xff] %v5651_v62  ;;  %7677 = vst [vmem:[#allocation123_spill] sm:$0xff] %v5659_v22  ;;  %v1890_v37 = vshra.s32 %v5659_v22, 16  ;;  %1865 = vmin.xlane.f32.xlu1 %v5651_v62  ;;  %1851 = vmin.xlane.f32.xlu0 %v5653_v55  ;;  %v5687_v62 = vcvt.s32.f32 %v1904_v47  ;;  %v5690_v22 = vsel %vm1285_vm9, %v5287_v52, 128 }
 0x23f   : > { %v1192_v14 = vpop.xlane.xlu1 %1191  ;;  %7680 = vst [vmem:[#allocation124_spill] sm:$0xff] %v5670_v56 }
 0x240   : > { %vm1282_vm8 = vcmp.eq.f32.partialorder %v5259_v46, %v1192_v14  ;;  %v5668_v27 = vcvt.s32.f32 %v1890_v37  ;;  %v1214_v46 = vpop.xlane.xlu0 %1213  ;;  %7684 = vst [vmem:[#allocation126_spill] sm:$0xff] %v5687_v62 }
 0x241   : > { %v5676_v23 = vsel %vm1282_vm8, %v5287_v52, 128  ;;  %vm1293_vm1 = vcmp.eq.f32.partialorder %v7696_v28, %v1214_v46  ;;  %v7700_v28 = vld [vmem:[#allocation89_spill] sm:$0xff] }
 0x242   : > { %7679 = vst [vmem:[#allocation81_spill] sm:$0xff] %v5668_v27  ;;  %7681 = vst [vmem:[#allocation125_spill] sm:$0xff] %v5676_v23  ;;  %v1918_v55 = vshra.s32 %v5676_v23, 16  ;;  %1893 = vmin.xlane.f32.xlu1 %v5668_v27  ;;  %1879 = vmin.xlane.f32.xlu0 %v5670_v56  ;;  %v5707_v27 = vsel %vm1287_vm11, %v5287_v52, 128 }
 0x243   : > { %v1196_v37 = vpop.xlane.xlu1 %1195 }
 0x244   : > { %vm1284_vm10 = vcmp.eq.f32.partialorder %v5265_v8, %v1196_v37  ;;  %v5685_v14 = vcvt.s32.f32 %v1918_v55  ;;  %v1960_v55 = vshra.s32 %v5690_v22, 16  ;;  %v5704_v37 = vcvt.s32.f32 %v1932_v51  ;;  %v1218_v23 = vpop.xlane.xlu0 %1217 }
 0x245   : > { %v5693_v44 = vsel %vm1284_vm10, %v5287_v52, 128  ;;  %vm1295_vm3 = vcmp.eq.f32.partialorder %v7700_v28, %v1218_v23  ;;  %v7704_v28 = vld [vmem:[#allocation90_spill] sm:$0xff] }
 0x246   : > { %7683 = vst [vmem:[#allocation82_spill] sm:$0xff] %v5685_v14  ;;  %v1946_v56 = vshra.s32 %v5693_v44, 16  ;;  %1921 = vmin.xlane.f32.xlu1 %v5685_v14  ;;  %1907 = vmin.xlane.f32.xlu0 %v5687_v62  ;;  %7687 = vst [vmem:[#allocation127_spill] sm:$0xff] %v5704_v37  ;;  %v5724_v14 = vsel %vm1289_vm13, %v5287_v52, 128 }
 0x247   : > { %v1200_v8 = vpop.xlane.xlu1 %1199 }
 0x248   : > { %vm1286_vm12 = vcmp.eq.f32.partialorder %v5271_v11, %v1200_v8  ;;  %v5702_v47 = vcvt.s32.f32 %v1946_v56  ;;  %v1988_v56 = vshra.s32 %v5707_v27, 16  ;;  %v5721_v8 = vcvt.s32.f32 %v1960_v55 }
 0x249   : > { %v5710_v38 = vsel %vm1286_vm12, %v5287_v52, 128 }
 0x24a   : > { %7686 = vst [vmem:[#allocation83_spill] sm:$0xff] %v5702_v47  ;;  %7688 = vst [vmem:[#allocation128_spill] sm:$0xff] %v5710_v38  ;;  %v1974_v62 = vshra.s32 %v5710_v38, 16  ;;  %1949 = vmin.xlane.f32.xlu1 %v5702_v47  ;;  %1935 = vmin.xlane.f32.xlu0 %v5704_v37  ;;  %v1222_v37 = vpop.xlane.xlu0 %1221  ;;  %v5740_v38 = vsel %vm1291_vm15, %v5287_v52, 128 }
 0x24b   : > { %v1204_v11 = vpop.xlane.xlu1 %1203  ;;  %7691 = vst [vmem:[#allocation129_spill] sm:$0xff] %v5721_v8  ;;  %vm1297_vm5 = vcmp.eq.f32.partialorder %v7704_v28, %v1222_v37  ;;  %v7707_v28 = vld [vmem:[#allocation92_spill] sm:$0xff] }
 0x24c   : > { %vm1288_vm14 = vcmp.eq.f32.partialorder %v5277_v42, %v1204_v11  ;;  %v5719_v51 = vcvt.s32.f32 %v1974_v62  ;;  %v2016_v62 = vshra.s32 %v5724_v14, 16  ;;  %v5737_v11 = vcvt.s32.f32 %v1988_v56 }
 0x24d   : > { %v5727_v17 = vsel %vm1288_vm14, %v5287_v52, 128 }
 0x24e   : > { %7690 = vst [vmem:[#allocation85_spill] sm:$0xff] %v5719_v51  ;;  %7692 = vst [vmem:[#allocation130_spill] sm:$0xff] %v5727_v17  ;;  %v2002_v47 = vshra.s32 %v5727_v17, 16  ;;  %1977 = vmin.xlane.f32.xlu1 %v5719_v51  ;;  %1963 = vmin.xlane.f32.xlu0 %v5721_v8  ;;  %v5753_v56 = vcvt.s32.f32 %v2016_v62  ;;  %v1226_v17 = vpop.xlane.xlu0 %1225 }
 0x24f   : > { %v1208_v42 = vpop.xlane.xlu1 %1207  ;;  %7695 = vst [vmem:[#allocation131_spill] sm:$0xff] %v5737_v11  ;;  %vm1299_vm7 = vcmp.eq.f32.partialorder %v7707_v28, %v1226_v17 }
 0x250   : > { %vm1290_vm0 = vcmp.eq.f32.partialorder %v5283_v43, %v1208_v42  ;;  %v5735_v55 = vcvt.s32.f32 %v2002_v47  ;;  %v2044_v43 = vshra.s32 %v5740_v38, 16  ;;  %7698 = vst [vmem:[#allocation132_spill] sm:$0xff] %v5753_v56  ;;  %v5756_v42 = vsel %vm1293_vm1, %v5287_v52, 128 }
 0x251   : > { %v5743_v49 = vsel %vm1290_vm0, %v5287_v52, 128 }
 0x252   : > { %7694 = vst [vmem:[#allocation86_spill] sm:$0xff] %v5735_v55  ;;  %v2030_v8 = vshra.s32 %v5743_v49, 16  ;;  %2005 = vmin.xlane.f32.xlu1 %v5735_v55  ;;  %1991 = vmin.xlane.f32.xlu0 %v5737_v11  ;;  %v5769_v62 = vcvt.s32.f32 %v2044_v43  ;;  %v5772_v55 = vsel %vm1295_vm3, %v5287_v52, 128 }
 0x253   : > { %v1212_v51 = vpop.xlane.xlu1 %1211 }
 0x254   : > { %vm1292_vm2 = vcmp.eq.f32.partialorder %v5293_v32, %v1212_v51  ;;  %v5751_v47 = vcvt.s32.f32 %v2030_v8  ;;  %v2072_v51 = vshra.s32 %v5756_v42, 16  ;;  %7702 = vst [vmem:[#allocation134_spill] sm:$0xff] %v5769_v62 }
 0x255   : > { %v5759_v46 = vsel %vm1292_vm2, %v5287_v52, 128 }
 0x256   : > { %7697 = vst [vmem:[#allocation88_spill] sm:$0xff] %v5751_v47  ;;  %7699 = vst [vmem:[#allocation133_spill] sm:$0xff] %v5759_v46  ;;  %v2058_v11 = vshra.s32 %v5759_v46, 16  ;;  %2033 = vmin.xlane.f32.xlu1 %v5751_v47  ;;  %2019 = vmin.xlane.f32.xlu0 %v5753_v56  ;;  %v1230_v56 = vpop.xlane.xlu0 %1229  ;;  %v5788_v46 = vsel %vm1297_vm5, %v5287_v52, 128 }
 0x257   : > { %v1216_v32 = vpop.xlane.xlu1 %1215  ;;  %vm1301_vm9 = vcmp.eq.f32.partialorder %v5231_v12, %v1230_v56 }
 0x258   : > { %vm1294_vm4 = vcmp.eq.f32.partialorder %v5303_v4, %v1216_v32  ;;  %v5767_v8 = vcvt.s32.f32 %v2058_v11  ;;  %v2100_v11 = vshra.s32 %v5772_v55, 16  ;;  %v5785_v32 = vcvt.s32.f32 %v2072_v51 }
 0x259   : > { %v5775_v23 = vsel %vm1294_vm4, %v5287_v52, 128 }
 0x25a   : > { %7701 = vst [vmem:[#allocation89_spill] sm:$0xff] %v5767_v8  ;;  %7703 = vst [vmem:[#allocation135_spill] sm:$0xff] %v5775_v23  ;;  %v2086_v47 = vshra.s32 %v5775_v23, 16  ;;  %2061 = vmin.xlane.f32.xlu1 %v5767_v8  ;;  %2047 = vmin.xlane.f32.xlu0 %v5769_v62  ;;  %v5801_v51 = vcvt.s32.f32 %v2100_v11  ;;  %v1234_v23 = vpop.xlane.xlu0 %1233 }
 0x25b   : > { %v1220_v4 = vpop.xlane.xlu1 %1219  ;;  %7706 = vst [vmem:[#allocation136_spill] sm:$0xff] %v5785_v32  ;;  %vm1303_vm11 = vcmp.eq.f32.partialorder %v5242_v10, %v1234_v23 }
 0x25c   : > { %vm1296_vm6 = vcmp.eq.f32.partialorder %v5313_v26, %v1220_v4  ;;  %v5783_v43 = vcvt.s32.f32 %v2086_v47  ;;  %v2128_v26 = vshra.s32 %v5788_v46, 16  ;;  %7709 = vst [vmem:[#allocation137_spill] sm:$0xff] %v5801_v51  ;;  %v5804_v4 = vsel %vm1299_vm7, %v5287_v52, 128 }
 0x25d   : > { %v5791_v37 = vsel %vm1296_vm6, %v5287_v52, 128 }
 0x25e   : > { %7705 = vst [vmem:[#allocation90_spill] sm:$0xff] %v5783_v43  ;;  %v2114_v62 = vshra.s32 %v5791_v37, 16  ;;  %2089 = vmin.xlane.f32.xlu1 %v5783_v43  ;;  %2075 = vmin.xlane.f32.xlu0 %v5785_v32  ;;  %v5817_v11 = vcvt.s32.f32 %v2128_v26  ;;  %v5820_v32 = vsel %vm1301_vm9, %v5287_v52, 128  ;;  %v1385_v43 = vand.u32 65535, %v5355_v7 }
 0x25f   : > { %v1224_v8 = vpop.xlane.xlu1 %1223 }
 0x260   : > { %vm1298_vm8 = vcmp.eq.f32.partialorder %v5323_v48, %v1224_v8  ;;  %v5799_v47 = vcvt.s32.f32 %v2114_v62  ;;  %v2156_v8 = vshra.s32 %v5804_v4, 16  ;;  %7711 = vst [vmem:[#allocation139_spill] sm:$0xff] %v5817_v11 }
 0x261   : > { %v5807_v17 = vsel %vm1298_vm8, %v5287_v52, 128 }
 0x262   : > { %7708 = vst [vmem:[#allocation92_spill] sm:$0xff] %v5799_v47  ;;  %v2142_v28 = vshra.s32 %v5807_v17, 16  ;;  %2117 = vmin.xlane.f32.xlu1 %v5799_v47  ;;  %2103 = vmin.xlane.f32.xlu0 %v5801_v51  ;;  %v1238_v51 = vpop.xlane.xlu0 %1237  ;;  %v5836_v47 = vsel %vm1303_vm11, %v5287_v52, 128 }
 0x263   : > { %v1228_v48 = vpop.xlane.xlu1 %1227  ;;  %vm1305_vm13 = vcmp.eq.f32.partialorder %v5252_v61, %v1238_v51 }
 0x264   : > { %vm1300_vm10 = vcmp.eq.f32.partialorder %v5333_v2, %v1228_v48  ;;  %v5815_v62 = vcvt.s32.f32 %v2142_v28  ;;  %v2184_v28 = vshra.s32 %v5820_v32, 16  ;;  %v5833_v48 = vcvt.s32.f32 %v2156_v8 }
 0x265   : > { %v5823_v12 = vsel %vm1300_vm10, %v5287_v52, 128 }
 0x266   : > { %7710 = vst [vmem:[#allocation138_spill] sm:$0xff] %v5815_v62  ;;  %v2170_v56 = vshra.s32 %v5823_v12, 16  ;;  %2145 = vmin.xlane.f32.xlu1 %v5815_v62  ;;  %2131 = vmin.xlane.f32.xlu0 %v5817_v11  ;;  %7713 = vst [vmem:[#allocation141_spill] sm:$0xff] %v5833_v48 }
 0x267   : > { %v1232_v2 = vpop.xlane.xlu1 %1231 }
 0x268   : > { %vm1302_vm12 = vcmp.eq.f32.partialorder %v5343_v13, %v1232_v2  ;;  %v5831_v26 = vcvt.s32.f32 %v2170_v56  ;;  %v2212_v13 = vshra.s32 %v5836_v47, 16  ;;  %v5849_v56 = vcvt.s32.f32 %v2184_v28 }
 0x269   : > { %v5839_v10 = vsel %vm1302_vm12, %v5287_v52, 128  ;;  %v5852_v2 = vsel %vm1305_vm13, %v5287_v52, 128 }
 0x26a   : > { %7712 = vst [vmem:[#allocation140_spill] sm:$0xff] %v5831_v26  ;;  %7714 = vst [vmem:[#allocation142_spill] sm:$0xff] %v5839_v10  ;;  %v2198_v23 = vshra.s32 %v5839_v10, 16  ;;  %2173 = vmin.xlane.f32.xlu1 %v5831_v26  ;;  %2159 = vmin.xlane.f32.xlu0 %v5833_v48  ;;  %v2240_v28 = vshra.s32 %v5852_v2, 16  ;;  %v5870_v26 = vcvt.s32.f32 %v2212_v13  ;;  %v5880_v10 = vpop.xlane.xlu0 %1375  ;;  %v2849_v13 = vld [vmem:[%s7313_s1 + $0x18] sm:$0xff] }
 0x26b   : > { %v1236_v11 = vpop.xlane.xlu1 %1235  ;;  %7716 = vst [vmem:[#allocation144_spill] sm:$0xff] %v5849_v56  ;;  %vm1377_vm1 = vcmp.eq.f32.partialorder %v5305_v15, %v5880_v10 }
 0x26c   : > { %vm1304_vm14 = vcmp.eq.f32.partialorder %v5351_v3, %v1236_v11  ;;  %v5847_v8 = vcvt.s32.f32 %v2198_v23  ;;  %v2846_v3 = vld [vmem:[%s7313_s1] sm:$0xff]  ;;  %v2847_v11 = vld [vmem:[%s7313_s1 + $0x8] sm:$0xff]  ;;  %7719 = vst [vmem:[#allocation147_spill] sm:$0xff] %v5870_v26 }
 0x26d   : > { %v5855_v61 = vsel %vm1304_vm14, %v5287_v52, 128 }
 0x26e   : > { %7715 = vst [vmem:[#allocation143_spill] sm:$0xff] %v5847_v8  ;;  %7717 = vst [vmem:[#allocation145_spill] sm:$0xff] %v5855_v61  ;;  %v2226_v51 = vshra.s32 %v5855_v61, 16  ;;  %2201 = vmin.xlane.f32.xlu1 %v5847_v8  ;;  %2187 = vmin.xlane.f32.xlu0 %v5849_v56  ;;  %v4281_v56 = vpack.c.bf16 %v2847_v11, %v2846_v3  ;;  %v1371_v61 = vand.u32 65535, %v5296_v19  ;;  %v5892_v3 = vcvt.s32.f32 %v2240_v28 }
 0x26f   : > { %v1240_v48 = vpop.xlane.xlu1 %1239  ;;  %v1413_v19 = vand.u32 65535, %v5370_v31  ;;  %v1399_v11 = vand.u32 65535, %v5316_v50  ;;  %v1441_v50 = vand.u32 65535, %v5380_v33 }
 0x270   : > { %vm1306_vm15 = vcmp.eq.f32.partialorder %v5363_v18, %v1240_v48  ;;  %v5868_v23 = vcvt.s32.f32 %v2226_v51  ;;  %4282 = vmatprep.subr.bf16.mxu1 %v4281_v56  ;;  %v2848_v48 = vld [vmem:[%s7313_s1 + $0x10] sm:$0xff]  ;;  %7721 = vst [vmem:[#allocation149_spill] sm:$0xff] %v5892_v3 }
 0x271   : > { %v5873_v8 = vsel %vm1306_vm15, %v5287_v52, 128  ;;  %4284 = vmatpush3.bf16.msra.mxu1 %v4281_v56  ;;  %v4285_v7 = vpack.c.bf16 %v2849_v13, %v2848_v48  ;;  %v1387_v56 = vcvt.s32.f32 %v1385_v43  ;;  %v1373_v48 = vcvt.s32.f32 %v1371_v61  ;;  %v2850_v13 = vld [vmem:[%s7313_s1 + $0x20] sm:$0xff] }
 0x272   : > { %7718 = vst [vmem:[#allocation146_spill] sm:$0xff] %v5868_v23  ;;  %v2254_v62 = vshra.s32 %v5873_v8, 16  ;;  %2229 = vmin.xlane.f32.xlu1 %v5868_v23  ;;  %2215 = vmin.xlane.f32.xlu0 %v5870_v26  ;;  %v1427_v43 = vand.u32 65535, %v5336_v16  ;;  %v1469_v16 = vand.u32 65535, %v5394_v6  ;;  %v1819_v23 = vand.u32 65535, %v5601_v20 }
 0x273   : > { %v5882_v18 = vpop.xlane.xlu1 %1389  ;;  %4286 = vmatprep.subr.bf16.mxu1 %v4285_v7  ;;  %v1378_v31 = vsel %vm1377_vm1, %v1373_v48, inf  ;;  %v2852_v48 = vld [vmem:[%s7313_s1 + $0x30] sm:$0xff]  ;;  %v1959_v20 = vand.u32 65535, %v5690_v22 }
 0x274   : > { %v5890_v51 = vcvt.s32.f32 %v2254_v62  ;;  %vm1391_vm0 = vcmp.eq.f32.partialorder %v5377_v0, %v5882_v18  ;;  %v5902_v62 = vpop.xlane.xlu0 %1403  ;;  %v2851_v0 = vld [vmem:[%s7313_s1 + $0x28] sm:$0xff] }
 0x275   : > { %4288 = vmatpush3.bf16.msra.mxu1 %v4285_v7  ;;  %v1392_v15 = vsel %vm1391_vm0, %v1387_v56, inf  ;;  %v4289_v52 = vpack.c.bf16 %v2851_v0, %v2850_v13  ;;  %vm1405_vm3 = vcmp.eq.f32.partialorder %v5325_v9, %v5902_v62  ;;  %v1415_v7 = vcvt.s32.f32 %v1413_v19 }
 0x276   : > { %7720 = vst [vmem:[#allocation148_spill] sm:$0xff] %v5890_v51  ;;  %2257 = vmin.xlane.f32.xlu1 %v5890_v51  ;;  %2243 = vmin.xlane.f32.xlu0 %v5892_v3  ;;  %v1401_v56 = vcvt.s32.f32 %v1399_v11  ;;  %v1455_v19 = vand.u32 65535, %v5358_v40  ;;  %v1497_v40 = vand.u32 65535, %v5404_v54  ;;  %v7749_v51 = vld [vmem:[#allocation87_spill] sm:$0xff] }
 0x277   : > { %v5904_v28 = vpop.xlane.xlu1 %1417  ;;  %4290 = vmatprep.subr.bf16.mxu1 %v4289_v52  ;;  %v1735_v26 = vand.u32 65535, %v7749_v51 }
 0x278   : > { %vm1419_vm2 = vcmp.eq.f32.partialorder %v5389_v60, %v5904_v28  ;;  %v5918_v61 = vpop.xlane.xlu0 %1431  ;;  %v2853_v60 = vld [vmem:[%s7313_s1 + $0x38] sm:$0xff]  ;;  %v1406_v13 = vsel %vm1405_vm3, %v1401_v56, inf }
 0x279   : > { %4292 = vmatpush3.bf16.msra.mxu1 %v4289_v52  ;;  %v4293_v9 = vpack.c.bf16 %v2853_v60, %v2852_v48  ;;  %v1420_v33 = vsel %vm1419_vm2, %v1415_v7, inf  ;;  %vm1433_vm5 = vcmp.eq.f32.partialorder %v5345_v34, %v5918_v61  ;;  %v1443_v52 = vcvt.s32.f32 %v1441_v50 }
 0x27a   : > { %1393 = vmin.xlane.f32.xlu1 %v1392_v15  ;;  %1379 = vmin.xlane.f32.xlu0 %v1378_v31  ;;  %v1429_v15 = vcvt.s32.f32 %v1427_v43  ;;  %v2854_v31 = vld [vmem:[%s7313_s1 + $0x40] sm:$0xff]  ;;  %v1483_v50 = vand.u32 65535, %v5383_v41  ;;  %v1471_v48 = vcvt.s32.f32 %v1469_v16  ;;  %v1457_v60 = vcvt.s32.f32 %v1455_v19 }
 0x27b   : > { %v5920_v3 = vpop.xlane.xlu1 %1445  ;;  %4294 = vmatprep.subr.bf16.mxu1 %v4293_v9  ;;  %v1525_v41 = vand.u32 65535, %v5418_v39 }
 0x27c   : > { %vm1447_vm4 = vcmp.eq.f32.partialorder %v5401_v5, %v5920_v3  ;;  %v5934_v11 = vpop.xlane.xlu0 %1459  ;;  %v2855_v5 = vld [vmem:[%s7313_s1 + $0x48] sm:$0xff]  ;;  %v1434_v6 = vsel %vm1433_vm5, %v1429_v15, inf  ;;  %v1485_v15 = vcvt.s32.f32 %v1483_v50 }
 0x27d   : > { %4296 = vmatpush3.bf16.msra.mxu1 %v4293_v9  ;;  %v1448_v34 = vsel %vm1447_vm4, %v1443_v52, inf  ;;  %v4297_v7 = vpack.c.bf16 %v2855_v5, %v2854_v31  ;;  %vm1461_vm7 = vcmp.eq.f32.partialorder %v5367_v1, %v5934_v11  ;;  %v2856_v9 = vld [vmem:[%s7313_s1 + $0x50] sm:$0xff]  ;;  %v1499_v52 = vcvt.s32.f32 %v1497_v40  ;;  %v2858_v31 = vld [vmem:[%s7313_s1 + $0x60] sm:$0xff] }
 0x27e   : > { %1421 = vmin.xlane.f32.xlu1 %v1420_v33  ;;  %1407 = vmin.xlane.f32.xlu0 %v1406_v13  ;;  %v1462_v33 = vsel %vm1461_vm7, %v1457_v60, inf  ;;  %v1511_v13 = vand.u32 65535, %v5407_v24  ;;  %v7722_v24 = vld [vmem:[#allocation71_spill] sm:$0xff]  ;;  %v1527_v60 = vcvt.s32.f32 %v1525_v41 }
 0x27f   : > { %v5936_v0 = vpop.xlane.xlu1 %1473  ;;  %4298 = vmatprep.subr.bf16.mxu1 %v4297_v7  ;;  %v7725_v41 = vld [vmem:[#allocation95_spill] sm:$0xff] }
 0x280   : > { %vm1475_vm6 = vcmp.eq.f32.partialorder %v5413_v35, %v5936_v0  ;;  %v5950_v43 = vpop.xlane.xlu0 %1487  ;;  %v2857_v35 = vld [vmem:[%s7313_s1 + $0x58] sm:$0xff] }
 0x281   : > { %4300 = vmatpush3.bf16.msra.mxu1 %v4297_v7  ;;  %v4301_v1 = vpack.c.bf16 %v2857_v35, %v2856_v9  ;;  %v1476_v54 = vsel %vm1475_vm6, %v1471_v48, inf  ;;  %vm1489_vm9 = vcmp.eq.f32.partialorder %v5391_v25, %v5950_v43  ;;  %v7724_v7 = vld [vmem:[#allocation94_spill] sm:$0xff]  ;;  %v1513_v9 = vcvt.s32.f32 %v1511_v13  ;;  %v2860_v35 = vld [vmem:[%s7313_s1 + $0x70] sm:$0xff] }
 0x282   : > { %1449 = vmin.xlane.f32.xlu1 %v1448_v34  ;;  %1435 = vmin.xlane.f32.xlu0 %v1434_v6  ;;  %v1490_v39 = vsel %vm1489_vm9, %v1485_v15, inf  ;;  %v7723_v34 = vld [vmem:[#allocation70_spill] sm:$0xff]  ;;  %v1539_v40 = vand.u32 65535, %v7724_v7  ;;  %v7726_v13 = vld [vmem:[#allocation96_spill] sm:$0xff]  ;;  %v7727_v15 = vld [vmem:[#allocation97_spill] sm:$0xff] }
 0x283   : > { %v5952_v56 = vpop.xlane.xlu1 %1501  ;;  %4302 = vmatprep.subr.bf16.mxu1 %v4301_v1  ;;  %v1553_v6 = vand.u32 65535, %v7723_v34  ;;  %v7729_v7 = vld [vmem:[#allocation99_spill] sm:$0xff] }
 0x284   : > { %vm1503_vm8 = vcmp.eq.f32.partialorder %v5425_v30, %v5952_v56  ;;  %v5966_v16 = vpop.xlane.xlu0 %1515  ;;  %v2859_v30 = vld [vmem:[%s7313_s1 + $0x68] sm:$0xff] }
 0x285   : > { %4304 = vmatpush3.bf16.msra.mxu1 %v4301_v1  ;;  %v1504_v25 = vsel %vm1503_vm8, %v1499_v52, inf  ;;  %v4305_v5 = vpack.c.bf16 %v2859_v30, %v2858_v31  ;;  %vm1517_vm11 = vcmp.eq.f32.partialorder %v7722_v24, %v5966_v16  ;;  %v1581_v52 = vand.u32 65535, %v7726_v13  ;;  %v7733_v13 = vld [vmem:[#allocation103_spill] sm:$0xff] }
 0x286   : > { %1477 = vmin.xlane.f32.xlu1 %v1476_v54  ;;  %1463 = vmin.xlane.f32.xlu0 %v1462_v33  ;;  %v1518_v33 = vsel %vm1517_vm11, %v1513_v9, inf  ;;  %v1567_v31 = vand.u32 65535, %v7727_v15  ;;  %v1637_v15 = vand.u32 65535, %v7733_v13 }
 0x287   : > { %v5968_v19 = vpop.xlane.xlu1 %1529  ;;  %4306 = vmatprep.subr.bf16.mxu1 %v4305_v5 }
 0x288   : > { %vm1531_vm10 = vcmp.eq.f32.partialorder %v5437_v53, %v5968_v19  ;;  %v5982_v50 = vpop.xlane.xlu0 %1543  ;;  %v2861_v53 = vld [vmem:[%s7313_s1 + $0x78] sm:$0xff] }
 0x289   : > { %4308 = vmatpush3.bf16.msra.mxu1 %v4305_v5  ;;  %v4309_v1 = vpack.c.bf16 %v2861_v53, %v2860_v35  ;;  %v1532_v54 = vsel %vm1531_vm10, %v1527_v60, inf  ;;  %vm1545_vm13 = vcmp.eq.f32.partialorder %v7725_v41, %v5982_v50  ;;  %v1541_v5 = vcvt.s32.f32 %v1539_v40  ;;  %v7730_v60 = vld [vmem:[#allocation100_spill] sm:$0xff]  ;;  %v7731_v35 = vld [vmem:[#allocation102_spill] sm:$0xff]  ;;  %v7732_v41 = vld [vmem:[#allocation101_spill] sm:$0xff] }
 0x28a   : > { %1505 = vmin.xlane.f32.xlu1 %v1504_v25  ;;  %1491 = vmin.xlane.f32.xlu0 %v1490_v39  ;;  %v1555_v39 = vcvt.s32.f32 %v1553_v6  ;;  %v1609_v9 = vand.u32 65535, %v7730_v60  ;;  %v1595_v53 = vand.u32 65535, %v7731_v35  ;;  %v1583_v6 = vcvt.s32.f32 %v1581_v52  ;;  %v7735_v52 = vld [vmem:[#allocation105_spill] sm:$0xff] }
 0x28b   : > { %v5984_v48 = vpop.xlane.xlu1 %1557  ;;  %4310 = vmatprep.subr.bf16.mxu1 %v4309_v1  ;;  %v1546_v34 = vsel %vm1545_vm13, %v1541_v5, inf  ;;  %v1569_v40 = vcvt.s32.f32 %v1567_v31  ;;  %v1623_v31 = vand.u32 65535, %v7735_v52  ;;  %v1639_v35 = vcvt.s32.f32 %v1637_v15  ;;  %v7741_v52 = vld [vmem:[#allocation110_spill] sm:$0xff] }
 0x28c   : > { %vm1559_vm12 = vcmp.eq.f32.partialorder %v5450_v45, %v5984_v48  ;;  %v7728_v45 = vld [vmem:[#allocation98_spill] sm:$0xff]  ;;  %v1611_v5 = vcvt.s32.f32 %v1609_v9 }
 0x28d   : > { %4312 = vmatpush3.bf16.msra.mxu1 %v4309_v1  ;;  %v1560_v24 = vsel %vm1559_vm12, %v1555_v39, inf }
 0x28e   : > { %1533 = vmin.xlane.f32.xlu1 %v1532_v54  ;;  %1519 = vmin.xlane.f32.xlu0 %v1518_v33 }
 0x28f   : > { %v5998_v30 = vpop.xlane.xlu1 %1585  ;;  %v6000_v25 = vpop.xlane.xlu0 %1571 }
 0x290   : > { %vm1587_vm14 = vcmp.eq.f32.partialorder %v7728_v45, %v5998_v30  ;;  %vm1573_vm15 = vcmp.eq.f32.partialorder %v7729_v7, %v6000_v25 }
 0x291   : > { %v1588_v33 = vsel %vm1587_vm14, %v1583_v6, inf  ;;  %v1574_v1 = vsel %vm1573_vm15, %v1569_v40, inf  ;;  %v7736_v6 = vld [vmem:[#allocation104_spill] sm:$0xff] }
 0x292   : > { %1561 = vmin.xlane.f32.xlu1 %v1560_v24  ;;  %1547 = vmin.xlane.f32.xlu0 %v1546_v34  ;;  %v1597_v24 = vcvt.s32.f32 %v1595_v53  ;;  %v7734_v34 = vld [vmem:[#allocation77_spill] sm:$0xff] }
 0x293   : > { %v6008_v54 = vpop.xlane.xlu1 %1613 }
 0x294   : > { %vm1615_vm0 = vcmp.eq.f32.partialorder %v7732_v41, %v6008_v54  ;;  %v7738_v41 = vld [vmem:[#allocation80_spill] sm:$0xff] }
 0x295   : > { %v1616_v45 = vsel %vm1615_vm0, %v1611_v5, inf  ;;  %v7739_v5 = vld [vmem:[#allocation108_spill] sm:$0xff] }
 0x296   : > { %1589 = vmin.xlane.f32.xlu1 %v1588_v33  ;;  %1575 = vmin.xlane.f32.xlu0 %v1574_v1  ;;  %v7737_v33 = vld [vmem:[#allocation106_spill] sm:$0xff]  ;;  %v1625_v1 = vcvt.s32.f32 %v1623_v31 }
 0x297   : > { %v6013_v39 = vpop.xlane.xlu0 %1599  ;;  %v1665_v9 = vand.u32 65535, %v7737_v33 }
 0x298   : > { %vm1601_vm1 = vcmp.eq.f32.partialorder %v7734_v34, %v6013_v39 }
 0x299   : > { %v1602_v7 = vsel %vm1601_vm1, %v1597_v24, inf  ;;  %v1651_v24 = vand.u32 65535, %v7739_v5  ;;  %v1667_v15 = vcvt.s32.f32 %v1665_v9  ;;  %v7746_v5 = vld [vmem:[#allocation84_spill] sm:$0xff] }
 0x29a   : > { %1617 = vmin.xlane.f32.xlu1 %v1616_v45  ;;  %1603 = vmin.xlane.f32.xlu0 %v1602_v7  ;;  %v7740_v45 = vld [vmem:[#allocation107_spill] sm:$0xff] }
 0x29b   : > { %v6018_v60 = vpop.xlane.xlu1 %1641  ;;  %v1653_v31 = vcvt.s32.f32 %v1651_v24 }
 0x29c   : > { %vm1643_vm2 = vcmp.eq.f32.partialorder %v7736_v6, %v6018_v60 }
 0x29d   : > { %v1644_v40 = vsel %vm1643_vm2, %v1639_v35, inf  ;;  %v1693_v35 = vand.u32 65535, %v7741_v52 }
 0x29e   : > { %1645 = vmin.xlane.f32.xlu1 %v1644_v40  ;;  %v7743_v40 = vld [vmem:[#allocation109_spill] sm:$0xff] }
 0x29f   : > { %v6023_v53 = vpop.xlane.xlu0 %1627  ;;  %v1695_v9 = vcvt.s32.f32 %v1693_v35  ;;  %v1791_v35 = vand.u32 65535, %v5584_v29  ;;  %v1931_v29 = vand.u32 65535, %v5673_v58 }
 0x2a0   : > { %vm1629_vm3 = vcmp.eq.f32.partialorder %v7738_v41, %v6023_v53 }
 0x2a1   : > { %v1630_v13 = vsel %vm1629_vm3, %v1625_v1, inf  ;;  %v7744_v1 = vld [vmem:[#allocation111_spill] sm:$0xff] }
 0x2a2   : > { %1631 = vmin.xlane.f32.xlu0 %v1630_v13  ;;  %v1679_v41 = vand.u32 65535, %v7744_v1 }
 0x2a3   : > { %v6028_v34 = vpop.xlane.xlu1 %1669 }
 0x2a4   : > { %vm1671_vm4 = vcmp.eq.f32.partialorder %v7740_v45, %v6028_v34  ;;  %v7747_v45 = vld [vmem:[#allocation113_spill] sm:$0xff]  ;;  %v1681_v24 = vcvt.s32.f32 %v1679_v41 }
 0x2a5   : > { %v1672_v7 = vsel %vm1671_vm4, %v1667_v15, inf }
 0x2a6   : > { %1673 = vmin.xlane.f32.xlu1 %v1672_v7  ;;  %v1721_v7 = vand.u32 65535, %v7747_v45 }
 0x2a7   : > { %v6033_v6 = vpop.xlane.xlu0 %1655 }
 0x2a8   : > { %7742 = vst [vmem:[#allocation71_spill] sm:$0xff] %v6033_v6  ;;  %vm1657_vm5 = vcmp.eq.f32.partialorder %v7743_v40, %v6033_v6  ;;  %v7750_v40 = vld [vmem:[#allocation115_spill] sm:$0xff]  ;;  %v1723_v51 = vcvt.s32.f32 %v1721_v7  ;;  %v6065_v7 = vcvt.s32.f32 %v1819_v23 }
 0x2a9   : > { %v1658_v33 = vsel %vm1657_vm5, %v1653_v31, inf  ;;  %v1763_v31 = vand.u32 65535, %v7750_v40  ;;  %v1903_v40 = vand.u32 65535, %v5656_v59 }
 0x2aa   : > { %1659 = vmin.xlane.f32.xlu0 %v1658_v33  ;;  %v7751_v33 = vld [vmem:[#allocation112_spill] sm:$0xff] }
 0x2ab   : > { %v6038_v13 = vpop.xlane.xlu1 %1697  ;;  %v6079_v23 = vcvt.s32.f32 %v1903_v40  ;;  %v7759_v40 = vld [vmem:[#allocation120_spill] sm:$0xff] }
 0x2ac   : > { %7745 = vst [vmem:[#allocation70_spill] sm:$0xff] %v6038_v13  ;;  %vm1699_vm6 = vcmp.eq.f32.partialorder %v7746_v5, %v6038_v13  ;;  %v1875_v5 = vand.u32 65535, %v5639_v57  ;;  %v7754_v13 = vld [vmem:[#allocation72_spill] sm:$0xff]  ;;  %v2015_v57 = vand.u32 65535, %v5724_v14  ;;  %v2099_v14 = vand.u32 65535, %v5772_v55 }
 0x2ad   : > { %v1700_v15 = vsel %vm1699_vm6, %v1695_v9, inf  ;;  %v1847_v9 = vand.u32 65535, %v5620_v36  ;;  %v1987_v36 = vand.u32 65535, %v5707_v27  ;;  %v2071_v27 = vand.u32 65535, %v5756_v42 }
 0x2ae   : > { %1701 = vmin.xlane.f32.xlu1 %v1700_v15  ;;  %v7752_v15 = vld [vmem:[#allocation114_spill] sm:$0xff]  ;;  %v6073_v22 = vcvt.s32.f32 %v1875_v5  ;;  %v2127_v5 = vand.u32 65535, %v5788_v46  ;;  %v6090_v55 = vcvt.s32.f32 %v2015_v57  ;;  %v7763_v46 = vld [vmem:[#allocation117_spill] sm:$0xff]  ;;  %v6106_v57 = vcvt.s32.f32 %v2099_v14 }
 0x2af   : > { %v6043_v52 = vpop.xlane.xlu0 %1683  ;;  %v1707_v45 = vand.u32 65535, %v7752_v15  ;;  %v6063_v15 = vcvt.s32.f32 %v1791_v35  ;;  %v6067_v59 = vcvt.s32.f32 %v1847_v9  ;;  %v7757_v35 = vld [vmem:[#allocation73_spill] sm:$0xff] }
 0x2b0   : > { %7748 = vst [vmem:[#allocation94_spill] sm:$0xff] %v6043_v52  ;;  %vm1685_vm7 = vcmp.eq.f32.partialorder %v7751_v33, %v6043_v52  ;;  %v1765_v33 = vcvt.s32.f32 %v1763_v31 }
 0x2b1   : > { %v1686_v1 = vsel %vm1685_vm7, %v1681_v24, inf  ;;  %v1737_v24 = vcvt.s32.f32 %v1735_v26  ;;  %v7755_v26 = vld [vmem:[#allocation116_spill] sm:$0xff]  ;;  %v1709_v58 = vcvt.s32.f32 %v1707_v45  ;;  %v1777_v45 = vand.u32 65535, %v5587_v63  ;;  %v7762_v63 = vld [vmem:[#allocation74_spill] sm:$0xff] }
 0x2b2   : > { %1687 = vmin.xlane.f32.xlu0 %v1686_v1  ;;  %v1749_v31 = vand.u32 65535, %v7755_v26  ;;  %v7758_v26 = vld [vmem:[#allocation118_spill] sm:$0xff] }
 0x2b3   : > { %v6054_v41 = vpop.xlane.xlu1 %1725  ;;  %v1805_v42 = vand.u32 65535, %v7758_v26  ;;  %v1861_v26 = vand.u32 65535, %v5642_v21 }
 0x2b4   : > { %7753 = vst [vmem:[#allocation95_spill] sm:$0xff] %v6054_v41  ;;  %vm1727_vm8 = vcmp.eq.f32.partialorder %v7754_v13, %v6054_v41  ;;  %v2043_v13 = vand.u32 65535, %v5740_v38  ;;  %v6083_v38 = vcvt.s32.f32 %v1959_v20  ;;  %v1751_v20 = vcvt.s32.f32 %v1749_v31 }
 0x2b5   : > { %v1728_v1 = vsel %vm1727_vm8, %v1723_v51, inf  ;;  %v6081_v51 = vcvt.s32.f32 %v1931_v29  ;;  %v2211_v31 = vand.u32 65535, %v5836_v47  ;;  %v1807_v6 = vcvt.s32.f32 %v1805_v42 }
 0x2b6   : > { %1729 = vmin.xlane.f32.xlu1 %v1728_v1  ;;  %v6085_v1 = vcvt.s32.f32 %v1987_v36  ;;  %v6098_v36 = vcvt.s32.f32 %v2043_v13  ;;  %v1779_v13 = vcvt.s32.f32 %v1777_v45  ;;  %v1945_v47 = vand.u32 65535, %v5693_v44  ;;  %v7770_v45 = vld [vmem:[#allocation91_spill] sm:$0xff] }
 0x2b7   : > { %v6071_v41 = vpop.xlane.xlu0 %1711  ;;  %v6132_v44 = vcvt.s32.f32 %v2211_v31 }
 0x2b8   : > { %7756 = vst [vmem:[#allocation96_spill] sm:$0xff] %v6071_v41  ;;  %vm1713_vm9 = vcmp.eq.f32.partialorder %v7757_v35, %v6071_v41  ;;  %v2155_v35 = vand.u32 65535, %v5804_v4  ;;  %v1833_v41 = vand.u32 65535, %v7759_v40  ;;  %v2183_v4 = vand.u32 65535, %v5820_v32 }
 0x2b9   : > { %v1714_v9 = vsel %vm1713_vm9, %v1709_v58, inf }
 0x2ba   : > { %1715 = vmin.xlane.f32.xlu0 %v1714_v9  ;;  %v6104_v9 = vcvt.s32.f32 %v2071_v27  ;;  %v2239_v27 = vand.u32 65535, %v5852_v2  ;;  %v1835_v32 = vcvt.s32.f32 %v1833_v41  ;;  %v6119_v21 = vcvt.s32.f32 %v2155_v35  ;;  %v7772_v41 = vld [vmem:[#allocation130_spill] sm:$0xff] }
 0x2bb   : > { %v6094_v58 = vpop.xlane.xlu1 %1753  ;;  %v6096_v29 = vpop.xlane.xlu0 %1739  ;;  %v1863_v2 = vcvt.s32.f32 %v1861_v26  ;;  %v2001_v35 = vand.u32 65535, %v7772_v41 }
 0x2bc   : > { %7760 = vst [vmem:[#allocation97_spill] sm:$0xff] %v6094_v58  ;;  %7761 = vst [vmem:[#allocation98_spill] sm:$0xff] %v6096_v29  ;;  %vm1755_vm10 = vcmp.eq.f32.partialorder %v7762_v63, %v6094_v58  ;;  %vm1741_vm11 = vcmp.eq.f32.partialorder %v7763_v46, %v6096_v29  ;;  %v6111_v63 = vcvt.s32.f32 %v2127_v5  ;;  %v7765_v58 = vld [vmem:[#allocation123_spill] sm:$0xff]  ;;  %v6142_v26 = vcvt.s32.f32 %v2239_v27 }
 0x2bd   : > { %v1756_v40 = vsel %vm1755_vm10, %v1751_v20, inf  ;;  %v1742_v52 = vsel %vm1741_vm11, %v1737_v24, inf  ;;  %v1889_v46 = vand.u32 65535, %v7765_v58  ;;  %7767 = vst [vmem:[#allocation102_spill] sm:$0xff] %v6119_v21  ;;  %v7768_v24 = vld [vmem:[#allocation125_spill] sm:$0xff]  ;;  %v6127_v58 = vcvt.s32.f32 %v2183_v4 }
 0x2be   : > { %1757 = vmin.xlane.f32.xlu1 %v1756_v40  ;;  %1743 = vmin.xlane.f32.xlu0 %v1742_v52  ;;  %7764 = vst [vmem:[#allocation99_spill] sm:$0xff] %v6111_v63  ;;  %v1917_v20 = vand.u32 65535, %v7768_v24  ;;  %v7769_v52 = vld [vmem:[#allocation75_spill] sm:$0xff]  ;;  %v7771_v40 = vld [vmem:[#allocation128_spill] sm:$0xff]  ;;  %v2029_v21 = vand.u32 65535, %v5743_v49  ;;  %v7773_v24 = vld [vmem:[#allocation133_spill] sm:$0xff]  ;;  %v1410_v27 = vcvt.f32.s32 %v5902_v62 }
 0x2bf   : > { %v6115_v14 = vpop.xlane.xlu1 %1781  ;;  %v6117_v29 = vpop.xlane.xlu0 %1767  ;;  %v1973_v63 = vand.u32 65535, %v7771_v40  ;;  %v6140_v4 = vcvt.s32.f32 %v1889_v46  ;;  %7774 = vst [vmem:[#allocation101_spill] sm:$0xff] %v6142_v26  ;;  %v7776_v49 = vld [vmem:[#allocation119_spill] sm:$0xff]  ;;  %v2113_v40 = vand.u32 65535, %v5791_v37  ;;  %v7779_v62 = vld [vmem:[#allocation142_spill] sm:$0xff] }
 0x2c0   : > { %7766 = vst [vmem:[#allocation100_spill] sm:$0xff] %v6115_v14  ;;  %vm1783_vm12 = vcmp.eq.f32.partialorder %v7769_v52, %v6115_v14  ;;  %vm1769_vm13 = vcmp.eq.f32.partialorder %v7770_v45, %v6117_v29  ;;  %v2057_v52 = vand.u32 65535, %v7773_v24  ;;  %v1382_v14 = vcvt.f32.s32 %v5880_v10 }
 0x2c1   : > { %v1784_v5 = vsel %vm1783_vm12, %v1779_v13, inf  ;;  %v1770_v42 = vsel %vm1769_vm13, %v1765_v33, inf  ;;  %v7775_v13 = vld [vmem:[#allocation76_spill] sm:$0xff]  ;;  %v6148_v31 = vcvt.s32.f32 %v1917_v20  ;;  %v6156_v24 = vcvt.s32.f32 %v1973_v63 }
 0x2c2   : > { %1785 = vmin.xlane.f32.xlu1 %v1784_v5  ;;  %1771 = vmin.xlane.f32.xlu0 %v1770_v42  ;;  %v6150_v5 = vcvt.s32.f32 %v1945_v47  ;;  %v7777_v42 = vld [vmem:[#allocation135_spill] sm:$0xff]  ;;  %v6162_v20 = vshll.u32 %v1382_v14, 16  ;;  %v2141_v47 = vand.u32 65535, %v5807_v17  ;;  %v1438_v63 = vcvt.f32.s32 %v5918_v61  ;;  %v7781_v14 = vld [vmem:[#allocation121_spill] sm:$0xff] }
 0x2c3   : > { %v6136_v45 = vpop.xlane.xlu1 %1809  ;;  %v6138_v33 = vpop.xlane.xlu0 %1795  ;;  %v2085_v10 = vand.u32 65535, %v7777_v42  ;;  %v2169_v42 = vand.u32 65535, %v5823_v12  ;;  %v1466_v61 = vcvt.f32.s32 %v5934_v11  ;;  %v7786_v11 = vld [vmem:[#allocation122_spill] sm:$0xff] }
 0x2c4   : > { %vm1811_vm14 = vcmp.eq.f32.partialorder %v7775_v13, %v6136_v45  ;;  %vm1797_vm15 = vcmp.eq.f32.partialorder %v7776_v49, %v6138_v33  ;;  %v6158_v13 = vcvt.s32.f32 %v2001_v35  ;;  %v6160_v49 = vcvt.s32.f32 %v2029_v21  ;;  %7778 = vst [vmem:[#allocation103_spill] sm:$0xff] %v6162_v20  ;;  %v7780_v35 = vld [vmem:[#allocation78_spill] sm:$0xff] }
 0x2c5   : > { %v1812_v41 = vsel %vm1811_vm14, %v1807_v6, inf  ;;  %v1798_v46 = vsel %vm1797_vm15, %v6063_v15, inf  ;;  %v6170_v15 = vcvt.s32.f32 %v2057_v52  ;;  %v6179_v12 = vcvt.s32.f32 %v2085_v10  ;;  %v7782_v52 = vld [vmem:[#allocation145_spill] sm:$0xff] }
 0x2c6   : > { %1813 = vmin.xlane.f32.xlu1 %v1812_v41  ;;  %1799 = vmin.xlane.f32.xlu0 %v1798_v46  ;;  %v2197_v41 = vand.u32 65535, %v7779_v62  ;;  %v6181_v46 = vcvt.s32.f32 %v2113_v40  ;;  %v6183_v20 = vshll.u32 %v1410_v27, 16  ;;  %v2225_v26 = vand.u32 65535, %v7782_v52 }
 0x2c7   : > { %v6166_v37 = vpop.xlane.xlu1 %1837  ;;  %v6168_v6 = vpop.xlane.xlu0 %1823  ;;  %v2253_v62 = vand.u32 65535, %v5873_v8  ;;  %v6193_v10 = vcvt.s32.f32 %v2141_v47  ;;  %v6195_v40 = vcvt.s32.f32 %v2169_v42  ;;  %v7783_v27 = vlaneseq  ;;  %v7785_v8 = vld [vmem:[#allocation79_spill] sm:$0xff] }
 0x2c8   : > { %vm1839_vm0 = vcmp.eq.f32.partialorder %v7780_v35, %v6166_v37  ;;  %vm1825_vm1 = vcmp.eq.f32.partialorder %v7781_v14, %v6168_v6  ;;  %v1396_v35 = vcvt.f32.s32 %v5882_v18  ;;  %v6200_v52 = vshll.u32 %v1438_v63, 16 }
 0x2c9   : > { %v1840_v21 = vsel %vm1839_vm0, %v1835_v32, inf  ;;  %v1826_v17 = vsel %vm1825_vm1, %v6065_v7, inf  ;;  %v6198_v14 = vshrl.u32 %v7783_v27, 7  ;;  %v6206_v18 = vcvt.s32.f32 %v2197_v41 }
 0x2ca   : > { %1841 = vmin.xlane.f32.xlu1 %v1840_v21  ;;  %1827 = vmin.xlane.f32.xlu0 %v1826_v17  ;;  %7784 = vst [vmem:[#allocation77_spill] sm:$0xff] %v6200_v52  ;;  %v1424_v21 = vcvt.f32.s32 %v5904_v28  ;;  %v1494_v47 = vcvt.f32.s32 %v5950_v43  ;;  %v6212_v27 = vshll.u32 %v1466_v61, 16  ;;  %v1452_v63 = vcvt.f32.s32 %v5920_v3 }
 0x2cb   : > { %v6189_v32 = vpop.xlane.xlu1 %1865  ;;  %v6191_v7 = vpop.xlane.xlu0 %1851  ;;  %v6217_v52 = vcvt.s32.f32 %v2253_v62  ;;  %v6219_v41 = vshll.u32 %v1396_v35, 16  ;;  %v1480_v28 = vcvt.f32.s32 %v5936_v0  ;;  %v1522_v43 = vcvt.f32.s32 %v5966_v16 }
 0x2cc   : > { %vm1867_vm2 = vcmp.eq.f32.partialorder %v7785_v8, %v6189_v32  ;;  %vm1853_vm3 = vcmp.eq.f32.partialorder %v7786_v11, %v6191_v7  ;;  %7787 = vst [vmem:[#allocation105_spill] sm:$0xff] %v6212_v27  ;;  %v6215_v8 = vcvt.s32.f32 %v2225_v26  ;;  %v2461_v61 = vadd.s32 8, %v6198_v14  ;;  %v7788_v11 = vld [vmem:[#allocation81_spill] sm:$0xff]  ;;  %v7789_v26 = vld [vmem:[#allocation124_spill] sm:$0xff] }
 0x2cd   : > { %v1868_v17 = vsel %vm1867_vm2, %v1863_v2, inf  ;;  %v1854_v42 = vsel %vm1853_vm3, %v6067_v59, inf  ;;  %v1508_v3 = vcvt.f32.s32 %v5952_v56  ;;  %v6233_v62 = vstv %s3763_s12 }
 0x2ce   : > { %1869 = vmin.xlane.f32.xlu1 %v1868_v17  ;;  %1855 = vmin.xlane.f32.xlu0 %v1854_v42  ;;  %v6235_v35 = vshll.u32 %v1424_v21, 16  ;;  %v6237_v0 = vshll.u32 %v1494_v47, 16  ;;  %v6241_v42 = vshll.u32 %v1452_v63, 16  ;;  %v1536_v56 = vcvt.f32.s32 %v5968_v19  ;;  %v7795_v63 = vld [vmem:[#allocation126_spill] sm:$0xff] }
 0x2cf   : > { %v6223_v2 = vpop.xlane.xlu1 %1893  ;;  %v6225_v59 = vpop.xlane.xlu0 %1879  ;;  %v1550_v27 = vcvt.f32.s32 %v5982_v50  ;;  %v6248_v21 = vshll.u32 %v1522_v43, 16  ;;  %v6257_v19 = vshll.u32 %v1508_v3, 16  ;;  %v7794_v50 = vld [vmem:[#allocation82_spill] sm:$0xff]  ;;  %v1564_v43 = vcvt.f32.s32 %v5984_v48 }
 0x2d0   : > { %vm1895_vm4 = vcmp.eq.f32.partialorder %v7788_v11, %v6223_v2  ;;  %vm1881_vm5 = vcmp.eq.f32.partialorder %v7789_v26, %v6225_v59  ;;  %7790 = vst [vmem:[#allocation104_spill] sm:$0xff] %v6237_v0  ;;  %v2462_v11 = vadd.s32 16, %v6198_v14  ;;  %v6246_v26 = vshll.u32 %v1480_v28, 16 }
 0x2d1   : > { %v1896_v16 = vsel %vm1895_vm4, %v6140_v4, inf  ;;  %v1882_v17 = vsel %vm1881_vm5, %v6073_v22, inf  ;;  %7792 = vst [vmem:[#allocation80_spill] sm:$0xff] %v6248_v21  ;;  %v2526_v22 = vadd.s32 %v6233_v62, %v6198_v14  ;;  %v2527_v4 = vadd.s32 %v6233_v62, %v2461_v61  ;;  %7793 = vst [vmem:[#allocation108_spill] sm:$0xff] %v6257_v19 }
 0x2d2   : > { %1897 = vmin.xlane.f32.xlu1 %v1896_v16  ;;  %1883 = vmin.xlane.f32.xlu0 %v1882_v17  ;;  %7791 = vst [vmem:[#allocation106_spill] sm:$0xff] %v6246_v26  ;;  %v2463_v28 = vadd.s32 24, %v6198_v14  ;;  %v6267_v21 = vshll.u32 %v1536_v56, 16  ;;  %v6269_v26 = vshll.u32 %v1550_v27, 16  ;;  %v2528_v61 = vadd.s32 %v6233_v62, %v2462_v11 }
 0x2d3   : > { %v6250_v47 = vpop.xlane.xlu1 %1921  ;;  %v6252_v0 = vpop.xlane.xlu0 %1907  ;;  %v2464_v3 = vadd.s32 32, %v6198_v14  ;;  %vm2590_vm8 = vcmp.lt.s32.totalorder %v2526_v22, 800  ;;  %vm2591_vm9 = vcmp.lt.s32.totalorder %v2527_v4, 800  ;;  %v2465_v56 = vadd.s32 40, %v6198_v14 }
 0x2d4   : > { %vm1923_vm6 = vcmp.eq.f32.partialorder %v7794_v50, %v6250_v47  ;;  %vm1909_vm7 = vcmp.eq.f32.partialorder %v7795_v63, %v6252_v0  ;;  %7796 = vst [vmem:[#allocation107_spill] sm:$0xff] %v6267_v21  ;;  %7797 = vst [vmem:[#allocation110_spill] sm:$0xff] %v6269_v26  ;;  %v1592_v50 = vcvt.f32.s32 %v5998_v30  ;;  %v1578_v63 = vcvt.f32.s32 %v6000_v25 }
 0x2d5   : > { %v1924_v16 = vsel %vm1923_vm6, %v6148_v31, inf  ;;  %v1910_v17 = vsel %vm1909_vm7, %v6079_v23, inf  ;;  %v7798_v23 = vld [vmem:[#allocation83_spill] sm:$0xff]  ;;  %v2529_v27 = vadd.s32 %v6233_v62, %v2463_v28  ;;  %v6285_v11 = vshll.u32 %v1564_v43, 16 }
 0x2d6   : > { %1925 = vmin.xlane.f32.xlu1 %v1924_v16  ;;  %1911 = vmin.xlane.f32.xlu0 %v1910_v17  ;;  %v7799_v31 = vld [vmem:[#allocation127_spill] sm:$0xff]  ;;  %v2466_v16 = vadd.s32 48, %v6198_v14  ;;  %v7507_v22 = vmov 0.0   ;;  %vm2592_vm12 = vcmp.lt.s32.totalorder %v2528_v61, 800  ;;  %v2467_v28 = vadd.s32 56, %v6198_v14  ;;  %v7803_v61 = vld [vmem:[#allocation85_spill] sm:$0xff] }
 0x2d7   : > { %v6275_v19 = vpop.xlane.xlu1 %1949  ;;  %v6277_v48 = vpop.xlane.xlu0 %1935  ;;  %7800 = vst [vmem:[#allocation109_spill] sm:$0xff] %v6285_v11  ;;  %v6291_v17 = vsel %vm2590_vm8, 1.0, %v7507_v22  ;;  %v6297_v43 = vshll.u32 %v1578_v63, 16  ;;  %vm2593_vm15 = vcmp.lt.s32.totalorder %v2529_v27, 800  ;;  %v2469_v27 = vadd.s32 72, %v6198_v14 }
 0x2d8   : > { %vm1951_vm10 = vcmp.eq.f32.partialorder %v7798_v23, %v6275_v19  ;;  %vm1937_vm11 = vcmp.eq.f32.partialorder %v7799_v31, %v6277_v48  ;;  %v2530_v23 = vadd.s32 %v6233_v62, %v2464_v3  ;;  %v6295_v31 = vshll.u32 %v1592_v50, 16  ;;  %v7804_v3 = vld [vmem:[#allocation129_spill] sm:$0xff] }
 0x2d9   : > { %v1952_v30 = vsel %vm1951_vm10, %v6150_v5, inf  ;;  %v1938_v25 = vsel %vm1937_vm11, %v6081_v51, inf  ;;  %7802 = vst [vmem:[#allocation84_spill] sm:$0xff] %v6297_v43  ;;  %v1620_v5 = vcvt.f32.s32 %v6008_v54  ;;  %v2531_v50 = vadd.s32 %v6233_v62, %v2465_v56 }
 0x2da   : > { %1953 = vmin.xlane.f32.xlu1 %v1952_v30  ;;  %1939 = vmin.xlane.f32.xlu0 %v1938_v25  ;;  %7801 = vst [vmem:[#allocation111_spill] sm:$0xff] %v6295_v31  ;;  %v6306_v30 = vsel %vm2591_vm9, 1.0, %v7507_v22  ;;  %v6316_v25 = vsel %vm2592_vm12, 1.0, %v7507_v22  ;;  %v2532_v4 = vadd.s32 %v6233_v62, %v2466_v16  ;;  %vm2594_vm0 = vcmp.lt.s32.totalorder %v2530_v23, 800  ;;  %v7809_v31 = vld [vmem:[#allocation131_spill] sm:$0xff] }
 0x2db   : > { %v6300_v51 = vpop.xlane.xlu1 %1977  ;;  %v6302_v26 = vpop.xlane.xlu0 %1963  ;;  %v2468_v43 = vadd.s32 64, %v6198_v14  ;;  %v2470_v16 = vadd.s32 80, %v6198_v14  ;;  %vm2595_vm3 = vcmp.lt.s32.totalorder %v2531_v50, 800  ;;  %v6342_v11 = vsel %vm2594_vm0, 1.0, %v7507_v22 }
 0x2dc   : > { %vm1979_vm13 = vcmp.eq.f32.partialorder %v7803_v61, %v6300_v51  ;;  %vm1965_vm14 = vcmp.eq.f32.partialorder %v7804_v3, %v6302_v26  ;;  %v2533_v61 = vadd.s32 %v6233_v62, %v2467_v28  ;;  %v6322_v3 = vshll.u32 %v1620_v5, 16  ;;  %v7808_v28 = vld [vmem:[#allocation86_spill] sm:$0xff] }
 0x2dd   : > { %v1980_v63 = vsel %vm1979_vm13, %v6156_v24, inf  ;;  %v1966_v54 = vsel %vm1965_vm14, %v6083_v38, inf  ;;  %v6329_v38 = vsel %vm2593_vm15, 1.0, %v7507_v22  ;;  %vm2596_vm4 = vcmp.lt.s32.totalorder %v2532_v4, 800 }
 0x2de   : > { %1981 = vmin.xlane.f32.xlu1 %v1980_v63  ;;  %1967 = vmin.xlane.f32.xlu0 %v1966_v54  ;;  %7805 = vst [vmem:[#allocation113_spill] sm:$0xff] %v6322_v3  ;;  %v2471_v63 = vadd.s32 88, %v6198_v14  ;;  %v1606_v54 = vcvt.f32.s32 %v6013_v39  ;;  %v1648_v21 = vcvt.f32.s32 %v6018_v60  ;;  %vm2597_vm5 = vcmp.lt.s32.totalorder %v2533_v61, 800  ;;  %v7818_v61 = vld [vmem:[#allocation89_spill] sm:$0xff] }
 0x2df   : > { %v6324_v56 = vpop.xlane.xlu1 %2005  ;;  %v6326_v24 = vpop.xlane.xlu0 %1991  ;;  %v2534_v39 = vadd.s32 %v6233_v62, %v2468_v43  ;;  %v2472_v60 = vadd.s32 96, %v6198_v14  ;;  %v7813_v43 = vld [vmem:[#allocation132_spill] sm:$0xff]  ;;  %v2474_v4 = vadd.s32 112, %v6198_v14 }
 0x2e0   : > { %7806 = vst [vmem:[#allocation87_spill] sm:$0xff] %v6324_v56  ;;  %7807 = vst [vmem:[#allocation115_spill] sm:$0xff] %v6326_v24  ;;  %vm2007_vm1 = vcmp.eq.f32.partialorder %v7808_v28, %v6324_v56  ;;  %vm1993_vm2 = vcmp.eq.f32.partialorder %v7809_v31, %v6326_v24  ;;  %v2535_v28 = vadd.s32 %v6233_v62, %v2469_v27  ;;  %v2473_v27 = vadd.s32 104, %v6198_v14 }
 0x2e1   : > { %v2008_v5 = vsel %vm2007_vm1, %v6158_v13, inf  ;;  %v1994_v3 = vsel %vm1993_vm2, %v6085_v1, inf  ;;  %v6352_v1 = vsel %vm2595_vm3, 1.0, %v7507_v22  ;;  %v2536_v13 = vadd.s32 %v6233_v62, %v2470_v16 }
 0x2e2   : > { %2009 = vmin.xlane.f32.xlu1 %v2008_v5  ;;  %1995 = vmin.xlane.f32.xlu0 %v1994_v3  ;;  %v2537_v23 = vadd.s32 %v6233_v62, %v2471_v63  ;;  %v6357_v5 = vshll.u32 %v1606_v54, 16  ;;  %v7812_v3 = vld [vmem:[#allocation88_spill] sm:$0xff]  ;;  %v7814_v56 = vmov 0.0   ;;  %v6374_v54 = vshll.u32 %v1648_v21, 16  ;;  %v7819_v21 = vld [vmem:[#allocation134_spill] sm:$0xff] }
 0x2e3   : > { %v6347_v31 = vpop.xlane.xlu1 %2033  ;;  %v6349_v50 = vpop.xlane.xlu0 %2019  ;;  %v6368_v16 = vsel %vm2596_vm4, 1.0, %v7814_v56  ;;  %v6372_v63 = vsel %vm2597_vm5, 1.0, %v7814_v56  ;;  %vm2598_vm8 = vcmp.lt.s32.totalorder %v2534_v39, 800  ;;  %vm2599_vm9 = vcmp.lt.s32.totalorder %v2535_v28, 800  ;;  %v7823_v28 = vld [vmem:[#allocation90_spill] sm:$0xff] }
 0x2e4   : > { %7810 = vst [vmem:[#allocation112_spill] sm:$0xff] %v6347_v31  ;;  %7811 = vst [vmem:[#allocation114_spill] sm:$0xff] %v6349_v50  ;;  %vm2035_vm6 = vcmp.eq.f32.partialorder %v7812_v3, %v6347_v31  ;;  %vm2021_vm7 = vcmp.eq.f32.partialorder %v7813_v43, %v6349_v50  ;;  %v1634_v3 = vcvt.f32.s32 %v6023_v53  ;;  %vm2600_vm10 = vcmp.lt.s32.totalorder %v2536_v13, 800 }
 0x2e5   : > { %v2036_v24 = vsel %vm2035_vm6, %v6160_v49, inf  ;;  %v2022_v22 = vsel %vm2021_vm7, %v6090_v55, inf  ;;  %7815 = vst [vmem:[#allocation72_spill] sm:$0xff] %v6374_v54  ;;  %vm2601_vm11 = vcmp.lt.s32.totalorder %v2537_v23, 800  ;;  %v2538_v55 = vadd.s32 %v6233_v62, %v2472_v60 }
 0x2e6   : > { %2037 = vmin.xlane.f32.xlu1 %v2036_v24  ;;  %2023 = vmin.xlane.f32.xlu0 %v2022_v22  ;;  %v2539_v53 = vadd.s32 %v6233_v62, %v2473_v27  ;;  %v2475_v22 = vadd.s32 120, %v6198_v14  ;;  %v6392_v54 = vsel %vm2598_vm8, 1.0, %v7814_v56  ;;  %v2476_v60 = vadd.s32 128, %v6198_v14 }
 0x2e7   : > { %v6377_v43 = vpop.xlane.xlu1 %2061  ;;  %v6379_v49 = vpop.xlane.xlu0 %2047  ;;  %v6395_v50 = vshll.u32 %v1634_v3, 16  ;;  %v6400_v27 = vsel %vm2599_vm9, 1.0, %v7814_v56  ;;  %v6413_v3 = vsel %vm2601_vm11, 1.0, %v7814_v56  ;;  %vm2602_vm14 = vcmp.lt.s32.totalorder %v2538_v55, 800 }
 0x2e8   : > { %7816 = vst [vmem:[#allocation116_spill] sm:$0xff] %v6377_v43  ;;  %7817 = vst [vmem:[#allocation73_spill] sm:$0xff] %v6379_v49  ;;  %vm2063_vm12 = vcmp.eq.f32.partialorder %v7818_v61, %v6377_v43  ;;  %vm2049_vm13 = vcmp.eq.f32.partialorder %v7819_v21, %v6379_v49  ;;  %v1676_v61 = vcvt.f32.s32 %v6028_v34  ;;  %v2477_v21 = vadd.s32 136, %v6198_v14 }
 0x2e9   : > { %v2064_v24 = vsel %vm2063_vm12, %v6170_v15, inf  ;;  %v2050_v39 = vsel %vm2049_vm13, %v6098_v36, inf  ;;  %7820 = vst [vmem:[#allocation118_spill] sm:$0xff] %v6395_v50  ;;  %v6409_v49 = vsel %vm2600_vm10, 1.0, %v7814_v56  ;;  %v2540_v34 = vadd.s32 %v6233_v62, %v2474_v4  ;;  %v7825_v50 = vld [vmem:[#allocation71_spill] sm:$0xff] }
 0x2ea   : > { %2065 = vmin.xlane.f32.xlu1 %v2064_v24  ;;  %2051 = vmin.xlane.f32.xlu0 %v2050_v39  ;;  %v7824_v24 = vld [vmem:[#allocation136_spill] sm:$0xff]  ;;  %vm2603_vm1 = vcmp.lt.s32.totalorder %v2539_v53, 800  ;;  %v2541_v39 = vadd.s32 %v6233_v62, %v2475_v22  ;;  %v1662_v13 = vcvt.f32.s32 %v7825_v50  ;;  %v2542_v31 = vadd.s32 %v6233_v62, %v2476_v60  ;;  %v7829_v60 = vld [vmem:[#allocation70_spill] sm:$0xff] }
 0x2eb   : > { %v6403_v15 = vpop.xlane.xlu1 %2089  ;;  %v6405_v36 = vpop.xlane.xlu0 %2075  ;;  %v6425_v55 = vshll.u32 %v1676_v61, 16  ;;  %v6428_v4 = vsel %vm2602_vm14, 1.0, %v7814_v56  ;;  %v2479_v53 = vadd.s32 152, %v6198_v14  ;;  %vm2604_vm2 = vcmp.lt.s32.totalorder %v2540_v34, 800 }
 0x2ec   : > { %7821 = vst [vmem:[#allocation120_spill] sm:$0xff] %v6403_v15  ;;  %7822 = vst [vmem:[#allocation74_spill] sm:$0xff] %v6405_v36  ;;  %vm2091_vm15 = vcmp.eq.f32.partialorder %v7823_v28, %v6403_v15  ;;  %vm2077_vm0 = vcmp.eq.f32.partialorder %v7824_v24, %v6405_v36  ;;  %v2543_v28 = vadd.s32 %v6233_v62, %v2477_v21  ;;  %v1704_v61 = vcvt.f32.s32 %v7829_v60  ;;  %v7830_v24 = vld [vmem:[#allocation92_spill] sm:$0xff]  ;;  %v7831_v21 = vld [vmem:[#allocation137_spill] sm:$0xff] }
 0x2ed   : > { %v2092_v43 = vsel %vm2091_vm15, %v6179_v12, inf  ;;  %v2078_v23 = vsel %vm2077_vm0, %v6104_v9, inf  ;;  %7826 = vst [vmem:[#allocation117_spill] sm:$0xff] %v6425_v55  ;;  %v6437_v12 = vsel %vm2603_vm1, 1.0, %v7814_v56  ;;  %v2478_v9 = vadd.s32 144, %v6198_v14 }
 0x2ee   : > { %2093 = vmin.xlane.f32.xlu1 %v2092_v43  ;;  %2079 = vmin.xlane.f32.xlu0 %v2078_v23  ;;  %v2481_v43 = vadd.s32 168, %v6198_v14  ;;  %vm2605_vm5 = vcmp.lt.s32.totalorder %v2541_v39, 800  ;;  %v6446_v23 = vshll.u32 %v1662_v13, 16  ;;  %vm2606_vm6 = vcmp.lt.s32.totalorder %v2542_v31, 800 }
 0x2ef   : > { %v6432_v22 = vpop.xlane.xlu1 %2117  ;;  %v6434_v50 = vpop.xlane.xlu0 %2103  ;;  %v6451_v34 = vsel %vm2604_vm2, 1.0, %v7814_v56  ;;  %vm2607_vm7 = vcmp.lt.s32.totalorder %v2543_v28, 800  ;;  %v2545_v60 = vadd.s32 %v6233_v62, %v2479_v53  ;;  %v7840_v53 = vld [vmem:[#allocation139_spill] sm:$0xff]  ;;  %v2483_v31 = vadd.s32 184, %v6198_v14 }
 0x2f0   : > { %7827 = vst [vmem:[#allocation123_spill] sm:$0xff] %v6432_v22  ;;  %7828 = vst [vmem:[#allocation125_spill] sm:$0xff] %v6434_v50  ;;  %vm2119_vm3 = vcmp.eq.f32.partialorder %v7830_v24, %v6432_v22  ;;  %vm2105_vm4 = vcmp.eq.f32.partialorder %v7831_v21, %v6434_v50  ;;  %v2480_v24 = vadd.s32 160, %v6198_v14  ;;  %v7834_v22 = vld [vmem:[#allocation94_spill] sm:$0xff]  ;;  %v2482_v28 = vadd.s32 176, %v6198_v14 }
 0x2f1   : > { %7832 = vst [vmem:[#allocation75_spill] sm:$0xff] %v6446_v23  ;;  %v2120_v36 = vsel %vm2119_vm3, %v6181_v46, inf  ;;  %v2106_v15 = vsel %vm2105_vm4, %v6106_v57, inf  ;;  %7833 = vst [vmem:[#allocation91_spill] sm:$0xff] %v6451_v34  ;;  %v1690_v21 = vcvt.f32.s32 %v7834_v22  ;;  %v6461_v46 = vsel %vm2605_vm5, 1.0, %v7814_v56  ;;  %v7839_v50 = vld [vmem:[#allocation138_spill] sm:$0xff] }
 0x2f2   : > { %2121 = vmin.xlane.f32.xlu1 %v2120_v36  ;;  %2107 = vmin.xlane.f32.xlu0 %v2106_v15  ;;  %7837 = vst [vmem:[#allocation133_spill] sm:$0xff] %v6461_v46  ;;  %v2544_v57 = vadd.s32 %v6233_v62, %v2478_v9  ;;  %v2547_v15 = vadd.s32 %v6233_v62, %v2481_v43  ;;  %v6465_v36 = vshll.u32 %v1704_v61, 16  ;;  %v6473_v22 = vsel %vm2606_vm6, 1.0, %v7814_v56  ;;  %v7842_v23 = vld [vmem:[#allocation95_spill] sm:$0xff]  ;;  %v7845_v61 = vld [vmem:[#allocation96_spill] sm:$0xff] }
 0x2f3   : > { %v6456_v39 = vpop.xlane.xlu1 %2145  ;;  %v6458_v13 = vpop.xlane.xlu0 %2131  ;;  %7841 = vst [vmem:[#allocation119_spill] sm:$0xff] %v6473_v22  ;;  %v1732_v55 = vcvt.f32.s32 %v7842_v23  ;;  %v7843_v34 = vld [vmem:[#allocation99_spill] sm:$0xff]  ;;  %v6480_v43 = vsel %vm2607_vm7, 1.0, %v7814_v56  ;;  %vm2609_vm10 = vcmp.lt.s32.totalorder %v2545_v60, 800 }
 0x2f4   : > { %7835 = vst [vmem:[#allocation128_spill] sm:$0xff] %v6456_v39  ;;  %7836 = vst [vmem:[#allocation130_spill] sm:$0xff] %v6458_v13  ;;  %vm2147_vm8 = vcmp.eq.f32.partialorder %v7839_v50, %v6456_v39  ;;  %vm2133_vm9 = vcmp.eq.f32.partialorder %v7840_v53, %v6458_v13  ;;  %v2546_v50 = vadd.s32 %v6233_v62, %v2480_v24  ;;  %v6485_v53 = vshll.u32 %v1690_v21, 16  ;;  %v7850_v24 = vld [vmem:[#allocation141_spill] sm:$0xff]  ;;  %v7851_v39 = vld [vmem:[#allocation102_spill] sm:$0xff] }
 0x2f5   : > { %7838 = vst [vmem:[#allocation76_spill] sm:$0xff] %v6465_v36  ;;  %v2148_v46 = vsel %vm2147_vm8, %v6193_v10, inf  ;;  %v2134_v9 = vsel %vm2133_vm9, %v7843_v34, inf  ;;  %7844 = vst [vmem:[#allocation135_spill] sm:$0xff] %v6480_v43  ;;  %v1718_v36 = vcvt.f32.s32 %v7845_v61  ;;  %vm2608_vm11 = vcmp.lt.s32.totalorder %v2544_v57, 800  ;;  %v7847_v34 = vld [vmem:[#allocation97_spill] sm:$0xff] }
 0x2f6   : > { %2149 = vmin.xlane.f32.xlu1 %v2148_v46  ;;  %2135 = vmin.xlane.f32.xlu0 %v2134_v9  ;;  %7846 = vst [vmem:[#allocation142_spill] sm:$0xff] %v6485_v53  ;;  %vm2611_vm12 = vcmp.lt.s32.totalorder %v2547_v15, 800  ;;  %v1760_v13 = vcvt.f32.s32 %v7847_v34  ;;  %v7848_v61 = vld [vmem:[#allocation98_spill] sm:$0xff]  ;;  %v7849_v9 = vld [vmem:[#allocation140_spill] sm:$0xff]  ;;  %v6498_v21 = vshll.u32 %v1732_v55, 16  ;;  %v6504_v57 = vsel %vm2609_vm10, 1.0, %v7814_v56 }
 0x2f7   : > { %v6487_v23 = vpop.xlane.xlu1 %2173  ;;  %v6489_v10 = vpop.xlane.xlu0 %2159  ;;  %v1746_v46 = vcvt.f32.s32 %v7848_v61  ;;  %v6506_v22 = vshll.u32 %v1718_v36, 16  ;;  %v6509_v34 = vsel %vm2608_vm11, 1.0, %v7814_v56  ;;  %vm2610_vm15 = vcmp.lt.s32.totalorder %v2546_v50, 800  ;;  %v7853_v55 = vld [vmem:[#allocation100_spill] sm:$0xff]  ;;  %v7856_v50 = vld [vmem:[#allocation143_spill] sm:$0xff] }
 0x2f8   : > { %vm2175_vm13 = vcmp.eq.f32.partialorder %v7849_v9, %v6487_v23  ;;  %vm2161_vm14 = vcmp.eq.f32.partialorder %v7850_v24, %v6489_v10  ;;  %v2549_v61 = vadd.s32 %v6233_v62, %v2483_v31  ;;  %v1788_v9 = vcvt.f32.s32 %v7853_v55  ;;  %v7857_v31 = vld [vmem:[#allocation144_spill] sm:$0xff] }
 0x2f9   : > { %v2176_v53 = vsel %vm2175_vm13, %v6195_v40, inf  ;;  %v2162_v43 = vsel %vm2161_vm14, %v7851_v39, inf  ;;  %7852 = vst [vmem:[#allocation78_spill] sm:$0xff] %v6506_v22  ;;  %v6519_v60 = vsel %vm2611_vm12, 1.0, %v7814_v56  ;;  %v2548_v39 = vadd.s32 %v6233_v62, %v2482_v28 }
 0x2fa   : > { %2177 = vmin.xlane.f32.xlu1 %v2176_v53  ;;  %2163 = vmin.xlane.f32.xlu0 %v2162_v43  ;;  %v2485_v36 = vadd.s32 200, %v6198_v14  ;;  %v6523_v43 = vshll.u32 %v1760_v13, 16  ;;  %v6525_v53 = vshll.u32 %v1746_v46, 16  ;;  %v1774_v55 = vcvt.f32.s32 %v6117_v29 }
 0x2fb   : > { %v6513_v24 = vpop.xlane.xlu1 %2201  ;;  %v6515_v40 = vpop.xlane.xlu0 %2187  ;;  %v6535_v28 = vsel %vm2610_vm15, 1.0, %v7814_v56  ;;  %v1816_v13 = vcvt.f32.s32 %v6136_v45  ;;  %v1802_v46 = vcvt.f32.s32 %v6138_v33  ;;  %vm2613_vm2 = vcmp.lt.s32.totalorder %v2549_v61, 800  ;;  %v7860_v45 = vld [vmem:[#allocation146_spill] sm:$0xff]  ;;  %v7861_v33 = vld [vmem:[#allocation147_spill] sm:$0xff] }
 0x2fc   : > { %7854 = vst [vmem:[#allocation121_spill] sm:$0xff] %v6523_v43  ;;  %7855 = vst [vmem:[#allocation145_spill] sm:$0xff] %v6525_v53  ;;  %vm2203_vm0 = vcmp.eq.f32.partialorder %v7856_v50, %v6513_v24  ;;  %vm2189_vm1 = vcmp.eq.f32.partialorder %v7857_v31, %v6515_v40  ;;  %v2484_v50 = vadd.s32 192, %v6198_v14  ;;  %v6540_v53 = vshll.u32 %v1788_v9, 16 }
 0x2fd   : > { %v2204_v15 = vsel %vm2203_vm0, %v6206_v18, inf  ;;  %v2190_v22 = vsel %vm2189_vm1, %v6127_v58, inf  ;;  %v1844_v29 = vcvt.f32.s32 %v6166_v37  ;;  %vm2612_vm3 = vcmp.lt.s32.totalorder %v2548_v39, 800 }
 0x2fe   : > { %2205 = vmin.xlane.f32.xlu1 %v2204_v15  ;;  %2191 = vmin.xlane.f32.xlu0 %v2190_v22  ;;  %7858 = vst [vmem:[#allocation79_spill] sm:$0xff] %v6540_v53  ;;  %v2551_v58 = vadd.s32 %v6233_v62, %v2485_v36  ;;  %v2486_v22 = vadd.s32 208, %v6198_v14  ;;  %v2487_v61 = vadd.s32 216, %v6198_v14  ;;  %v6554_v9 = vshll.u32 %v1774_v55, 16 }
 0x2ff   : > { %v6543_v31 = vpop.xlane.xlu1 %2229  ;;  %v6545_v18 = vpop.xlane.xlu0 %2215  ;;  %v6559_v53 = vsel %vm2613_vm2, 1.0, %v7814_v56  ;;  %v6561_v36 = vshll.u32 %v1816_v13, 16  ;;  %v6563_v43 = vshll.u32 %v1802_v46, 16  ;;  %v1872_v55 = vcvt.f32.s32 %v6189_v32  ;;  %v7866_v46 = vld [vmem:[#allocation148_spill] sm:$0xff] }
 0x300   : > { %7859 = vst [vmem:[#allocation122_spill] sm:$0xff] %v6545_v18  ;;  %vm2231_vm4 = vcmp.eq.f32.partialorder %v7860_v45, %v6543_v31  ;;  %vm2217_vm5 = vcmp.eq.f32.partialorder %v7861_v33, %v6545_v18  ;;  %v1830_v45 = vcvt.f32.s32 %v6168_v6  ;;  %v2550_v33 = vadd.s32 %v6233_v62, %v2484_v50  ;;  %v7867_v6 = vld [vmem:[#allocation149_spill] sm:$0xff] }
 0x301   : > { %v2232_v37 = vsel %vm2231_vm4, %v6215_v8, inf  ;;  %v2218_v15 = vsel %vm2217_vm5, %v6132_v44, inf  ;;  %7862 = vst [vmem:[#allocation81_spill] sm:$0xff] %v6561_v36  ;;  %7863 = vst [vmem:[#allocation124_spill] sm:$0xff] %v6563_v43  ;;  %v6567_v18 = vshll.u32 %v1844_v29, 16  ;;  %v6576_v13 = vsel %vm2612_vm3, 1.0, %v7814_v56 }
 0x302   : > { %2233 = vmin.xlane.f32.xlu1 %v2232_v37  ;;  %2219 = vmin.xlane.f32.xlu0 %v2218_v15  ;;  %vm2615_vm6 = vcmp.lt.s32.totalorder %v2551_v58, 800  ;;  %v2552_v50 = vadd.s32 %v6233_v62, %v2486_v22  ;;  %v2553_v29 = vadd.s32 %v6233_v62, %v2487_v61  ;;  %v1858_v32 = vcvt.f32.s32 %v6191_v7  ;;  %v7868_v15 = vld [vmem:[#allocation101_spill] sm:$0xff] }
 0x303   : > { %7864 = vst [vmem:[#allocation82_spill] sm:$0xff] %v6567_v18  ;;  %v6570_v8 = vpop.xlane.xlu1 %2257  ;;  %v6572_v44 = vpop.xlane.xlu0 %2243  ;;  %v2488_v39 = vadd.s32 224, %v6198_v14  ;;  %v6588_v43 = vshll.u32 %v1830_v45, 16  ;;  %v1900_v36 = vcvt.f32.s32 %v6223_v2  ;;  %vm2614_vm9 = vcmp.lt.s32.totalorder %v2550_v33, 800 }
 0x304   : > { %7865 = vst [vmem:[#allocation126_spill] sm:$0xff] %v6572_v44  ;;  %vm2259_vm7 = vcmp.eq.f32.partialorder %v7866_v46, %v6570_v8  ;;  %vm2245_vm8 = vcmp.eq.f32.partialorder %v7867_v6, %v6572_v44  ;;  %v1886_v46 = vcvt.f32.s32 %v6225_v59  ;;  %v6592_v22 = vshll.u32 %v1872_v55, 16 }
 0x305   : > { %v2260_v37 = vsel %vm2259_vm7, %v6217_v52, inf  ;;  %v2246_v18 = vsel %vm2245_vm8, %v7868_v15, inf  ;;  %v1928_v61 = vcvt.f32.s32 %v6250_v47  ;;  %v6597_v52 = vsel %vm2615_vm6, 1.0, %v7814_v56 }
 0x306   : > { %2261 = vmin.xlane.f32.xlu1 %v2260_v37  ;;  %2247 = vmin.xlane.f32.xlu0 %v2246_v18  ;;  %v2489_v45 = vadd.s32 232, %v6198_v14  ;;  %vm2616_vm10 = vcmp.lt.s32.totalorder %v2552_v50, 800  ;;  %vm2617_vm11 = vcmp.lt.s32.totalorder %v2553_v29, 800  ;;  %v6600_v2 = vshll.u32 %v1858_v32, 16  ;;  %v7871_v37 = vld [vmem:[#allocation103_spill] sm:$0xff] }
 0x307   : > { %v1394_v7 = vpop.xlane.xlu1 %1393  ;;  %v1380_v6 = vpop.xlane.xlu0 %1379  ;;  %v1914_v59 = vcvt.f32.s32 %v6252_v0  ;;  %v6604_v18 = vsel %vm2614_vm9, 1.0, %v7814_v56  ;;  %v2554_v47 = vadd.s32 %v6233_v62, %v2488_v39  ;;  %v6607_v33 = vshll.u32 %v1900_v36, 16  ;;  %v7873_v36 = vld [vmem:[#allocation93_spill] sm:$0xff] }
 0x308   : > { %v1395_v15 = vcvt.f32.s32 %v1394_v7  ;;  %v1381_v44 = vcvt.f32.s32 %v1380_v6  ;;  %v6609_v58 = vshll.u32 %v1886_v46, 16  ;;  %v6613_v6 = vshll.u32 %v1928_v61, 16 }
 0x309   : > { %7869 = vst [vmem:[#allocation83_spill] sm:$0xff] %v6607_v33  ;;  %v6616_v32 = vsel %vm2616_vm10, 1.0, %v7814_v56  ;;  %v6619_v0 = vsel %vm2617_vm11, 1.0, %v7814_v56  ;;  %v2555_v39 = vadd.s32 %v6233_v62, %v2489_v45  ;;  %vm2618_vm14 = vcmp.lt.s32.totalorder %v2554_v47, 800 }
 0x30a   : > { %7870 = vst [vmem:[#allocation127_spill] sm:$0xff] %v6609_v58  ;;  %v1398_v55 = vadd.s32 %v6219_v41, %v1395_v15  ;;  %v1384_v7 = vadd.s32 %v7871_v37, %v1381_v44  ;;  %7872 = vst [vmem:[#allocation85_spill] sm:$0xff] %v6613_v6  ;;  %v6624_v41 = vshll.u32 %v1914_v59, 16 }
 0x30b   : > { %v1422_v50 = vpop.xlane.xlu1 %1421  ;;  %v1408_v29 = vpop.xlane.xlu0 %1407  ;;  %vm2619_vm15 = vcmp.lt.s32.totalorder %v2555_v39, 800  ;;  %v7877_v39 = vld [vmem:[#allocation105_spill] sm:$0xff] }
 0x30c   : > { %vm2268_vm12 = vcmp.eq.s32.totalorder %v7873_v36, %v1398_v55  ;;  %v1423_v46 = vcvt.f32.s32 %v1422_v50  ;;  %v1409_v58 = vcvt.f32.s32 %v1408_v29  ;;  %vm2267_vm13 = vcmp.eq.s32.totalorder %v7873_v36, %v1384_v7  ;;  %7874 = vst [vmem:[#allocation129_spill] sm:$0xff] %v6624_v41 }
 0x30d   : > { %v3700_v44 = vsel %vm2268_vm12, 1.0, %v7814_v56  ;;  %v3699_v61 = vsel %vm2267_vm13, 1.0, %v7814_v56  ;;  %v1956_v55 = vcvt.f32.s32 %v6275_v19  ;;  %v1942_v50 = vcvt.f32.s32 %v6277_v48 }
 0x30e   : > { %v1426_v15 = vadd.s32 %v6235_v35, %v1423_v46  ;;  %v1412_v37 = vadd.s32 %v6183_v20, %v1409_v58  ;;  %v2782_v6 = vmul.f32 %v6291_v17, %v3699_v61  ;;  %v2783_v45 = vmul.f32 %v6306_v30, %v3700_v44  ;;  %v7875_v58 = vld [vmem:[#allocation77_spill] sm:$0xff] }
 0x30f   : > { %v1450_v7 = vpop.xlane.xlu1 %1449  ;;  %v1436_v59 = vpop.xlane.xlu0 %1435  ;;  %v2490_v29 = vadd.s32 240, %v6198_v14  ;;  %v6641_v19 = vsel %vm2618_vm14, 1.0, %v7814_v56  ;;  %v2491_v48 = vadd.s32 248, %v6198_v14  ;;  %v6654_v47 = vsel %vm2619_vm15, 1.0, %v7814_v56 }
 0x310   : > { %vm2270_vm0 = vcmp.eq.s32.totalorder %v7873_v36, %v1426_v15  ;;  %vm2269_vm1 = vcmp.eq.s32.totalorder %v7873_v36, %v1412_v37  ;;  %v1451_v35 = vcvt.f32.s32 %v1450_v7  ;;  %v1437_v46 = vcvt.f32.s32 %v1436_v59  ;;  %4153 = vmatprep.mubr.f32.mxu1 %v2782_v6 }
 0x311   : > { %4154 = vmatmul.mubr.f32.vlgmr.msra.gmra.mrb[0].mxu1 %v2783_v45  ;;  %v3701_v20 = vsel %vm2269_vm1, 1.0, %v7814_v56  ;;  %v3702_v17 = vsel %vm2270_vm0, 1.0, %v7814_v56  ;;  %v6648_v37 = vshll.u32 %v1956_v55, 16  ;;  %v6650_v7 = vshll.u32 %v1942_v50, 16 }
 0x312   : > { %v1454_v30 = vadd.s32 %v6241_v42, %v1451_v35  ;;  %v1440_v44 = vadd.s32 %v7875_v58, %v1437_v46  ;;  %v2784_v61 = vmul.f32 %v6316_v25, %v3701_v20  ;;  %v2785_v15 = vmul.f32 %v6329_v38, %v3702_v17 }
 0x313   : > { %v3312_v59 = vadd.f32 %v2783_v45, %v2782_v6  ;;  %v1478_v41 = vpop.xlane.xlu1 %1477  ;;  %v1464_v33 = vpop.xlane.xlu0 %1463  ;;  %v2556_v6 = vadd.s32 %v6233_v62, %v2490_v29  ;;  %v7876_v45 = vld [vmem:[#allocation106_spill] sm:$0xff]  ;;  %v2557_v58 = vadd.s32 %v6233_v62, %v2491_v48  ;;  %v7878_v48 = vld [vmem:[#allocation108_spill] sm:$0xff] }
 0x314   : > { %vm2272_vm2 = vcmp.eq.s32.totalorder %v7873_v36, %v1454_v30  ;;  %vm2271_vm3 = vcmp.eq.s32.totalorder %v7873_v36, %v1440_v44  ;;  %v1479_v42 = vcvt.f32.s32 %v1478_v41  ;;  %v1465_v35 = vcvt.f32.s32 %v1464_v33  ;;  %4156 = vmatprep.mubr.f32.mxu1 %v2784_v61 }
 0x315   : > { %v3313_v25 = vadd.f32 %v3312_v59, %v2784_v61  ;;  %4157 = vmatmul.mubr.f32.gmra.mrb[2].mxu1 %v2785_v15  ;;  %v3703_v38 = vsel %vm2271_vm3, 1.0, %v7814_v56  ;;  %v3704_v55 = vsel %vm2272_vm2, 1.0, %v7814_v56  ;;  %v2492_v44 = vadd.s32 256, %v6198_v14 }
 0x316   : > { %v1482_v50 = vadd.s32 %v7876_v45, %v1479_v42  ;;  %v1468_v46 = vadd.s32 %v7877_v39, %v1465_v35  ;;  %v2786_v20 = vmul.f32 %v6342_v11, %v3703_v38  ;;  %v2787_v17 = vmul.f32 %v6352_v1, %v3704_v55 }
 0x317   : > { %v3314_v30 = vadd.f32 %v3313_v25, %v2785_v15  ;;  %v1506_v41 = vpop.xlane.xlu1 %1505  ;;  %v1492_v33 = vpop.xlane.xlu0 %1491  ;;  %v2493_v61 = vadd.s32 264, %v6198_v14  ;;  %v1984_v11 = vcvt.f32.s32 %v6300_v51  ;;  %v7879_v25 = vld [vmem:[#allocation104_spill] sm:$0xff]  ;;  %vm2620_vm6 = vcmp.lt.s32.totalorder %v2556_v6, 800 }
 0x318   : > { %vm2274_vm4 = vcmp.eq.s32.totalorder %v7873_v36, %v1482_v50  ;;  %vm2273_vm5 = vcmp.eq.s32.totalorder %v7873_v36, %v1468_v46  ;;  %v1507_v29 = vcvt.f32.s32 %v1506_v41  ;;  %v1493_v59 = vcvt.f32.s32 %v1492_v33  ;;  %4159 = vmatprep.mubr.f32.mxu1 %v2786_v20 }
 0x319   : > { %v3315_v42 = vadd.f32 %v3314_v30, %v2786_v20  ;;  %4160 = vmatmul.mubr.f32.gmra.mrb[4].mxu1 %v2787_v17  ;;  %v3705_v1 = vsel %vm2273_vm5, 1.0, %v7814_v56  ;;  %v3706_v15 = vsel %vm2274_vm4, 1.0, %v7814_v56  ;;  %v1970_v50 = vcvt.f32.s32 %v6302_v26 }
 0x31a   : > { %v1510_v35 = vadd.s32 %v7878_v48, %v1507_v29  ;;  %v1496_v38 = vadd.s32 %v7879_v25, %v1493_v59  ;;  %v2788_v55 = vmul.f32 %v6368_v16, %v3705_v1  ;;  %v2789_v45 = vmul.f32 %v6372_v63, %v3706_v15  ;;  %v7880_v63 = vld [vmem:[#allocation107_spill] sm:$0xff]  ;;  %v7881_v29 = vld [vmem:[#allocation80_spill] sm:$0xff] }
 0x31b   : > { %v3316_v39 = vadd.f32 %v3315_v42, %v2787_v17  ;;  %v1534_v46 = vpop.xlane.xlu1 %1533  ;;  %v1520_v41 = vpop.xlane.xlu0 %1519  ;;  %vm2621_vm7 = vcmp.lt.s32.totalorder %v2557_v58, 800  ;;  %v6680_v30 = vshll.u32 %v1984_v11, 16  ;;  %v6688_v15 = vshll.u32 %v1970_v50, 16 }
 0x31c   : > { %vm2276_vm8 = vcmp.eq.s32.totalorder %v7873_v36, %v1510_v35  ;;  %vm2275_vm9 = vcmp.eq.s32.totalorder %v7873_v36, %v1496_v38  ;;  %v1535_v51 = vcvt.f32.s32 %v1534_v46  ;;  %v1521_v20 = vcvt.f32.s32 %v1520_v41  ;;  %4162 = vmatprep.mubr.f32.mxu1 %v2788_v55  ;;  %v7883_v46 = vld [vmem:[#allocation110_spill] sm:$0xff] }
 0x31d   : > { %v3317_v33 = vadd.f32 %v3316_v39, %v2788_v55  ;;  %4163 = vmatmul.mubr.f32.gmra.mrb[6].mxu1 %v2789_v45  ;;  %v3707_v16 = vsel %vm2275_vm9, 1.0, %v7814_v56  ;;  %v3708_v26 = vsel %vm2276_vm8, 1.0, %v7814_v56  ;;  %v6692_v25 = vsel %vm2620_vm6, 1.0, %v7814_v56  ;;  %v7882_v39 = vld [vmem:[#allocation109_spill] sm:$0xff] }
 0x31e   : > { %v1538_v17 = vadd.s32 %v7880_v63, %v1535_v51  ;;  %v1524_v59 = vadd.s32 %v7881_v29, %v1521_v20  ;;  %v2790_v42 = vmul.f32 %v6392_v54, %v3707_v16  ;;  %v2791_v1 = vmul.f32 %v6400_v27, %v3708_v26 }
 0x31f   : > { %v3318_v48 = vadd.f32 %v3317_v33, %v2789_v45  ;;  %v1562_v35 = vpop.xlane.xlu1 %1561  ;;  %v1548_v11 = vpop.xlane.xlu0 %1547  ;;  %v6696_v38 = vsel %vm2621_vm7, 1.0, %v7814_v56  ;;  %v6703_v6 = vadd.s32 %v6233_v62, %v2492_v44  ;;  %v6710_v63 = vadd.s32 %v6233_v62, %v2493_v61 }
 0x320   : > { %vm2278_vm10 = vcmp.eq.s32.totalorder %v7873_v36, %v1538_v17  ;;  %vm2277_vm11 = vcmp.eq.s32.totalorder %v7873_v36, %v1524_v59  ;;  %v1563_v54 = vcvt.f32.s32 %v1562_v35  ;;  %v1549_v55 = vcvt.f32.s32 %v1548_v11  ;;  %4165 = vmatprep.mubr.f32.mxu1 %v2790_v42  ;;  %v7886_v11 = vld [vmem:[#allocation84_spill] sm:$0xff] }
 0x321   : > { %v3319_v27 = vadd.f32 %v3318_v48, %v2790_v42  ;;  %4166 = vmatmul.mubr.f32.gmra.mrb[8].mxu1 %v2791_v1  ;;  %v3709_v45 = vsel %vm2277_vm11, 1.0, %v7814_v56  ;;  %v3710_v50 = vsel %vm2278_vm10, 1.0, %v7814_v56  ;;  %v2494_v17 = vadd.s32 272, %v6198_v14  ;;  %v7885_v48 = vld [vmem:[#allocation111_spill] sm:$0xff] }
 0x322   : > { %v1566_v58 = vadd.s32 %v7882_v39, %v1563_v54  ;;  %v1552_v41 = vadd.s32 %v7883_v46, %v1549_v55  ;;  %v2792_v51 = vmul.f32 %v6409_v49, %v3709_v45  ;;  %v2793_v20 = vmul.f32 %v6413_v3, %v3710_v50  ;;  %v7884_v49 = vld [vmem:[#allocation87_spill] sm:$0xff] }
 0x323   : > { %v3320_v33 = vadd.f32 %v3319_v27, %v2791_v1  ;;  %v1590_v16 = vpop.xlane.xlu1 %1589  ;;  %v1576_v26 = vpop.xlane.xlu0 %1575  ;;  %v2495_v29 = vadd.s32 280, %v6198_v14  ;;  %v2012_v42 = vcvt.f32.s32 %v7884_v49  ;;  %v7887_v45 = vld [vmem:[#allocation115_spill] sm:$0xff]  ;;  %vm2622_vm14 = vcmp.lt.s32.totalorder %v6703_v6, 800 }
 0x324   : > { %vm2280_vm12 = vcmp.eq.s32.totalorder %v7873_v36, %v1566_v58  ;;  %vm2279_vm13 = vcmp.eq.s32.totalorder %v7873_v36, %v1552_v41  ;;  %v1591_v44 = vcvt.f32.s32 %v1590_v16  ;;  %v1577_v59 = vcvt.f32.s32 %v1576_v26  ;;  %4168 = vmatprep.mubr.f32.mxu1 %v2792_v51  ;;  %v7889_v16 = vld [vmem:[#allocation113_spill] sm:$0xff] }
 0x325   : > { %v3321_v3 = vadd.f32 %v3320_v33, %v2792_v51  ;;  %4169 = vmatmul.mubr.f32.gmra.mrb[10].mxu1 %v2793_v20  ;;  %v3711_v1 = vsel %vm2279_vm13, 1.0, %v7814_v56  ;;  %v3712_v61 = vsel %vm2280_vm12, 1.0, %v7814_v56  ;;  %v1998_v50 = vcvt.f32.s32 %v7887_v45  ;;  %v7893_v45 = vld [vmem:[#allocation114_spill] sm:$0xff] }
 0x326   : > { %v1594_v35 = vadd.s32 %v7885_v48, %v1591_v44  ;;  %v1580_v54 = vadd.s32 %v7886_v11, %v1577_v59  ;;  %v2794_v55 = vmul.f32 %v6428_v4, %v3711_v1  ;;  %v2795_v27 = vmul.f32 %v6437_v12, %v3712_v61  ;;  %v7890_v59 = vld [vmem:[#allocation91_spill] sm:$0xff] }
 0x327   : > { %v3322_v39 = vadd.f32 %v3321_v3, %v2793_v20  ;;  %v1618_v58 = vpop.xlane.xlu1 %1617  ;;  %v1604_v46 = vpop.xlane.xlu0 %1603  ;;  %vm2623_vm15 = vcmp.lt.s32.totalorder %v6710_v63, 800  ;;  %v6728_v33 = vshll.u32 %v2012_v42, 16  ;;  %v7891_v3 = vld [vmem:[#allocation133_spill] sm:$0xff]  ;;  %v2560_v48 = vadd.s32 %v6233_v62, %v2494_v17 }
 0x328   : > { %vm2282_vm0 = vcmp.eq.s32.totalorder %v7873_v36, %v1594_v35  ;;  %vm2281_vm1 = vcmp.eq.s32.totalorder %v7873_v36, %v1580_v54  ;;  %v1619_v41 = vcvt.f32.s32 %v1618_v58  ;;  %v1605_v51 = vcvt.f32.s32 %v1604_v46  ;;  %4171 = vmatprep.mubr.f32.mxu1 %v2794_v55  ;;  %v7892_v54 = vld [vmem:[#allocation112_spill] sm:$0xff] }
 0x329   : > { %7888 = vst [vmem:[#allocation86_spill] sm:$0xff] %v6728_v33  ;;  %v3323_v4 = vadd.f32 %v3322_v39, %v2794_v55  ;;  %4172 = vmatmul.mubr.f32.gmra.mrb[12].mxu1 %v2795_v27  ;;  %v3713_v12 = vsel %vm2281_vm1, 1.0, %v7814_v56  ;;  %v3714_v20 = vsel %vm2282_vm0, 1.0, %v7814_v56  ;;  %v2561_v42 = vadd.s32 %v6233_v62, %v2495_v29 }
 0x32a   : > { %v1622_v26 = vadd.s32 %v7889_v16, %v1619_v41  ;;  %v1608_v44 = vadd.s32 %v6357_v5, %v1605_v51  ;;  %v2796_v49 = vmul.f32 %v7890_v59, %v3713_v12  ;;  %v2797_v1 = vmul.f32 %v7891_v3, %v3714_v20  ;;  %v7895_v41 = vld [vmem:[#allocation72_spill] sm:$0xff]  ;;  %v7896_v12 = vld [vmem:[#allocation119_spill] sm:$0xff] }
 0x32b   : > { %v1646_v61 = vpop.xlane.xlu1 %1645  ;;  %v2496_v35 = vadd.s32 288, %v6198_v14  ;;  %v2497_v11 = vadd.s32 296, %v6198_v14  ;;  %v2040_v55 = vcvt.f32.s32 %v7892_v54  ;;  %v2026_v39 = vcvt.f32.s32 %v7893_v45  ;;  %v7897_v16 = vld [vmem:[#allocation135_spill] sm:$0xff] }
 0x32c   : > { %vm2284_vm2 = vcmp.eq.s32.totalorder %v7873_v36, %v1622_v26  ;;  %vm2283_vm3 = vcmp.eq.s32.totalorder %v7873_v36, %v1608_v44  ;;  %v1647_v5 = vcvt.f32.s32 %v1646_v61  ;;  %4174 = vmatprep.mubr.f32.mxu1 %v2796_v49  ;;  %v3324_v58 = vadd.f32 %v3323_v4, %v2795_v27 }
 0x32d   : > { %4175 = vmatmul.mubr.f32.gmra.mrb[14].mxu1 %v2797_v1  ;;  %v3715_v17 = vsel %vm2283_vm3, 1.0, %v7814_v56  ;;  %v3716_v29 = vsel %vm2284_vm2, 1.0, %v7814_v56  ;;  %v6746_v46 = vshll.u32 %v1998_v50, 16  ;;  %v6756_v59 = vsel %vm2622_vm14, 1.0, %v7814_v56 }
 0x32e   : > { %v1650_v51 = vadd.s32 %v7895_v41, %v1647_v5  ;;  %v2798_v20 = vmul.f32 %v7896_v12, %v3715_v17  ;;  %v6751_v26 = vmul.f32 %v7897_v16, %v3716_v29  ;;  %vm2624_vm4 = vcmp.lt.s32.totalorder %v2560_v48, 800  ;;  %v7901_v5 = vld [vmem:[#allocation118_spill] sm:$0xff]  ;;  %v7902_v17 = vld [vmem:[#allocation73_spill] sm:$0xff] }
 0x32f   : > { %7894 = vst [vmem:[#allocation131_spill] sm:$0xff] %v6746_v46  ;;  %v1632_v44 = vpop.xlane.xlu0 %1631  ;;  %v2562_v27 = vadd.s32 %v6233_v62, %v2496_v35  ;;  %v2563_v4 = vadd.s32 %v6233_v62, %v2497_v11  ;;  %v6763_v3 = vsel %vm2623_vm15, 1.0, %v7814_v56  ;;  %vm2625_vm5 = vcmp.lt.s32.totalorder %v2561_v42, 800  ;;  %v7900_v35 = vld [vmem:[#allocation116_spill] sm:$0xff] }
 0x330   : > { %v1633_v50 = vcvt.f32.s32 %v1632_v44  ;;  %4177 = vmatprep.mubr.f32.mxu1 %v2798_v20  ;;  %v2498_v61 = vadd.s32 304, %v6198_v14  ;;  %v6766_v54 = vshll.u32 %v2040_v55, 16  ;;  %v6768_v6 = vshll.u32 %v2026_v39, 16 }
 0x331   : > { %vm2286_vm6 = vcmp.eq.s32.totalorder %v7873_v36, %v1650_v51  ;;  %v3325_v48 = vadd.f32 %v3324_v58, %v2796_v49  ;;  %4178 = vmatmul.mubr.f32.gmra.mrb[16].mxu1 %v6751_v26  ;;  %v2068_v11 = vcvt.f32.s32 %v7900_v35  ;;  %v6775_v63 = vsel %vm2624_vm4, 1.0, %v7814_v56  ;;  %v7903_v35 = vld [vmem:[#allocation117_spill] sm:$0xff] }
 0x332   : > { %7898 = vst [vmem:[#allocation88_spill] sm:$0xff] %v6766_v54  ;;  %7899 = vst [vmem:[#allocation132_spill] sm:$0xff] %v6768_v6  ;;  %v1636_v45 = vadd.s32 %v7901_v5, %v1633_v50  ;;  %v2499_v42 = vadd.s32 312, %v6198_v14  ;;  %v2054_v29 = vcvt.f32.s32 %v7902_v17  ;;  %v6780_v39 = vsel %vm2625_vm5, 1.0, %v7814_v56  ;;  %v7905_v6 = vld [vmem:[#allocation120_spill] sm:$0xff] }
 0x333   : > { %v1674_v55 = vpop.xlane.xlu1 %1673  ;;  %vm2626_vm7 = vcmp.lt.s32.totalorder %v2562_v27, 800  ;;  %vm2627_vm8 = vcmp.lt.s32.totalorder %v2563_v4, 800  ;;  %v3718_v58 = vsel %vm2286_vm6, 1.0, %v7814_v56  ;;  %v2564_v41 = vadd.s32 %v6233_v62, %v2498_v61  ;;  %v7906_v61 = vld [vmem:[#allocation74_spill] sm:$0xff] }
 0x334   : > { %vm2285_vm9 = vcmp.eq.s32.totalorder %v7873_v36, %v1636_v45  ;;  %v1675_v49 = vcvt.f32.s32 %v1674_v55  ;;  %v3326_v51 = vadd.f32 %v3325_v48, %v2797_v1  ;;  %v2500_v16 = vadd.s32 320, %v6198_v14 }
 0x335   : > { %v3717_v12 = vsel %vm2285_vm9, 1.0, %v7814_v56  ;;  %v2501_v44 = vadd.s32 328, %v6198_v14  ;;  %v6788_v50 = vshll.u32 %v2068_v11, 16  ;;  %v2565_v45 = vadd.s32 %v6233_v62, %v2499_v42 }
 0x336   : > { %v1678_v5 = vadd.s32 %v7903_v35, %v1675_v49  ;;  %v2800_v17 = vmul.f32 %v6509_v34, %v3717_v12  ;;  %v6793_v55 = vshll.u32 %v2054_v29, 16  ;;  %v2096_v54 = vcvt.f32.s32 %v7905_v6 }
 0x337   : > { %v2082_v1 = vcvt.f32.s32 %v7906_v61  ;;  %v1660_v48 = vpop.xlane.xlu0 %1659  ;;  %v2801_v46 = vmul.f32 %v6504_v57, %v3718_v58  ;;  %v6800_v11 = vsel %vm2626_vm7, 1.0, %v7814_v56  ;;  %v6804_v34 = vsel %vm2627_vm8, 1.0, %v7814_v56  ;;  %v7907_v57 = vld [vmem:[#allocation75_spill] sm:$0xff] }
 0x338   : > { %7904 = vst [vmem:[#allocation89_spill] sm:$0xff] %v6793_v55  ;;  %v1661_v33 = vcvt.f32.s32 %v1660_v48  ;;  %4180 = vmatprep.mubr.f32.mxu1 %v2800_v17  ;;  %vm2628_vm10 = vcmp.lt.s32.totalorder %v2564_v41, 800  ;;  %v3327_v42 = vadd.f32 %v3326_v51, %v2798_v20  ;;  %vm2288_vm11 = vcmp.eq.s32.totalorder %v7873_v36, %v1678_v5  ;;  %v7910_v41 = vld [vmem:[#allocation123_spill] sm:$0xff]  ;;  %v7912_v48 = vld [vmem:[#allocation76_spill] sm:$0xff] }
 0x339   : > { %4181 = vmatmul.mubr.f32.gmra.mrb[18].mxu1 %v2801_v46  ;;  %v2566_v6 = vadd.s32 %v6233_v62, %v2500_v16  ;;  %v2567_v29 = vadd.s32 %v6233_v62, %v2501_v44  ;;  %vm2629_vm12 = vcmp.lt.s32.totalorder %v2565_v45, 800  ;;  %v2502_v27 = vadd.s32 336, %v6198_v14  ;;  %v7911_v16 = vld [vmem:[#allocation125_spill] sm:$0xff]  ;;  %v7916_v45 = vld [vmem:[#allocation130_spill] sm:$0xff] }
 0x33a   : > { %v1664_v49 = vadd.s32 %v7907_v57, %v1661_v33  ;;  %v2503_v58 = vadd.s32 344, %v6198_v14  ;;  %v6812_v12 = vshll.u32 %v2096_v54, 16  ;;  %v6814_v4 = vshll.u32 %v2082_v1, 16 }
 0x33b   : > { %v2124_v20 = vcvt.f32.s32 %v7910_v41  ;;  %v1702_v51 = vpop.xlane.xlu1 %1701  ;;  %v6818_v35 = vsel %vm2628_vm10, 1.0, %v7814_v56  ;;  %v2110_v61 = vcvt.f32.s32 %v7911_v16  ;;  %v3720_v44 = vsel %vm2288_vm11, 1.0, %v7814_v56 }
 0x33c   : > { %7908 = vst [vmem:[#allocation134_spill] sm:$0xff] %v6812_v12  ;;  %7909 = vst [vmem:[#allocation90_spill] sm:$0xff] %v6814_v4  ;;  %vm2287_vm13 = vcmp.eq.s32.totalorder %v7873_v36, %v1664_v49  ;;  %v1703_v33 = vcvt.f32.s32 %v1702_v51  ;;  %v3328_v54 = vadd.f32 %v3327_v42, %v6751_v26  ;;  %vm2630_vm14 = vcmp.lt.s32.totalorder %v2566_v6, 800 }
 0x33d   : > { %v3719_v1 = vsel %vm2287_vm13, 1.0, %v7814_v56  ;;  %vm2631_vm15 = vcmp.lt.s32.totalorder %v2567_v29, 800  ;;  %v2568_v4 = vadd.s32 %v6233_v62, %v2502_v27  ;;  %v2569_v16 = vadd.s32 %v6233_v62, %v2503_v58  ;;  %v7915_v27 = vld [vmem:[#allocation128_spill] sm:$0xff] }
 0x33e   : > { %v1706_v57 = vadd.s32 %v7912_v48, %v1703_v33  ;;  %v2802_v41 = vmul.f32 %v6535_v28, %v3719_v1  ;;  %v3329_v49 = vadd.f32 %v3328_v54, %v2800_v17  ;;  %v2803_v12 = vmul.f32 %v6519_v60, %v3720_v44 }
 0x33f   : > { %v1688_v51 = vpop.xlane.xlu0 %1687  ;;  %v6834_v5 = vsel %vm2629_vm12, 1.0, %v7814_v56  ;;  %v2504_v26 = vadd.s32 352, %v6198_v14  ;;  %v6837_v42 = vshll.u32 %v2124_v20, 16  ;;  %v6839_v55 = vshll.u32 %v2110_v61, 16  ;;  %v7917_v61 = vld [vmem:[#allocation142_spill] sm:$0xff] }
 0x340   : > { %v1689_v33 = vcvt.f32.s32 %v1688_v51  ;;  %4183 = vmatprep.mubr.f32.mxu1 %v2802_v41  ;;  %v2505_v28 = vadd.s32 360, %v6198_v14  ;;  %v2152_v58 = vcvt.f32.s32 %v7915_v27  ;;  %vm2290_vm0 = vcmp.eq.s32.totalorder %v7873_v36, %v1706_v57 }
 0x341   : > { %7913 = vst [vmem:[#allocation136_spill] sm:$0xff] %v6837_v42  ;;  %7914 = vst [vmem:[#allocation71_spill] sm:$0xff] %v6839_v55  ;;  %4184 = vmatmul.mubr.f32.gmra.mrb[20].mxu1 %v2803_v12  ;;  %v6846_v60 = vsel %vm2630_vm14, 1.0, %v7814_v56  ;;  %v6850_v17 = vsel %vm2631_vm15, 1.0, %v7814_v56  ;;  %v2138_v20 = vcvt.f32.s32 %v7916_v45  ;;  %vm2632_vm1 = vcmp.lt.s32.totalorder %v2568_v4, 800  ;;  %v7918_v4 = vld [vmem:[#allocation78_spill] sm:$0xff] }
 0x342   : > { %v1692_v44 = vadd.s32 %v7917_v61, %v1689_v33  ;;  %vm2633_vm2 = vcmp.lt.s32.totalorder %v2569_v16, 800  ;;  %v3330_v54 = vadd.f32 %v3329_v49, %v2801_v46  ;;  %v2570_v48 = vadd.s32 %v6233_v62, %v2504_v26 }
 0x343   : > { %v1730_v1 = vpop.xlane.xlu1 %1729  ;;  %v2506_v57 = vadd.s32 368, %v6198_v14  ;;  %v2507_v6 = vadd.s32 376, %v6198_v14  ;;  %v3722_v29 = vsel %vm2290_vm0, 1.0, %v7814_v56  ;;  %v2571_v27 = vadd.s32 %v6233_v62, %v2505_v28 }
 0x344   : > { %vm2289_vm3 = vcmp.eq.s32.totalorder %v7873_v36, %v1692_v44  ;;  %v1731_v51 = vcvt.f32.s32 %v1730_v1  ;;  %v6860_v45 = vshll.u32 %v2152_v58, 16  ;;  %v2180_v33 = vcvt.f32.s32 %v6487_v23 }
 0x345   : > { %v3331_v61 = vadd.f32 %v3330_v54, %v2802_v41  ;;  %v3721_v46 = vsel %vm2289_vm3, 1.0, %v7814_v56  ;;  %v6864_v49 = vshll.u32 %v2138_v20, 16  ;;  %v2166_v26 = vcvt.f32.s32 %v6489_v10 }
 0x346   : > { %v1734_v55 = vadd.s32 %v6498_v21, %v1731_v51  ;;  %v2804_v44 = vmul.f32 %v6576_v13, %v3721_v46  ;;  %v2805_v42 = vmul.f32 %v6559_v53, %v3722_v29  ;;  %vm2634_vm4 = vcmp.lt.s32.totalorder %v2570_v48, 800 }
 0x347   : > { %v1716_v1 = vpop.xlane.xlu0 %1715  ;;  %v2572_v28 = vadd.s32 %v6233_v62, %v2506_v57  ;;  %v2573_v58 = vadd.s32 %v6233_v62, %v2507_v6  ;;  %v6874_v41 = vsel %vm2632_vm1, 1.0, %v7814_v56  ;;  %v6878_v10 = vsel %vm2633_vm2, 1.0, %v7814_v56 }
 0x348   : > { %v1717_v23 = vcvt.f32.s32 %v1716_v1  ;;  %4186 = vmatprep.mubr.f32.mxu1 %v2804_v44  ;;  %vm2635_vm5 = vcmp.lt.s32.totalorder %v2571_v27, 800  ;;  %v6880_v21 = vshll.u32 %v2180_v33, 16  ;;  %v2208_v53 = vcvt.f32.s32 %v6513_v24  ;;  %v7921_v1 = vld [vmem:[#allocation145_spill] sm:$0xff] }
 0x349   : > { %v3332_v13 = vadd.f32 %v3331_v61, %v2803_v12  ;;  %vm2292_vm6 = vcmp.eq.s32.totalorder %v7873_v36, %v1734_v55  ;;  %4187 = vmatmul.mubr.f32.gmra.mrb[22].mxu1 %v2805_v42  ;;  %v6884_v20 = vshll.u32 %v2166_v26, 16  ;;  %v2194_v54 = vcvt.f32.s32 %v6515_v40  ;;  %v7920_v26 = vld [vmem:[#allocation121_spill] sm:$0xff] }
 0x34a   : > { %v1720_v57 = vadd.s32 %v7918_v4, %v1717_v23  ;;  %v6890_v16 = vsel %vm2634_vm4, 1.0, %v7814_v56  ;;  %v6893_v27 = vsel %vm2635_vm5, 1.0, %v7814_v56  ;;  %vm2636_vm7 = vcmp.lt.s32.totalorder %v2572_v28, 800 }
 0x34b   : > { %v3333_v6 = vadd.f32 %v3332_v13, %v2804_v44  ;;  %v1758_v51 = vpop.xlane.xlu1 %1757  ;;  %v1744_v29 = vpop.xlane.xlu0 %1743  ;;  %vm2637_vm8 = vcmp.lt.s32.totalorder %v2573_v58, 800  ;;  %v3724_v40 = vsel %vm2292_vm6, 1.0, %v7814_v56  ;;  %v6897_v12 = vshll.u32 %v2208_v53, 16 }
 0x34c   : > { %vm2291_vm9 = vcmp.eq.s32.totalorder %v7873_v36, %v1720_v57  ;;  %v1759_v24 = vcvt.f32.s32 %v1758_v51  ;;  %v1745_v55 = vcvt.f32.s32 %v1744_v29  ;;  %v2508_v33 = vadd.s32 384, %v6198_v14 }
 0x34d   : > { %7919 = vst [vmem:[#allocation70_spill] sm:$0xff] %v6897_v12  ;;  %v3723_v48 = vsel %vm2291_vm9, 1.0, %v7814_v56  ;;  %v2509_v61 = vadd.s32 392, %v6198_v14  ;;  %v6902_v46 = vshll.u32 %v2194_v54, 16  ;;  %v3334_v4 = vadd.f32 %v3333_v6, %v2805_v42  ;;  %v7922_v6 = vld [vmem:[#allocation79_spill] sm:$0xff] }
 0x34e   : > { %v1762_v44 = vadd.s32 %v7920_v26, %v1759_v24  ;;  %v1748_v23 = vadd.s32 %v7921_v1, %v1745_v55  ;;  %v2806_v13 = vmul.f32 %v6604_v18, %v3723_v48  ;;  %v2807_v53 = vmul.f32 %v6597_v52, %v3724_v40 }
 0x34f   : > { %v1786_v57 = vpop.xlane.xlu1 %1785  ;;  %v1772_v51 = vpop.xlane.xlu0 %1771  ;;  %v6910_v29 = vsel %vm2636_vm7, 1.0, %v7814_v56  ;;  %v6914_v12 = vsel %vm2637_vm8, 1.0, %v7814_v56  ;;  %v2574_v28 = vadd.s32 %v6233_v62, %v2508_v33 }
 0x350   : > { %vm2294_vm10 = vcmp.eq.s32.totalorder %v7873_v36, %v1762_v44  ;;  %vm2293_vm11 = vcmp.eq.s32.totalorder %v7873_v36, %v1748_v23  ;;  %v1787_v54 = vcvt.f32.s32 %v1786_v57  ;;  %v1773_v24 = vcvt.f32.s32 %v1772_v51  ;;  %4189 = vmatprep.mubr.f32.mxu1 %v2806_v13 }
 0x351   : > { %v3335_v18 = vadd.f32 %v3334_v4, %v2806_v13  ;;  %4190 = vmatmul.mubr.f32.gmra.mrb[24].mxu1 %v2807_v53  ;;  %v3725_v42 = vsel %vm2293_vm11, 1.0, %v7814_v56  ;;  %v3726_v52 = vsel %vm2294_vm10, 1.0, %v7814_v56  ;;  %v2575_v23 = vadd.s32 %v6233_v62, %v2509_v61  ;;  %v7923_v61 = vld [vmem:[#allocation81_spill] sm:$0xff] }
 0x352   : > { %v1790_v55 = vadd.s32 %v7922_v6, %v1787_v54  ;;  %v1776_v58 = vadd.s32 %v6554_v9, %v1773_v24  ;;  %v2808_v40 = vmul.f32 %v6616_v32, %v3725_v42  ;;  %v2809_v48 = vmul.f32 %v6619_v0, %v3726_v52  ;;  %v7924_v54 = vld [vmem:[#allocation124_spill] sm:$0xff]  ;;  %v7925_v52 = vld [vmem:[#allocation122_spill] sm:$0xff] }
 0x353   : > { %v3336_v26 = vadd.f32 %v3335_v18, %v2807_v53  ;;  %v1814_v44 = vpop.xlane.xlu1 %1813  ;;  %v1800_v1 = vpop.xlane.xlu0 %1799  ;;  %v2510_v13 = vadd.s32 400, %v6198_v14  ;;  %v2511_v4 = vadd.s32 408, %v6198_v14  ;;  %v2236_v9 = vcvt.f32.s32 %v6543_v31 }
 0x354   : > { %vm2296_vm12 = vcmp.eq.s32.totalorder %v7873_v36, %v1790_v55  ;;  %vm2295_vm13 = vcmp.eq.s32.totalorder %v7873_v36, %v1776_v58  ;;  %v1815_v33 = vcvt.f32.s32 %v1814_v44  ;;  %v1801_v57 = vcvt.f32.s32 %v1800_v1  ;;  %4192 = vmatprep.mubr.f32.mxu1 %v2808_v40 }
 0x355   : > { %v3337_v32 = vadd.f32 %v3336_v26, %v2808_v40  ;;  %4193 = vmatmul.mubr.f32.gmra.mrb[26].mxu1 %v2809_v48  ;;  %v3727_v0 = vsel %vm2295_vm13, 1.0, %v7814_v56  ;;  %v3728_v51 = vsel %vm2296_vm12, 1.0, %v7814_v56  ;;  %v2222_v6 = vcvt.f32.s32 %v7925_v52 }
 0x356   : > { %v1818_v53 = vadd.s32 %v7923_v61, %v1815_v33  ;;  %v1804_v24 = vadd.s32 %v7924_v54, %v1801_v57  ;;  %v2810_v18 = vmul.f32 %v6641_v19, %v3727_v0  ;;  %v2811_v42 = vmul.f32 %v6654_v47, %v3728_v51 }
 0x357   : > { %v3338_v55 = vadd.f32 %v3337_v32, %v2809_v48  ;;  %v1842_v58 = vpop.xlane.xlu1 %1841  ;;  %v1828_v44 = vpop.xlane.xlu0 %1827  ;;  %vm2638_vm14 = vcmp.lt.s32.totalorder %v2574_v28, 800  ;;  %vm2639_vm15 = vcmp.lt.s32.totalorder %v2575_v23, 800  ;;  %v6940_v26 = vshll.u32 %v2236_v9, 16  ;;  %v7926_v48 = vld [vmem:[#allocation82_spill] sm:$0xff] }
 0x358   : > { %vm2298_vm0 = vcmp.eq.s32.totalorder %v7873_v36, %v1818_v53  ;;  %vm2297_vm1 = vcmp.eq.s32.totalorder %v7873_v36, %v1804_v24  ;;  %v1843_v31 = vcvt.f32.s32 %v1842_v58  ;;  %v1829_v40 = vcvt.f32.s32 %v1828_v44  ;;  %4195 = vmatprep.mubr.f32.mxu1 %v2810_v18 }
 0x359   : > { %v3339_v1 = vadd.f32 %v3338_v55, %v2810_v18  ;;  %4196 = vmatmul.mubr.f32.gmra.mrb[28].mxu1 %v2811_v42  ;;  %v3729_v19 = vsel %vm2297_vm1, 1.0, %v7814_v56  ;;  %v3730_v47 = vsel %vm2298_vm0, 1.0, %v7814_v56  ;;  %v6948_v51 = vshll.u32 %v2222_v6, 16 }
 0x35a   : > { %v1846_v33 = vadd.s32 %v7926_v48, %v1843_v31  ;;  %v1832_v57 = vadd.s32 %v6588_v43, %v1829_v40  ;;  %v2812_v32 = vmul.f32 %v6692_v25, %v3729_v19  ;;  %v2813_v0 = vmul.f32 %v6696_v38, %v3730_v47 }
 0x35b   : > { %v3340_v61 = vadd.f32 %v3339_v1, %v2811_v42  ;;  %v1870_v53 = vpop.xlane.xlu1 %1869  ;;  %v1856_v9 = vpop.xlane.xlu0 %1855  ;;  %v6952_v54 = vsel %vm2638_vm14, 1.0, %v7814_v56  ;;  %v6956_v24 = vsel %vm2639_vm15, 1.0, %v7814_v56  ;;  %v2576_v28 = vadd.s32 %v6233_v62, %v2510_v13 }
 0x35c   : > { %vm2300_vm2 = vcmp.eq.s32.totalorder %v7873_v36, %v1846_v33  ;;  %vm2299_vm3 = vcmp.eq.s32.totalorder %v7873_v36, %v1832_v57  ;;  %v1871_v43 = vcvt.f32.s32 %v1870_v53  ;;  %v1857_v25 = vcvt.f32.s32 %v1856_v9  ;;  %4198 = vmatprep.mubr.f32.mxu1 %v2812_v32  ;;  %v7928_v33 = vld [vmem:[#allocation127_spill] sm:$0xff] }
 0x35d   : > { %v3341_v38 = vadd.f32 %v3340_v61, %v2812_v32  ;;  %4199 = vmatmul.mubr.f32.gmra.mrb[30].mxu1 %v2813_v0  ;;  %v3731_v18 = vsel %vm2299_vm3, 1.0, %v7814_v56  ;;  %v3732_v42 = vsel %vm2300_vm2, 1.0, %v7814_v56  ;;  %v2577_v40 = vadd.s32 %v6233_v62, %v2511_v4  ;;  %v7927_v4 = vld [vmem:[#allocation83_spill] sm:$0xff]  ;;  %v7929_v61 = vld [vmem:[#allocation126_spill] sm:$0xff] }
 0x35e   : > { %v1874_v52 = vadd.s32 %v6592_v22, %v1871_v43  ;;  %v1860_v23 = vadd.s32 %v6600_v2, %v1857_v25  ;;  %v2814_v6 = vmul.f32 %v6756_v59, %v3731_v18  ;;  %v2815_v55 = vmul.f32 %v6763_v3, %v3732_v42 }
 0x35f   : > { %v3342_v58 = vadd.f32 %v3341_v38, %v2813_v0  ;;  %v1898_v44 = vpop.xlane.xlu1 %1897  ;;  %v1884_v31 = vpop.xlane.xlu0 %1883  ;;  %v2512_v1 = vadd.s32 416, %v6198_v14  ;;  %v2513_v19 = vadd.s32 424, %v6198_v14  ;;  %v2264_v2 = vcvt.f32.s32 %v6570_v8 }
 0x360   : > { %vm2302_vm4 = vcmp.eq.s32.totalorder %v7873_v36, %v1874_v52  ;;  %vm2301_vm5 = vcmp.eq.s32.totalorder %v7873_v36, %v1860_v23  ;;  %v1899_v22 = vcvt.f32.s32 %v1898_v44  ;;  %v1885_v13 = vcvt.f32.s32 %v1884_v31  ;;  %4201 = vmatprep.mubr.f32.mxu1 %v2814_v6  ;;  %v7930_v52 = vld [vmem:[#allocation85_spill] sm:$0xff] }
 0x361   : > { %v3343_v59 = vadd.f32 %v3342_v58, %v2814_v6  ;;  %4202 = vmatmul.mubr.f32.gmra.mrb[32].mxu1 %v2815_v55  ;;  %v3733_v3 = vsel %vm2301_vm5, 1.0, %v7814_v56  ;;  %v3734_v47 = vsel %vm2302_vm4, 1.0, %v7814_v56  ;;  %v2250_v53 = vcvt.f32.s32 %v7929_v61  ;;  %v7931_v6 = vld [vmem:[#allocation129_spill] sm:$0xff] }
 0x362   : > { %v1902_v48 = vadd.s32 %v7927_v4, %v1899_v22  ;;  %v1888_v57 = vadd.s32 %v7928_v33, %v1885_v13  ;;  %v2816_v32 = vmul.f32 %v6775_v63, %v3733_v3  ;;  %v2817_v0 = vmul.f32 %v6780_v39, %v3734_v47 }
 0x363   : > { %v3344_v9 = vadd.f32 %v3343_v59, %v2815_v55  ;;  %v1926_v43 = vpop.xlane.xlu1 %1925  ;;  %v1912_v25 = vpop.xlane.xlu0 %1911  ;;  %vm2640_vm6 = vcmp.lt.s32.totalorder %v2576_v28, 800  ;;  %vm2641_vm7 = vcmp.lt.s32.totalorder %v2577_v40, 800  ;;  %v6982_v18 = vshll.u32 %v2264_v2, 16 }
 0x364   : > { %vm2304_vm8 = vcmp.eq.s32.totalorder %v7873_v36, %v1902_v48  ;;  %vm2303_vm9 = vcmp.eq.s32.totalorder %v7873_v36, %v1888_v57  ;;  %v1927_v8 = vcvt.f32.s32 %v1926_v43  ;;  %v1913_v38 = vcvt.f32.s32 %v1912_v25  ;;  %4204 = vmatprep.mubr.f32.mxu1 %v2816_v32 }
 0x365   : > { %v3345_v42 = vadd.f32 %v3344_v9, %v2816_v32  ;;  %4205 = vmatmul.mubr.f32.gmra.mrb[34].mxu1 %v2817_v0  ;;  %v3735_v63 = vsel %vm2303_vm9, 1.0, %v7814_v56  ;;  %v3736_v39 = vsel %vm2304_vm8, 1.0, %v7814_v56  ;;  %v6990_v31 = vshll.u32 %v2250_v53, 16 }
 0x366   : > { %v1930_v23 = vadd.s32 %v7930_v52, %v1927_v8  ;;  %v1916_v55 = vadd.s32 %v7931_v6, %v1913_v38  ;;  %v2818_v58 = vmul.f32 %v6800_v11, %v3735_v63  ;;  %v2819_v44 = vmul.f32 %v6804_v34, %v3736_v39 }
 0x367   : > { %v3346_v22 = vadd.f32 %v3345_v42, %v2817_v0  ;;  %v1954_v13 = vpop.xlane.xlu1 %1953  ;;  %v1940_v2 = vpop.xlane.xlu0 %1939  ;;  %v6994_v59 = vsel %vm2640_vm6, 1.0, %v7814_v56  ;;  %v6998_v3 = vsel %vm2641_vm7, 1.0, %v7814_v56  ;;  %v2578_v28 = vadd.s32 %v6233_v62, %v2512_v1 }
 0x368   : > { %vm2306_vm10 = vcmp.eq.s32.totalorder %v7873_v36, %v1930_v23  ;;  %vm2305_vm11 = vcmp.eq.s32.totalorder %v7873_v36, %v1916_v55  ;;  %v1955_v11 = vcvt.f32.s32 %v1954_v13  ;;  %v1941_v47 = vcvt.f32.s32 %v1940_v2  ;;  %4207 = vmatprep.mubr.f32.mxu1 %v2818_v58  ;;  %v7933_v13 = vld [vmem:[#allocation131_spill] sm:$0xff] }
 0x369   : > { %v3347_v34 = vadd.f32 %v3346_v22, %v2818_v58  ;;  %4208 = vmatmul.mubr.f32.gmra.mrb[36].mxu1 %v2819_v44  ;;  %v3737_v4 = vsel %vm2305_vm11, 1.0, %v7814_v56  ;;  %v3738_v48 = vsel %vm2306_vm10, 1.0, %v7814_v56  ;;  %v2579_v9 = vadd.s32 %v6233_v62, %v2513_v19 }
 0x36a   : > { %v1958_v33 = vadd.s32 %v6648_v37, %v1955_v11  ;;  %v1944_v40 = vadd.s32 %v6650_v7, %v1941_v47  ;;  %v2820_v57 = vmul.f32 %v6818_v35, %v3737_v4  ;;  %v2821_v32 = vmul.f32 %v6834_v5, %v3738_v48 }
 0x36b   : > { %v3348_v0 = vadd.f32 %v3347_v34, %v2819_v44  ;;  %v1982_v61 = vpop.xlane.xlu1 %1981  ;;  %v1968_v53 = vpop.xlane.xlu0 %1967  ;;  %v2514_v43 = vadd.s32 432, %v6198_v14  ;;  %v2515_v25 = vadd.s32 440, %v6198_v14  ;;  %vm2642_vm14 = vcmp.lt.s32.totalorder %v2578_v28, 800  ;;  %v7932_v44 = vld [vmem:[#allocation86_spill] sm:$0xff] }
 0x36c   : > { %vm2308_vm12 = vcmp.eq.s32.totalorder %v7873_v36, %v1958_v33  ;;  %vm2307_vm13 = vcmp.eq.s32.totalorder %v7873_v36, %v1944_v40  ;;  %v1983_v37 = vcvt.f32.s32 %v1982_v61  ;;  %v1969_v1 = vcvt.f32.s32 %v1968_v53  ;;  %4210 = vmatprep.mubr.f32.mxu1 %v2820_v57  ;;  %v7935_v53 = vld [vmem:[#allocation132_spill] sm:$0xff] }
 0x36d   : > { %v3349_v7 = vadd.f32 %v3348_v0, %v2820_v57  ;;  %4211 = vmatmul.mubr.f32.gmra.mrb[38].mxu1 %v2821_v32  ;;  %v3739_v35 = vsel %vm2307_vm13, 1.0, %v7814_v56  ;;  %v3740_v5 = vsel %vm2308_vm12, 1.0, %v7814_v56  ;;  %vm2643_vm15 = vcmp.lt.s32.totalorder %v2579_v9, 800  ;;  %v7934_v0 = vld [vmem:[#allocation88_spill] sm:$0xff] }
 0x36e   : > { %v1986_v19 = vadd.s32 %v6680_v30, %v1983_v37  ;;  %v1972_v8 = vadd.s32 %v6688_v15, %v1969_v1  ;;  %v2822_v38 = vmul.f32 %v6846_v60, %v3739_v35  ;;  %v2823_v42 = vmul.f32 %v6850_v17, %v3740_v5 }
 0x36f   : > { %v3350_v63 = vadd.f32 %v3349_v7, %v2821_v32  ;;  %v2010_v39 = vpop.xlane.xlu1 %2009  ;;  %v1996_v52 = vpop.xlane.xlu0 %1995  ;;  %v2580_v23 = vadd.s32 %v6233_v62, %v2514_v43  ;;  %v2581_v6 = vadd.s32 %v6233_v62, %v2515_v25  ;;  %v7028_v58 = vsel %vm2642_vm14, 1.0, %v7814_v56 }
 0x370   : > { %vm2310_vm0 = vcmp.eq.s32.totalorder %v7873_v36, %v1986_v19  ;;  %vm2309_vm1 = vcmp.eq.s32.totalorder %v7873_v36, %v1972_v8  ;;  %v2011_v55 = vcvt.f32.s32 %v2010_v39  ;;  %v1997_v30 = vcvt.f32.s32 %v1996_v52  ;;  %4213 = vmatprep.mubr.f32.mxu1 %v2822_v38  ;;  %v7936_v52 = vld [vmem:[#allocation89_spill] sm:$0xff] }
 0x371   : > { %v3351_v15 = vadd.f32 %v3350_v63, %v2822_v38  ;;  %4214 = vmatmul.mubr.f32.gmra.mrb[40].mxu1 %v2823_v42  ;;  %v3741_v60 = vsel %vm2309_vm1, 1.0, %v7814_v56  ;;  %v3742_v17 = vsel %vm2310_vm0, 1.0, %v7814_v56  ;;  %v7036_v33 = vsel %vm2643_vm15, 1.0, %v7814_v56 }
 0x372   : > { %v2014_v22 = vadd.s32 %v7932_v44, %v2011_v55  ;;  %v2000_v2 = vadd.s32 %v7933_v13, %v1997_v30  ;;  %v2824_v11 = vmul.f32 %v6874_v41, %v3741_v60  ;;  %v2825_v47 = vmul.f32 %v6878_v10, %v3742_v17 }
 0x373   : > { %v3352_v34 = vadd.f32 %v3351_v15, %v2823_v42  ;;  %v2038_v4 = vpop.xlane.xlu1 %2037  ;;  %v2024_v48 = vpop.xlane.xlu0 %2023  ;;  %vm2644_vm2 = vcmp.lt.s32.totalorder %v2580_v23, 800  ;;  %vm2645_vm3 = vcmp.lt.s32.totalorder %v2581_v6, 800  ;;  %v2516_v32 = vadd.s32 448, %v6198_v14 }
 0x374   : > { %vm2312_vm4 = vcmp.eq.s32.totalorder %v7873_v36, %v2014_v22  ;;  %vm2311_vm5 = vcmp.eq.s32.totalorder %v7873_v36, %v2000_v2  ;;  %v2039_v28 = vcvt.f32.s32 %v2038_v4  ;;  %v2025_v40 = vcvt.f32.s32 %v2024_v48  ;;  %4216 = vmatprep.mubr.f32.mxu1 %v2824_v11 }
 0x375   : > { %v3353_v57 = vadd.f32 %v3352_v34, %v2824_v11  ;;  %4217 = vmatmul.mubr.f32.gmra.mrb[42].mxu1 %v2825_v47  ;;  %v3743_v41 = vsel %vm2311_vm5, 1.0, %v7814_v56  ;;  %v3744_v10 = vsel %vm2312_vm4, 1.0, %v7814_v56  ;;  %v7049_v35 = vsel %vm2644_vm2, 1.0, %v7814_v56  ;;  %v7937_v11 = vld [vmem:[#allocation134_spill] sm:$0xff] }
 0x376   : > { %v2042_v61 = vadd.s32 %v7934_v0, %v2039_v28  ;;  %v2028_v9 = vadd.s32 %v7935_v53, %v2025_v40  ;;  %v2826_v43 = vmul.f32 %v6890_v16, %v3743_v41  ;;  %v2827_v25 = vmul.f32 %v6893_v27, %v3744_v10  ;;  %v7938_v34 = vld [vmem:[#allocation90_spill] sm:$0xff] }
 0x377   : > { %v3354_v37 = vadd.f32 %v3353_v57, %v2825_v47  ;;  %v2066_v1 = vpop.xlane.xlu1 %2065  ;;  %v2052_v7 = vpop.xlane.xlu0 %2051  ;;  %v7053_v5 = vsel %vm2645_vm3, 1.0, %v7814_v56  ;;  %v2517_v19 = vadd.s32 456, %v6198_v14  ;;  %v2582_v63 = vadd.s32 %v6233_v62, %v2516_v32 }
 0x378   : > { %vm2314_vm6 = vcmp.eq.s32.totalorder %v7873_v36, %v2042_v61  ;;  %vm2313_vm7 = vcmp.eq.s32.totalorder %v7873_v36, %v2028_v9  ;;  %v2067_v16 = vcvt.f32.s32 %v2066_v1  ;;  %v2053_v8 = vcvt.f32.s32 %v2052_v7  ;;  %4219 = vmatprep.mubr.f32.mxu1 %v2826_v43 }
 0x379   : > { %v3355_v27 = vadd.f32 %v3354_v37, %v2826_v43  ;;  %4220 = vmatmul.mubr.f32.gmra.mrb[44].mxu1 %v2827_v25  ;;  %v3745_v38 = vsel %vm2313_vm7, 1.0, %v7814_v56  ;;  %v3746_v42 = vsel %vm2314_vm6, 1.0, %v7814_v56  ;;  %v2583_v17 = vadd.s32 %v6233_v62, %v2517_v19  ;;  %v7939_v43 = vld [vmem:[#allocation136_spill] sm:$0xff]  ;;  %v7940_v37 = vld [vmem:[#allocation71_spill] sm:$0xff] }
 0x37a   : > { %v2070_v39 = vadd.s32 %v6788_v50, %v2067_v16  ;;  %v2056_v23 = vadd.s32 %v7936_v52, %v2053_v8  ;;  %v2828_v6 = vmul.f32 %v6910_v29, %v3745_v38  ;;  %v2829_v55 = vmul.f32 %v6914_v12, %v3746_v42 }
 0x37b   : > { %v3356_v30 = vadd.f32 %v3355_v27, %v2827_v25  ;;  %v2094_v15 = vpop.xlane.xlu1 %2093  ;;  %v2080_v60 = vpop.xlane.xlu0 %2079  ;;  %v2518_v44 = vadd.s32 464, %v6198_v14  ;;  %v2519_v22 = vadd.s32 472, %v6198_v14  ;;  %vm2646_vm10 = vcmp.lt.s32.totalorder %v2582_v63, 800 }
 0x37c   : > { %vm2316_vm8 = vcmp.eq.s32.totalorder %v7873_v36, %v2070_v39  ;;  %vm2315_vm9 = vcmp.eq.s32.totalorder %v7873_v36, %v2056_v23  ;;  %v2095_v50 = vcvt.f32.s32 %v2094_v15  ;;  %v2081_v13 = vcvt.f32.s32 %v2080_v60  ;;  %4222 = vmatprep.mubr.f32.mxu1 %v2828_v6 }
 0x37d   : > { %v3357_v2 = vadd.f32 %v3356_v30, %v2828_v6  ;;  %4223 = vmatmul.mubr.f32.gmra.mrb[46].mxu1 %v2829_v55  ;;  %v3747_v12 = vsel %vm2315_vm9, 1.0, %v7814_v56  ;;  %v3748_v29 = vsel %vm2316_vm8, 1.0, %v7814_v56  ;;  %vm2647_vm11 = vcmp.lt.s32.totalorder %v2583_v17, 800 }
 0x37e   : > { %v2098_v47 = vadd.s32 %v7937_v11, %v2095_v50  ;;  %v2084_v4 = vadd.s32 %v7938_v34, %v2081_v13  ;;  %v2830_v48 = vmul.f32 %v6952_v54, %v3747_v12  ;;  %v2831_v28 = vmul.f32 %v6956_v24, %v3748_v29 }
 0x37f   : > { %v3358_v40 = vadd.f32 %v3357_v2, %v2829_v55  ;;  %v2122_v57 = vpop.xlane.xlu1 %2121  ;;  %v2108_v41 = vpop.xlane.xlu0 %2107  ;;  %v2584_v10 = vadd.s32 %v6233_v62, %v2518_v44  ;;  %v2585_v32 = vadd.s32 %v6233_v62, %v2519_v22  ;;  %v7084_v9 = vsel %vm2646_vm10, 1.0, %v7814_v56 }
 0x380   : > { %vm2318_vm12 = vcmp.eq.s32.totalorder %v7873_v36, %v2098_v47  ;;  %vm2317_vm13 = vcmp.eq.s32.totalorder %v7873_v36, %v2084_v4  ;;  %v2123_v0 = vcvt.f32.s32 %v2122_v57  ;;  %v2109_v61 = vcvt.f32.s32 %v2108_v41  ;;  %4225 = vmatprep.mubr.f32.mxu1 %v2830_v48 }
 0x381   : > { %v3359_v53 = vadd.f32 %v3358_v40, %v2830_v48  ;;  %4226 = vmatmul.mubr.f32.gmra.mrb[48].mxu1 %v2831_v28  ;;  %v3749_v54 = vsel %vm2317_vm13, 1.0, %v7814_v56  ;;  %v3750_v24 = vsel %vm2318_vm12, 1.0, %v7814_v56  ;;  %v3821_v38 = vsel %vm2647_vm11, 1.0, %v7814_v56 }
 0x382   : > { %v2126_v25 = vadd.s32 %v7939_v43, %v2123_v0  ;;  %v2112_v1 = vadd.s32 %v7940_v37, %v2109_v61  ;;  %v2832_v7 = vmul.f32 %v6994_v59, %v3749_v54  ;;  %v2833_v19 = vmul.f32 %v6998_v3, %v3750_v24 }
 0x383   : > { %v3360_v16 = vadd.f32 %v3359_v53, %v2831_v28  ;;  %v2150_v8 = vpop.xlane.xlu1 %2149  ;;  %v2136_v27 = vpop.xlane.xlu0 %2135  ;;  %vm2648_vm14 = vcmp.lt.s32.totalorder %v2584_v10, 800  ;;  %vm2649_vm15 = vcmp.lt.s32.totalorder %v2585_v32, 800  ;;  %v2520_v52 = vadd.s32 480, %v6198_v14  ;;  %v7941_v10 = vld [vmem:[#allocation70_spill] sm:$0xff] }
 0x384   : > { %vm2320_vm0 = vcmp.eq.s32.totalorder %v7873_v36, %v2126_v25  ;;  %vm2319_vm1 = vcmp.eq.s32.totalorder %v7873_v36, %v2112_v1  ;;  %v2151_v42 = vcvt.f32.s32 %v2150_v8  ;;  %v2137_v63 = vcvt.f32.s32 %v2136_v27  ;;  %4228 = vmatprep.mubr.f32.mxu1 %v2832_v7 }
 0x385   : > { %v3361_v39 = vadd.f32 %v3360_v16, %v2832_v7  ;;  %4229 = vmatmul.mubr.f32.gmra.mrb[50].mxu1 %v2833_v19  ;;  %v3751_v59 = vsel %vm2319_vm1, 1.0, %v7814_v56  ;;  %v3752_v3 = vsel %vm2320_vm0, 1.0, %v7814_v56  ;;  %v3822_v44 = vsel %vm2648_vm14, 1.0, %v7814_v56 }
 0x386   : > { %v2154_v23 = vadd.s32 %v6860_v45, %v2151_v42  ;;  %v2140_v6 = vadd.s32 %v6864_v49, %v2137_v63  ;;  %v2834_v55 = vmul.f32 %v7028_v58, %v3751_v59  ;;  %v2835_v30 = vmul.f32 %v7036_v33, %v3752_v3 }
 0x387   : > { %v3362_v15 = vadd.f32 %v3361_v39, %v2833_v19  ;;  %v2178_v60 = vpop.xlane.xlu1 %2177  ;;  %v2164_v17 = vpop.xlane.xlu0 %2163  ;;  %v3823_v22 = vsel %vm2649_vm15, 1.0, %v7814_v56  ;;  %v2521_v50 = vadd.s32 488, %v6198_v14  ;;  %v2586_v2 = vadd.s32 %v6233_v62, %v2520_v52 }
 0x388   : > { %vm2322_vm2 = vcmp.eq.s32.totalorder %v7873_v36, %v2154_v23  ;;  %vm2321_vm3 = vcmp.eq.s32.totalorder %v7873_v36, %v2140_v6  ;;  %v2179_v45 = vcvt.f32.s32 %v2178_v60  ;;  %v2165_v49 = vcvt.f32.s32 %v2164_v17  ;;  %4231 = vmatprep.mubr.f32.mxu1 %v2834_v55 }
 0x389   : > { %v3363_v58 = vadd.f32 %v3362_v15, %v2834_v55  ;;  %4232 = vmatmul.mubr.f32.gmra.mrb[52].mxu1 %v2835_v30  ;;  %v3753_v33 = vsel %vm2321_vm3, 1.0, %v7814_v56  ;;  %v3754_v13 = vsel %vm2322_vm2, 1.0, %v7814_v56  ;;  %v2587_v28 = vadd.s32 %v6233_v62, %v2521_v50 }
 0x38a   : > { %v2182_v12 = vadd.s32 %v6880_v21, %v2179_v45  ;;  %v2168_v29 = vadd.s32 %v6884_v20, %v2165_v49  ;;  %v2836_v11 = vmul.f32 %v7049_v35, %v3753_v33  ;;  %v2837_v47 = vmul.f32 %v7053_v5, %v3754_v13 }
 0x38b   : > { %v3364_v34 = vadd.f32 %v3363_v58, %v2835_v30  ;;  %v2206_v4 = vpop.xlane.xlu1 %2205  ;;  %v2192_v48 = vpop.xlane.xlu0 %2191  ;;  %v2522_v40 = vadd.s32 496, %v6198_v14  ;;  %v2523_v57 = vadd.s32 504, %v6198_v14  ;;  %vm2650_vm6 = vcmp.lt.s32.totalorder %v2586_v2, 800 }
 0x38c   : > { %vm2324_vm4 = vcmp.eq.s32.totalorder %v7873_v36, %v2182_v12  ;;  %vm2323_vm5 = vcmp.eq.s32.totalorder %v7873_v36, %v2168_v29  ;;  %v2207_v21 = vcvt.f32.s32 %v2206_v4  ;;  %v2193_v41 = vcvt.f32.s32 %v2192_v48  ;;  %4234 = vmatprep.mubr.f32.mxu1 %v2836_v11 }
 0x38d   : > { %v3365_v20 = vadd.f32 %v3364_v34, %v2836_v11  ;;  %4235 = vmatmul.mubr.f32.gmra.mrb[54].mxu1 %v2837_v47  ;;  %v3755_v35 = vsel %vm2323_vm5, 1.0, %v7814_v56  ;;  %v3756_v5 = vsel %vm2324_vm4, 1.0, %v7814_v56  ;;  %vm2651_vm7 = vcmp.lt.s32.totalorder %v2587_v28, 800  ;;  %v7942_v34 = vld [vmem:[#allocation7_spill] sm:$0xff]  ;;  %v7943_v28 = vld [vmem:[#allocation6_spill] sm:$0xff] }
 0x38e   : > { %v2210_v32 = vadd.s32 %v7941_v10, %v2207_v21  ;;  %v2196_v0 = vadd.s32 %v6902_v46, %v2193_v41  ;;  %v2838_v14 = vmul.f32 %v7084_v9, %v3755_v35  ;;  %v2839_v61 = vmul.f32 %v3821_v38, %v3756_v5  ;;  %v7944_v5 = vld [vmem:[#allocation9_spill] sm:$0xff] }
 0x38f   : > { %v3366_v53 = vadd.f32 %v3365_v20, %v2837_v47  ;;  %v2234_v54 = vpop.xlane.xlu1 %2233  ;;  %v2220_v24 = vpop.xlane.xlu0 %2219  ;;  %v2588_v43 = vadd.s32 %v6233_v62, %v2522_v40  ;;  %v2589_v25 = vadd.s32 %v6233_v62, %v2523_v57  ;;  %v3824_v19 = vsel %vm2650_vm6, 1.0, %v7814_v56 }
 0x390   : > { %vm2326_vm8 = vcmp.eq.s32.totalorder %v7873_v36, %v2210_v32  ;;  %vm2325_vm9 = vcmp.eq.s32.totalorder %v7873_v36, %v2196_v0  ;;  %v2235_v37 = vcvt.f32.s32 %v2234_v54  ;;  %v2221_v1 = vcvt.f32.s32 %v2220_v24  ;;  %4237 = vmatprep.mubr.f32.mxu1 %v2838_v14  ;;  %v7945_v32 = vld [vmem:[#allocation8_spill] sm:$0xff] }
 0x391   : > { %v3367_v7 = vadd.f32 %v3366_v53, %v2838_v14  ;;  %4238 = vmatmul.mubr.f32.gmra.mrb[56].mxu1 %v2839_v61  ;;  %v3757_v46 = vsel %vm2325_vm9, 1.0, %v7814_v56  ;;  %v3758_v9 = vsel %vm2326_vm8, 1.0, %v7814_v56  ;;  %v3825_v39 = vsel %vm2651_vm7, 1.0, %v7814_v56 }
 0x392   : > { %v2238_v16 = vadd.s32 %v6940_v26, %v2235_v37  ;;  %v2224_v62 = vadd.s32 %v6948_v51, %v2221_v1  ;;  %v2840_v8 = vmul.f32 %v3822_v44, %v3757_v46  ;;  %v2841_v27 = vmul.f32 %v3823_v22, %v3758_v9  ;;  %v7947_v37 = vld [vmem:[#allocation10_spill] sm:$0xff] }
 0x393   : > { %v3368_v38 = vadd.f32 %v3367_v7, %v2839_v61  ;;  %v2262_v42 = vpop.xlane.xlu1 %2261  ;;  %v2248_v63 = vpop.xlane.xlu0 %2247  ;;  %vm2652_vm10 = vcmp.lt.s32.totalorder %v2588_v43, 800  ;;  %vm2653_vm11 = vcmp.lt.s32.totalorder %v2589_v25, 800  ;;  %v7946_v43 = vld [vmem:[#allocation11_spill] sm:$0xff]  ;;  %vm3588_vm0 = vcmask (!%p3828_p5), 1040384  }
 0x394   : > { %vm2328_vm12 = vcmp.eq.s32.totalorder %v7873_v36, %v2238_v16  ;;  %vm2327_vm13 = vcmp.eq.s32.totalorder %v7873_v36, %v2224_v62  ;;  %v2263_v59 = vcvt.f32.s32 %v2262_v42  ;;  %v2249_v3 = vcvt.f32.s32 %v2248_v63  ;;  %4240 = vmatprep.mubr.f32.mxu1 %v2840_v8 }
 0x395   : > { %v3369_v26 = vadd.f32 %v3368_v38, %v2840_v8  ;;  %4241 = vmatmul.mubr.f32.gmra.mrb[58].mxu1 %v2841_v27  ;;  %v3759_v51 = vsel %vm2327_vm13, 1.0, %v7814_v56  ;;  %v3760_v52 = vsel %vm2328_vm12, 1.0, %v7814_v56  ;;  %v3826_v60 = vsel %vm2652_vm10, 1.0, %v7814_v56  ;;  %v7948_v8 = vld [vmem:[#allocation13_spill] sm:$0xff]  ;;  %v7949_v38 = vld [vmem:[#allocation12_spill] sm:$0xff] }
 0x396   : > { %v2266_v23 = vadd.s32 %v6982_v18, %v2263_v59  ;;  %v2252_v6 = vadd.s32 %v6990_v31, %v2249_v3  ;;  %v2842_v55 = vmul.f32 %v3824_v19, %v3759_v51  ;;  %v2843_v30 = vmul.f32 %v3825_v39, %v3760_v52  ;;  %v7950_v52 = vld [vmem:[#allocation15_spill] sm:$0xff] }
 0x397   : > { %v3370_v15 = vadd.f32 %v3369_v26, %v2841_v27  ;;  %v3827_v17 = vsel %vm2653_vm11, 1.0, %v7814_v56  ;;  %vm3600_vm1 = vcmask (!%p3828_p5), 0  }
 0x398   : > { %vm2330_vm14 = vcmp.eq.s32.totalorder %v7873_v36, %v2266_v23  ;;  %vm2329_vm15 = vcmp.eq.s32.totalorder %v7873_v36, %v2252_v6  ;;  %4243 = vmatprep.mubr.f32.mxu1 %v2842_v55  ;;  %v7951_v6 = vld [vmem:[#allocation14_spill] sm:$0xff] }
 0x399   : > { %v3762_v44 = vsel %vm2330_vm14, 1.0, %v7814_v56  ;;  %v3761_v18 = vsel %vm2329_vm15, 1.0, %v7814_v56  ;;  %v3371_v22 = vadd.f32 %v3370_v15, %v2842_v55  ;;  %4244 = vmatmul.mubr.f32.gmra.mrb[60].mxu1 %v2843_v30  ;;  %v3311_v56 = vld [vmem:[%s7317_s5] sm:$0x1] }
 0x39a   : > { %v2844_v31 = vmul.f32 %v3826_v60, %v3761_v18  ;;  %v2845_v50 = vmul.f32 %v3827_v17, %v3762_v44 }
 0x39b   : > { %v3372_v45 = vadd.f32 %v3371_v22, %v2843_v30  ;;  %v7952_v22 = vld [vmem:[#allocation17_spill] sm:$0xff] }
 0x39c   : > { %4246 = vmatprep.mubr.f32.mxu1 %v2844_v31 }
 0x39d   : > { %v3373_v49 = vadd.f32 %v3372_v45, %v2844_v31  ;;  %4247 = vmatmul.mubr.f32.gmra.mrb[62].mxu1 %v2845_v50 }
 0x39f   : > { %v3374_v58 = vadd.f32 %v3373_v49, %v2845_v50  ;;  %v7953_v50 = vld [vmem:[#allocation16_spill] sm:$0xff] }
 0x3a1   : > { %v3375_v33 = vrot.slane %v3374_v58, 4 }
 0x3a3   : > { %v3376_v13 = vadd.f32 %v3375_v33, %v3374_v58 }
 0x3a5   : > { %v3377_v2 = vrot.slane %v3376_v13, 2 }
 0x3a7   : > { %v3378_v36 = vadd.f32 %v3377_v2, %v3376_v13 }
 0x3a9   : > { %v3379_v12 = vrot.slane %v3378_v36, 1 }
 0x3ab   : > { %v3380_v29 = vadd.f32 %v3379_v12, %v3378_v36  ;;  %v7954_v12 = vld [vmem:[#allocation19_spill] sm:$0xff] }
 0x3ad   : > { %v3381_v11 = vadd.f32 %v3380_v29, %v3311_v56  ;;  %v7955_v29 = vld [vmem:[#allocation18_spill] sm:$0xff] }
 0x3af   : > { %3382 = vst [vmem:[%s7317_s5] sm:$0x1] %v3381_v11 }
 0x3e4   : > { %v4155_v47 = vpop.f32.mrb[0].mxu1 }
 0x3e5   : > { %3248 = vst [vmem:[%s4427_s30 + $0x8] sm:$0xff] %v4155_v47  ;;  %v3384_v4 = vsub.f32 %v4155_v47, %v7942_v34  ;;  %v2928_v48 = vpop.f32.mrb[1].mxu1 }
 0x3e6   : > { %3247 = vst [vmem:[%s4427_s30] sm:$0xff] %v2928_v48  ;;  %v3383_v40 = vsub.f32 %v2928_v48, %v7943_v28 }
 0x3e7   : > { %v3449_v57 = vmul.f32 %v3384_v4, %v3384_v4 }
 0x3e8   : > { %v3448_v21 = vmul.f32 %v3383_v40, %v3383_v40  ;;  %v4158_v41 = vpop.f32.mrb[2].mxu1 }
 0x3e9   : > { %3250 = vst [vmem:[%s4427_s30 + $0x18] sm:$0xff] %v4158_v41  ;;  %v2938_v20 = vpop.f32.mrb[3].mxu1  ;;  %v3386_v10 = vsub.f32 %v4158_v41, %v7944_v5  ;;  %v7957_v41 = vld [vmem:[#allocation20_spill] sm:$0xff] }
 0x3ea   : > { %v3512_v35 = vadd.f32 %v3449_v57, %v3448_v21  ;;  %3249 = vst [vmem:[%s4427_s30 + $0x10] sm:$0xff] %v2938_v20  ;;  %v3385_v0 = vsub.f32 %v2938_v20, %v7945_v32  ;;  %v7956_v57 = vld [vmem:[#allocation21_spill] sm:$0xff] }
 0x3eb   : > { %v3451_v54 = vmul.f32 %v3386_v10, %v3386_v10 }
 0x3ec   : > { %v3450_v14 = vmul.f32 %v3385_v0, %v3385_v0  ;;  %v4161_v61 = vpop.f32.mrb[4].mxu1 }
 0x3ed   : > { %3252 = vst [vmem:[%s4427_s30 + $0x28] sm:$0xff] %v4161_v61  ;;  %v2948_v53 = vpop.f32.mrb[5].mxu1  ;;  %v3388_v25 = vsub.f32 %v4161_v61, %v7946_v43  ;;  %v7958_v61 = vld [vmem:[#allocation23_spill] sm:$0xff] }
 0x3ee   : > { %v3513_v24 = vadd.f32 %v3512_v35, %v3450_v14  ;;  %3251 = vst [vmem:[%s4427_s30 + $0x20] sm:$0xff] %v2948_v53  ;;  %v3387_v1 = vsub.f32 %v2948_v53, %v7947_v37 }
 0x3ef   : > { %v3453_v16 = vmul.f32 %v3388_v25, %v3388_v25 }
 0x3f0   : > { %v3452_v7 = vmul.f32 %v3387_v1, %v3387_v1  ;;  %v3514_v46 = vadd.f32 %v3513_v24, %v3451_v54  ;;  %v4164_v9 = vpop.f32.mrb[6].mxu1  ;;  %v7959_v54 = vld [vmem:[#allocation22_spill] sm:$0xff] }
 0x3f1   : > { %3254 = vst [vmem:[%s4427_s30 + $0x38] sm:$0xff] %v4164_v9  ;;  %v2958_v19 = vpop.f32.mrb[7].mxu1  ;;  %v3390_v27 = vsub.f32 %v4164_v9, %v7948_v8 }
 0x3f2   : > { %v3515_v62 = vadd.f32 %v3514_v46, %v3452_v7  ;;  %3253 = vst [vmem:[%s4427_s30 + $0x30] sm:$0xff] %v2958_v19  ;;  %v3389_v42 = vsub.f32 %v2958_v19, %v7949_v38  ;;  %v7960_v19 = vld [vmem:[#allocation25_spill] sm:$0xff] }
 0x3f3   : > { %v3455_v26 = vmul.f32 %v3390_v27, %v3390_v27 }
 0x3f4   : > { %v3454_v63 = vmul.f32 %v3389_v42, %v3389_v42  ;;  %v3516_v39 = vadd.f32 %v3515_v62, %v3453_v16  ;;  %v4167_v59 = vpop.f32.mrb[8].mxu1  ;;  %v7961_v62 = vld [vmem:[#allocation24_spill] sm:$0xff] }
 0x3f5   : > { %3256 = vst [vmem:[%s4427_s30 + $0x48] sm:$0xff] %v4167_v59  ;;  %v2968_v3 = vpop.f32.mrb[9].mxu1  ;;  %v3392_v23 = vsub.f32 %v4167_v59, %v7950_v52 }
 0x3f6   : > { %v3517_v51 = vadd.f32 %v3516_v39, %v3454_v63  ;;  %3255 = vst [vmem:[%s4427_s30 + $0x40] sm:$0xff] %v2968_v3  ;;  %v3391_v55 = vsub.f32 %v2968_v3, %v7951_v6  ;;  %v7962_v3 = vld [vmem:[#allocation27_spill] sm:$0xff] }
 0x3f7   : > { %v3457_v44 = vmul.f32 %v3392_v23, %v3392_v23 }
 0x3f8   : > { %v3456_v30 = vmul.f32 %v3391_v55, %v3391_v55  ;;  %v3518_v15 = vadd.f32 %v3517_v51, %v3455_v26  ;;  %v4170_v60 = vpop.f32.mrb[10].mxu1  ;;  %v7963_v51 = vld [vmem:[#allocation26_spill] sm:$0xff] }
 0x3f9   : > { %3258 = vst [vmem:[%s4427_s30 + $0x58] sm:$0xff] %v4170_v60  ;;  %v2978_v17 = vpop.f32.mrb[11].mxu1  ;;  %v3394_v31 = vsub.f32 %v4170_v60, %v7952_v22 }
 0x3fa   : > { %v3519_v18 = vadd.f32 %v3518_v15, %v3456_v30  ;;  %3257 = vst [vmem:[%s4427_s30 + $0x50] sm:$0xff] %v2978_v17  ;;  %v3393_v45 = vsub.f32 %v2978_v17, %v7953_v50  ;;  %v7964_v17 = vld [vmem:[#allocation29_spill] sm:$0xff] }
 0x3fb   : > { %v3459_v2 = vmul.f32 %v3394_v31, %v3394_v31 }
 0x3fc   : > { %v3458_v49 = vmul.f32 %v3393_v45, %v3393_v45  ;;  %v3520_v58 = vadd.f32 %v3519_v18, %v3457_v44  ;;  %v4173_v33 = vpop.f32.mrb[12].mxu1  ;;  %v7965_v18 = vld [vmem:[#allocation28_spill] sm:$0xff] }
 0x3fd   : > { %3260 = vst [vmem:[%s4427_s30 + $0x68] sm:$0xff] %v4173_v33  ;;  %v2988_v13 = vpop.f32.mrb[13].mxu1  ;;  %v3396_v56 = vsub.f32 %v4173_v33, %v7954_v12 }
 0x3fe   : > { %v3521_v36 = vadd.f32 %v3520_v58, %v3458_v49  ;;  %3259 = vst [vmem:[%s4427_s30 + $0x60] sm:$0xff] %v2988_v13  ;;  %v3395_v11 = vsub.f32 %v2988_v13, %v7955_v29  ;;  %v7966_v13 = vld [vmem:[#allocation31_spill] sm:$0xff] }
 0x3ff   : > { %v3461_v28 = vmul.f32 %v3396_v56, %v3396_v56 }
 0x400   : > { %v3460_v47 = vmul.f32 %v3395_v11, %v3395_v11  ;;  %v3522_v34 = vadd.f32 %v3521_v36, %v3459_v2  ;;  %v4176_v4 = vpop.f32.mrb[14].mxu1  ;;  %v7967_v36 = vld [vmem:[#allocation30_spill] sm:$0xff] }
 0x401   : > { %3262 = vst [vmem:[%s4427_s30 + $0x78] sm:$0xff] %v4176_v4  ;;  %v2998_v48 = vpop.f32.mrb[15].mxu1  ;;  %v3398_v21 = vsub.f32 %v4176_v4, %v7956_v57  ;;  %v7968_v4 = vld [vmem:[#allocation33_spill] sm:$0xff] }
 0x402   : > { %v3523_v40 = vadd.f32 %v3522_v34, %v3460_v47  ;;  %3261 = vst [vmem:[%s4427_s30 + $0x70] sm:$0xff] %v2998_v48  ;;  %v3397_v20 = vsub.f32 %v2998_v48, %v7957_v41 }
 0x403   : > { %v3463_v0 = vmul.f32 %v3398_v21, %v3398_v21 }
 0x404   : > { %v3462_v35 = vmul.f32 %v3397_v20, %v3397_v20  ;;  %v3524_v5 = vadd.f32 %v3523_v40, %v3461_v28  ;;  %v4179_v10 = vpop.f32.mrb[16].mxu1  ;;  %v7969_v28 = vld [vmem:[#allocation32_spill] sm:$0xff] }
 0x405   : > { %3264 = vst [vmem:[%s4427_s30 + $0x88] sm:$0xff] %v4179_v10  ;;  %v3008_v32 = vpop.f32.mrb[17].mxu1  ;;  %v3400_v53 = vsub.f32 %v4179_v10, %v7958_v61  ;;  %v7970_v10 = vld [vmem:[#allocation35_spill] sm:$0xff] }
 0x406   : > { %v3525_v14 = vadd.f32 %v3524_v5, %v3462_v35  ;;  %3263 = vst [vmem:[%s4427_s30 + $0x80] sm:$0xff] %v3008_v32  ;;  %v3399_v24 = vsub.f32 %v3008_v32, %v7959_v54 }
 0x407   : > { %v3465_v37 = vmul.f32 %v3400_v53, %v3400_v53 }
 0x408   : > { %v3464_v43 = vmul.f32 %v3399_v24, %v3399_v24  ;;  %v3526_v25 = vadd.f32 %v3525_v14, %v3463_v0  ;;  %v7971_v0 = vld [vmem:[#allocation34_spill] sm:$0xff] }
 0x40a   : > { %v3527_v1 = vadd.f32 %v3526_v25, %v3464_v43 }
 0x40c   : > { %v4182_v7 = vpop.f32.mrb[18].mxu1  ;;  %v3528_v46 = vadd.f32 %v3527_v1, %v3465_v37  ;;  %v7972_v37 = vld [vmem:[#allocation37_spill] sm:$0xff] }
 0x40d   : > { %3266 = vst [vmem:[%s4427_s30 + $0x98] sm:$0xff] %v4182_v7  ;;  %v3018_v9 = vpop.f32.mrb[19].mxu1  ;;  %v3402_v16 = vsub.f32 %v4182_v7, %v7960_v19  ;;  %v7973_v7 = vld [vmem:[#allocation36_spill] sm:$0xff] }
 0x40e   : > { %3265 = vst [vmem:[%s4427_s30 + $0x90] sm:$0xff] %v3018_v9  ;;  %v3401_v8 = vsub.f32 %v3018_v9, %v7961_v62 }
 0x40f   : > { %v3467_v38 = vmul.f32 %v3402_v16, %v3402_v16 }
 0x410   : > { %v3466_v27 = vmul.f32 %v3401_v8, %v3401_v8 }
 0x412   : > { %v3529_v42 = vadd.f32 %v3528_v46, %v3466_v27 }
 0x414   : > { %v4185_v63 = vpop.f32.mrb[20].mxu1  ;;  %v3530_v39 = vadd.f32 %v3529_v42, %v3467_v38  ;;  %v7974_v38 = vld [vmem:[#allocation39_spill] sm:$0xff] }
 0x415   : > { %3268 = vst [vmem:[%s4427_s30 + $0xa8] sm:$0xff] %v4185_v63  ;;  %v3028_v59 = vpop.f32.mrb[21].mxu1  ;;  %v3404_v26 = vsub.f32 %v4185_v63, %v7962_v3  ;;  %v7975_v63 = vld [vmem:[#allocation38_spill] sm:$0xff] }
 0x416   : > { %3267 = vst [vmem:[%s4427_s30 + $0xa0] sm:$0xff] %v3028_v59  ;;  %v3403_v52 = vsub.f32 %v3028_v59, %v7963_v51 }
 0x417   : > { %v3469_v6 = vmul.f32 %v3404_v26, %v3404_v26 }
 0x418   : > { %v3468_v23 = vmul.f32 %v3403_v52, %v3403_v52 }
 0x41a   : > { %v3531_v55 = vadd.f32 %v3530_v39, %v3468_v23 }
 0x41c   : > { %v4188_v30 = vpop.f32.mrb[22].mxu1  ;;  %v3532_v15 = vadd.f32 %v3531_v55, %v3469_v6  ;;  %v7976_v6 = vld [vmem:[#allocation41_spill] sm:$0xff] }
 0x41d   : > { %3270 = vst [vmem:[%s4427_s30 + $0xb8] sm:$0xff] %v4188_v30  ;;  %v3038_v60 = vpop.f32.mrb[23].mxu1  ;;  %v3406_v44 = vsub.f32 %v4188_v30, %v7964_v17  ;;  %v7977_v30 = vld [vmem:[#allocation40_spill] sm:$0xff] }
 0x41e   : > { %3269 = vst [vmem:[%s4427_s30 + $0xb0] sm:$0xff] %v3038_v60  ;;  %v3405_v22 = vsub.f32 %v3038_v60, %v7965_v18 }
 0x41f   : > { %v3471_v50 = vmul.f32 %v3406_v44, %v3406_v44 }
 0x420   : > { %v3470_v31 = vmul.f32 %v3405_v22, %v3405_v22 }
 0x422   : > { %v3533_v45 = vadd.f32 %v3532_v15, %v3470_v31 }
 0x424   : > { %v4191_v49 = vpop.f32.mrb[24].mxu1  ;;  %v3534_v58 = vadd.f32 %v3533_v45, %v3471_v50  ;;  %v7978_v50 = vld [vmem:[#allocation43_spill] sm:$0xff] }
 0x425   : > { %3272 = vst [vmem:[%s4427_s30 + $0xc8] sm:$0xff] %v4191_v49  ;;  %v3048_v33 = vpop.f32.mrb[25].mxu1  ;;  %v3408_v2 = vsub.f32 %v4191_v49, %v7966_v13  ;;  %v7979_v49 = vld [vmem:[#allocation42_spill] sm:$0xff] }
 0x426   : > { %3271 = vst [vmem:[%s4427_s30 + $0xc0] sm:$0xff] %v3048_v33  ;;  %v3407_v12 = vsub.f32 %v3048_v33, %v7967_v36 }
 0x427   : > { %v3473_v47 = vmul.f32 %v3408_v2, %v3408_v2 }
 0x428   : > { %v3472_v56 = vmul.f32 %v3407_v12, %v3407_v12  ;;  %v4194_v29 = vpop.f32.mrb[26].mxu1 }
 0x429   : > { %3274 = vst [vmem:[%s4427_s30 + $0xd8] sm:$0xff] %v4194_v29  ;;  %v3058_v11 = vpop.f32.mrb[27].mxu1  ;;  %v3410_v48 = vsub.f32 %v4194_v29, %v7968_v4  ;;  %v7980_v29 = vld [vmem:[#allocation45_spill] sm:$0xff] }
 0x42a   : > { %v3535_v34 = vadd.f32 %v3534_v58, %v3472_v56  ;;  %3273 = vst [vmem:[%s4427_s30 + $0xd0] sm:$0xff] %v3058_v11  ;;  %v3409_v40 = vsub.f32 %v3058_v11, %v7969_v28 }
 0x42b   : > { %v3475_v35 = vmul.f32 %v3410_v48, %v3410_v48 }
 0x42c   : > { %v3474_v57 = vmul.f32 %v3409_v40, %v3409_v40  ;;  %v3536_v21 = vadd.f32 %v3535_v34, %v3473_v47  ;;  %v4197_v41 = vpop.f32.mrb[28].mxu1  ;;  %v7981_v47 = vld [vmem:[#allocation44_spill] sm:$0xff] }
 0x42d   : > { %3276 = vst [vmem:[%s4427_s30 + $0xe8] sm:$0xff] %v4197_v41  ;;  %v3068_v20 = vpop.f32.mrb[29].mxu1  ;;  %v3412_v32 = vsub.f32 %v4197_v41, %v7970_v10  ;;  %v7982_v41 = vld [vmem:[#allocation47_spill] sm:$0xff] }
 0x42e   : > { %v3537_v5 = vadd.f32 %v3536_v21, %v3474_v57  ;;  %3275 = vst [vmem:[%s4427_s30 + $0xe0] sm:$0xff] %v3068_v20  ;;  %v3411_v14 = vsub.f32 %v3068_v20, %v7971_v0 }
 0x42f   : > { %v3477_v43 = vmul.f32 %v3412_v32, %v3412_v32 }
 0x430   : > { %v3476_v61 = vmul.f32 %v3411_v14, %v3411_v14  ;;  %v3538_v53 = vadd.f32 %v3537_v5, %v3475_v35  ;;  %v4200_v54 = vpop.f32.mrb[30].mxu1  ;;  %v7983_v35 = vld [vmem:[#allocation46_spill] sm:$0xff] }
 0x431   : > { %3278 = vst [vmem:[%s4427_s30 + $0xf8] sm:$0xff] %v4200_v54  ;;  %v3078_v24 = vpop.f32.mrb[31].mxu1  ;;  %v3414_v1 = vsub.f32 %v4200_v54, %v7972_v37  ;;  %v7984_v54 = vld [vmem:[#allocation49_spill] sm:$0xff] }
 0x432   : > { %v3539_v25 = vadd.f32 %v3538_v53, %v3476_v61  ;;  %3277 = vst [vmem:[%s4427_s30 + $0xf0] sm:$0xff] %v3078_v24  ;;  %v3413_v46 = vsub.f32 %v3078_v24, %v7973_v7 }
 0x433   : > { %v3479_v8 = vmul.f32 %v3414_v1, %v3414_v1 }
 0x434   : > { %v3478_v9 = vmul.f32 %v3413_v46, %v3413_v46  ;;  %v3540_v19 = vadd.f32 %v3539_v25, %v3477_v43  ;;  %v4203_v16 = vpop.f32.mrb[32].mxu1  ;;  %v7985_v43 = vld [vmem:[#allocation48_spill] sm:$0xff] }
 0x435   : > { %3280 = vst [vmem:[%s4427_s30 + $0x108] sm:$0xff] %v4203_v16  ;;  %v3088_v62 = vpop.f32.mrb[33].mxu1  ;;  %v3416_v42 = vsub.f32 %v4203_v16, %v7974_v38  ;;  %v7986_v16 = vld [vmem:[#allocation51_spill] sm:$0xff] }
 0x436   : > { %v3541_v27 = vadd.f32 %v3540_v19, %v3478_v9  ;;  %3279 = vst [vmem:[%s4427_s30 + $0x100] sm:$0xff] %v3088_v62  ;;  %v3415_v39 = vsub.f32 %v3088_v62, %v7975_v63 }
 0x437   : > { %v3481_v52 = vmul.f32 %v3416_v42, %v3416_v42 }
 0x438   : > { %v3480_v59 = vmul.f32 %v3415_v39, %v3415_v39  ;;  %v3542_v3 = vadd.f32 %v3541_v27, %v3479_v8  ;;  %v4206_v26 = vpop.f32.mrb[34].mxu1  ;;  %v7987_v8 = vld [vmem:[#allocation50_spill] sm:$0xff] }
 0x439   : > { %3282 = vst [vmem:[%s4427_s30 + $0x118] sm:$0xff] %v4206_v26  ;;  %v3098_v51 = vpop.f32.mrb[35].mxu1  ;;  %v3418_v55 = vsub.f32 %v4206_v26, %v7976_v6  ;;  %v7988_v26 = vld [vmem:[#allocation53_spill] sm:$0xff] }
 0x43a   : > { %v3543_v23 = vadd.f32 %v3542_v3, %v3480_v59  ;;  %3281 = vst [vmem:[%s4427_s30 + $0x110] sm:$0xff] %v3098_v51  ;;  %v3417_v15 = vsub.f32 %v3098_v51, %v7977_v30 }
 0x43b   : > { %v3483_v22 = vmul.f32 %v3418_v55, %v3418_v55 }
 0x43c   : > { %v3482_v60 = vmul.f32 %v3417_v15, %v3417_v15  ;;  %v3544_v17 = vadd.f32 %v3543_v23, %v3481_v52  ;;  %v4209_v44 = vpop.f32.mrb[36].mxu1  ;;  %v7989_v52 = vld [vmem:[#allocation52_spill] sm:$0xff] }
 0x43d   : > { %3284 = vst [vmem:[%s4427_s30 + $0x128] sm:$0xff] %v4209_v44  ;;  %v3108_v18 = vpop.f32.mrb[37].mxu1  ;;  %v3420_v45 = vsub.f32 %v4209_v44, %v7978_v50  ;;  %v7990_v44 = vld [vmem:[#allocation55_spill] sm:$0xff] }
 0x43e   : > { %v3545_v31 = vadd.f32 %v3544_v17, %v3482_v60  ;;  %3283 = vst [vmem:[%s4427_s30 + $0x120] sm:$0xff] %v3108_v18  ;;  %v3419_v58 = vsub.f32 %v3108_v18, %v7979_v49 }
 0x43f   : > { %v3485_v12 = vmul.f32 %v3420_v45, %v3420_v45 }
 0x440   : > { %v3484_v33 = vmul.f32 %v3419_v58, %v3419_v58  ;;  %v3546_v13 = vadd.f32 %v3545_v31, %v3483_v22  ;;  %v4212_v2 = vpop.f32.mrb[38].mxu1  ;;  %v7991_v22 = vld [vmem:[#allocation54_spill] sm:$0xff] }
 0x441   : > { %3286 = vst [vmem:[%s4427_s30 + $0x138] sm:$0xff] %v4212_v2  ;;  %v3118_v36 = vpop.f32.mrb[39].mxu1  ;;  %v3422_v11 = vsub.f32 %v4212_v2, %v7980_v29  ;;  %v7992_v2 = vld [vmem:[#allocation57_spill] sm:$0xff] }
 0x442   : > { %v3547_v56 = vadd.f32 %v3546_v13, %v3484_v33  ;;  %3285 = vst [vmem:[%s4427_s30 + $0x130] sm:$0xff] %v3118_v36  ;;  %v3421_v34 = vsub.f32 %v3118_v36, %v7981_v47 }
 0x443   : > { %v3487_v57 = vmul.f32 %v3422_v11, %v3422_v11 }
 0x444   : > { %v3486_v4 = vmul.f32 %v3421_v34, %v3421_v34  ;;  %v3548_v48 = vadd.f32 %v3547_v56, %v3485_v12  ;;  %v4215_v28 = vpop.f32.mrb[40].mxu1  ;;  %v7993_v12 = vld [vmem:[#allocation56_spill] sm:$0xff] }
 0x445   : > { %3288 = vst [vmem:[%s4427_s30 + $0x148] sm:$0xff] %v4215_v28  ;;  %v3128_v40 = vpop.f32.mrb[41].mxu1  ;;  %v3424_v20 = vsub.f32 %v4215_v28, %v7982_v41  ;;  %v7994_v28 = vld [vmem:[#allocation59_spill] sm:$0xff] }
 0x446   : > { %v3549_v21 = vadd.f32 %v3548_v48, %v3486_v4  ;;  %3287 = vst [vmem:[%s4427_s30 + $0x140] sm:$0xff] %v3128_v40  ;;  %v3423_v5 = vsub.f32 %v3128_v40, %v7983_v35 }
 0x447   : > { %v3489_v61 = vmul.f32 %v3424_v20, %v3424_v20 }
 0x448   : > { %v3488_v10 = vmul.f32 %v3423_v5, %v3423_v5  ;;  %v3550_v32 = vadd.f32 %v3549_v21, %v3487_v57  ;;  %v4218_v0 = vpop.f32.mrb[42].mxu1  ;;  %v7995_v57 = vld [vmem:[#allocation58_spill] sm:$0xff] }
 0x449   : > { %3290 = vst [vmem:[%s4427_s30 + $0x158] sm:$0xff] %v4218_v0  ;;  %v3138_v14 = vpop.f32.mrb[43].mxu1  ;;  %v3426_v24 = vsub.f32 %v4218_v0, %v7984_v54  ;;  %v7996_v0 = vld [vmem:[#allocation61_spill] sm:$0xff] }
 0x44a   : > { %v3551_v53 = vadd.f32 %v3550_v32, %v3488_v10  ;;  %3289 = vst [vmem:[%s4427_s30 + $0x150] sm:$0xff] %v3138_v14  ;;  %v3425_v25 = vsub.f32 %v3138_v14, %v7985_v43 }
 0x44b   : > { %v3491_v9 = vmul.f32 %v3426_v24, %v3426_v24 }
 0x44c   : > { %v3490_v37 = vmul.f32 %v3425_v25, %v3425_v25  ;;  %v3552_v1 = vadd.f32 %v3551_v53, %v3489_v61  ;;  %v4221_v7 = vpop.f32.mrb[44].mxu1  ;;  %v7997_v61 = vld [vmem:[#allocation60_spill] sm:$0xff] }
 0x44d   : > { %3292 = vst [vmem:[%s4427_s30 + $0x168] sm:$0xff] %v4221_v7  ;;  %v3148_v46 = vpop.f32.mrb[45].mxu1  ;;  %v3428_v62 = vsub.f32 %v4221_v7, %v7986_v16  ;;  %v7998_v7 = vld [vmem:[#allocation63_spill] sm:$0xff] }
 0x44e   : > { %v3553_v19 = vadd.f32 %v3552_v1, %v3490_v37  ;;  %3291 = vst [vmem:[%s4427_s30 + $0x160] sm:$0xff] %v3148_v46  ;;  %v3427_v27 = vsub.f32 %v3148_v46, %v7987_v8 }
 0x44f   : > { %v3493_v59 = vmul.f32 %v3428_v62, %v3428_v62 }
 0x450   : > { %v3492_v38 = vmul.f32 %v3427_v27, %v3427_v27  ;;  %v3554_v42 = vadd.f32 %v3553_v19, %v3491_v9  ;;  %v4224_v63 = vpop.f32.mrb[46].mxu1  ;;  %v7999_v9 = vld [vmem:[#allocation62_spill] sm:$0xff] }
 0x451   : > { %3294 = vst [vmem:[%s4427_s30 + $0x178] sm:$0xff] %v4224_v63  ;;  %v3158_v39 = vpop.f32.mrb[47].mxu1  ;;  %v3430_v51 = vsub.f32 %v4224_v63, %v7988_v26  ;;  %v8000_v63 = vld [vmem:[#allocation65_spill] sm:$0xff] }
 0x452   : > { %v3555_v3 = vadd.f32 %v3554_v42, %v3492_v38  ;;  %3293 = vst [vmem:[%s4427_s30 + $0x170] sm:$0xff] %v3158_v39  ;;  %v3429_v23 = vsub.f32 %v3158_v39, %v7989_v52 }
 0x453   : > { %v3495_v60 = vmul.f32 %v3430_v51, %v3430_v51 }
 0x454   : > { %v3494_v6 = vmul.f32 %v3429_v23, %v3429_v23  ;;  %v3556_v55 = vadd.f32 %v3555_v3, %v3493_v59  ;;  %v4227_v30 = vpop.f32.mrb[48].mxu1  ;;  %v8001_v59 = vld [vmem:[#allocation64_spill] sm:$0xff] }
 0x455   : > { %3296 = vst [vmem:[%s4427_s30 + $0x188] sm:$0xff] %v4227_v30  ;;  %v3168_v15 = vpop.f32.mrb[49].mxu1  ;;  %v3432_v18 = vsub.f32 %v4227_v30, %v7990_v44  ;;  %v8002_v30 = vld [vmem:[#allocation67_spill] sm:$0xff] }
 0x456   : > { %v3557_v17 = vadd.f32 %v3556_v55, %v3494_v6  ;;  %3295 = vst [vmem:[%s4427_s30 + $0x180] sm:$0xff] %v3168_v15  ;;  %v3431_v31 = vsub.f32 %v3168_v15, %v7991_v22 }
 0x457   : > { %v3497_v33 = vmul.f32 %v3432_v18, %v3432_v18 }
 0x458   : > { %v3496_v50 = vmul.f32 %v3431_v31, %v3431_v31  ;;  %v3558_v45 = vadd.f32 %v3557_v17, %v3495_v60  ;;  %v4230_v49 = vpop.f32.mrb[50].mxu1  ;;  %v8003_v60 = vld [vmem:[#allocation66_spill] sm:$0xff] }
 0x459   : > { %3298 = vst [vmem:[%s4427_s30 + $0x198] sm:$0xff] %v4230_v49  ;;  %v3178_v58 = vpop.f32.mrb[51].mxu1  ;;  %v3434_v36 = vsub.f32 %v4230_v49, %v7992_v2  ;;  %v8004_v49 = vld [vmem:[#allocation69_spill] sm:$0xff] }
 0x45a   : > { %v3559_v13 = vadd.f32 %v3558_v45, %v3496_v50  ;;  %3297 = vst [vmem:[%s4427_s30 + $0x190] sm:$0xff] %v3178_v58  ;;  %v3433_v56 = vsub.f32 %v3178_v58, %v7993_v12 }
 0x45b   : > { %v3499_v4 = vmul.f32 %v3434_v36, %v3434_v36 }
 0x45c   : > { %v3498_v29 = vmul.f32 %v3433_v56, %v3433_v56  ;;  %v3560_v11 = vadd.f32 %v3559_v13, %v3497_v33  ;;  %v4233_v47 = vpop.f32.mrb[52].mxu1  ;;  %v8005_v33 = vld [vmem:[#allocation68_spill] sm:$0xff] }
 0x45d   : > { %3300 = vst [vmem:[%s4427_s30 + $0x1a8] sm:$0xff] %v4233_v47  ;;  %v3188_v34 = vpop.f32.mrb[53].mxu1  ;;  %v3436_v40 = vsub.f32 %v4233_v47, %v7994_v28  ;;  %v3447_v28 = vld [vmem:[#allocation2] sm:$0x1] }
 0x45e   : > { %v3561_v48 = vadd.f32 %v3560_v11, %v3498_v29  ;;  %3299 = vst [vmem:[%s4427_s30 + $0x1a0] sm:$0xff] %v3188_v34  ;;  %v3435_v21 = vsub.f32 %v3188_v34, %v7995_v57 }
 0x45f   : > { %v3501_v10 = vmul.f32 %v3436_v40, %v3436_v40 }
 0x460   : > { %v3500_v41 = vmul.f32 %v3435_v21, %v3435_v21  ;;  %v3562_v20 = vadd.f32 %v3561_v48, %v3499_v4  ;;  %v4236_v35 = vpop.f32.mrb[54].mxu1 }
 0x461   : > { %3302 = vst [vmem:[%s4427_s30 + $0x1b8] sm:$0xff] %v4236_v35  ;;  %v3198_v5 = vpop.f32.mrb[55].mxu1  ;;  %v3438_v14 = vsub.f32 %v4236_v35, %v7996_v0 }
 0x462   : > { %v3563_v32 = vadd.f32 %v3562_v20, %v3500_v41  ;;  %3301 = vst [vmem:[%s4427_s30 + $0x1b0] sm:$0xff] %v3198_v5  ;;  %v3437_v53 = vsub.f32 %v3198_v5, %v7997_v61 }
 0x463   : > { %v3503_v37 = vmul.f32 %v3438_v14, %v3438_v14 }
 0x464   : > { %v3502_v54 = vmul.f32 %v3437_v53, %v3437_v53  ;;  %v3564_v24 = vadd.f32 %v3563_v32, %v3501_v10  ;;  %v4239_v43 = vpop.f32.mrb[56].mxu1 }
 0x465   : > { %3304 = vst [vmem:[%s4427_s30 + $0x1c8] sm:$0xff] %v4239_v43  ;;  %v3208_v25 = vpop.f32.mrb[57].mxu1  ;;  %v3440_v46 = vsub.f32 %v4239_v43, %v7998_v7 }
 0x466   : > { %v3565_v1 = vadd.f32 %v3564_v24, %v3502_v54  ;;  %3303 = vst [vmem:[%s4427_s30 + $0x1c0] sm:$0xff] %v3208_v25  ;;  %v3439_v19 = vsub.f32 %v3208_v25, %v7999_v9 }
 0x467   : > { %v3505_v38 = vmul.f32 %v3440_v46, %v3440_v46 }
 0x468   : > { %v3504_v16 = vmul.f32 %v3439_v19, %v3439_v19  ;;  %v3566_v62 = vadd.f32 %v3565_v1, %v3503_v37  ;;  %v4242_v8 = vpop.f32.mrb[58].mxu1 }
 0x469   : > { %3306 = vst [vmem:[%s4427_s30 + $0x1d8] sm:$0xff] %v4242_v8  ;;  %v3218_v27 = vpop.f32.mrb[59].mxu1  ;;  %v3442_v39 = vsub.f32 %v4242_v8, %v8000_v63 }
 0x46a   : > { %v3567_v42 = vadd.f32 %v3566_v62, %v3504_v16  ;;  %3305 = vst [vmem:[%s4427_s30 + $0x1d0] sm:$0xff] %v3218_v27  ;;  %v3441_v3 = vsub.f32 %v3218_v27, %v8001_v59 }
 0x46b   : > { %v3507_v6 = vmul.f32 %v3442_v39, %v3442_v39 }
 0x46c   : > { %v3506_v26 = vmul.f32 %v3441_v3, %v3441_v3  ;;  %v3568_v51 = vadd.f32 %v3567_v42, %v3505_v38  ;;  %v4245_v52 = vpop.f32.mrb[60].mxu1 }
 0x46d   : > { %3308 = vst [vmem:[%s4427_s30 + $0x1e8] sm:$0xff] %v4245_v52  ;;  %v3228_v23 = vpop.f32.mrb[61].mxu1  ;;  %v3444_v15 = vsub.f32 %v4245_v52, %v8002_v30 }
 0x46e   : > { %v3569_v55 = vadd.f32 %v3568_v51, %v3506_v26  ;;  %3307 = vst [vmem:[%s4427_s30 + $0x1e0] sm:$0xff] %v3228_v23  ;;  %v3443_v17 = vsub.f32 %v3228_v23, %v8003_v60 }
 0x46f   : > { %v3509_v50 = vmul.f32 %v3444_v15, %v3444_v15 }
 0x470   : > { %v3508_v44 = vmul.f32 %v3443_v17, %v3443_v17  ;;  %v3570_v18 = vadd.f32 %v3569_v55, %v3507_v6  ;;  %v4248_v22 = vpop.f32.mrb[62].mxu1 }
 0x471   : > { %3310 = vst [vmem:[%s4427_s30 + $0x1f8] sm:$0xff] %v4248_v22  ;;  %v3238_v31 = vpop.f32.mrb[63].mxu1  ;;  %v3446_v58 = vsub.f32 %v4248_v22, %v8004_v49 }
 0x472   : > { %v3571_v45 = vadd.f32 %v3570_v18, %v3508_v44  ;;  %3309 = vst [vmem:[%s4427_s30 + $0x1f0] sm:$0xff] %v3238_v31  ;;  %v3445_v13 = vsub.f32 %v3238_v31, %v8005_v33 }
 0x473   : > { %v3511_v12 = vmul.f32 %v3446_v58, %v3446_v58 }
 0x474   : > { %v3510_v2 = vmul.f32 %v3445_v13, %v3445_v13  ;;  %v3572_v36 = vadd.f32 %v3571_v45, %v3509_v50 }
 0x476   : > { %v3573_v56 = vadd.f32 %v3572_v36, %v3510_v2 }
 0x478   : > { %v3574_v29 = vadd.f32 %v3573_v56, %v3511_v12 }
 0x47a   : > { %v3575_v11 = vrot.slane %v3574_v29, 4 }
 0x47c   : > { %v3576_v47 = vadd.f32 %v3575_v11, %v3574_v29 }
 0x47e   : > { %v3577_v34 = vrot.slane %v3576_v47, 2 }
 0x480   : > { %v3578_v4 = vadd.f32 %v3577_v34, %v3576_v47 }
 0x482   : > { %v3579_v48 = vrot.slane %v3578_v4, 1  ;;  %3586 = sbr.rel (%p3828_p5) target bundleno = 1375 (0x55f), region = 44 }
 0x484   : > { %v3580_v40 = vadd.f32 %v3579_v48, %v3578_v4 }
 0x486   : > { %v3581_v57 = vadd.f32 %v3580_v40, %v3447_v28 }
 0x488   : > { %3582 = vst [vmem:[#allocation2] sm:$0x1] %v3581_v57 }
 0x48f   : > { %v3587_v21 = vld [vmem:[#allocation2] sm:$0x1] }
 0x490   : > { %v3589_v41 = vsel %vm3588_vm0, %v3587_v21, 0.0 }
 0x491   : > { %3590 = vadd.xlane.f32.xlu0 %v3589_v41 }
 0x51e   : > { %v3591_v20 = vpop.xlane.xlu0 %3590 }
 0x51f   : > { %v3592_v35 = vrot.slane %v3591_v20, 4 }
 0x521   : > { %v3593_v5 = vadd.f32 %v3592_v35, %v3591_v20 }
 0x523   : > { %v3594_v10 = vrot.slane %v3593_v5, 2 }
 0x525   : > { %v3595_v32 = vadd.f32 %v3594_v10, %v3593_v5 }
 0x527   : > { %v3596_v0 = vrot.slane %v3595_v32, 1 }
 0x529   : > { %v3597_v14 = vadd.f32 %v3596_v0, %v3595_v32 }
 0x52b   : > { %4313 = vpush %v3597_v14 }
 0x55c   : > { %s4314_s30 = spop %4313 }
 0x55d   : > { %v3599_v61 = vstv %s4314_s30 }
 0x55e   : > { %3601 = vst.msk [vmem:[#allocation3] sm:$0x1] %vm3600_vm1, %v3599_v61 }
 0x55f PF: > { %p4319_p6 = scmp.eq.s32.totalorder %s4414_s22, 1  ;;  %s4372_s17 = smov [#allocation3]  }
 0x560   : > { %s3621_s18 = sshll.u32 %s4372_s17, 4  ;;  %s3622_s18 = int_to_ptr.vmem [resolvable:$true] %s3621_s18 }
 0x561   : > { %s4332_s19 = scalar_lea.vmem %s3622_s18, 16  ;;  %s4338_s20 = scalar_lea.vmem %s3622_s18, 32 }
 0x562   : > { %p4333_p7 = scmp.ne.s32.totalorder %s3622_s18, %s4332_s19  ;;  %p4339_p10 = scmp.lt.s32.totalorder %s3622_s18, %s3622_s18 }
 0x563   : > { %p4340_p11 = scmp.lt.s32.totalorder %s4338_s20, %s4332_s19 }
 0x564   : > { %p4334_p8 = pnand %p4333_p7, %p4319_p6 }
 0x565   : > { %p4341_p12 = por %p4340_p11, %p4339_p10 }
 0x566   : > { %p4335_p9 = pneg %p4334_p8 }
 0x568   : > { %p4342_p13 = pnand %p4341_p12, %p4335_p9 }
 0x56a   : > { %4345 = shalt.err (!%p4342_p13)
}
 0x56b   : > { %s4346_s25 = scalar_lea.hbm %s7318_s6, 16 }
 0x56c   : > { %p4347_p0 = scmp.ne.s32.totalorder %s7318_s6, %s4346_s25  ;;  %p4352_p3 = scmp.lt.u32.totalorder %s4346_s25, %s7318_s6 }
 0x56e   : > { %p4348_p1 = pnand %p4347_p0, %p4319_p6 }
 0x570   : > { %p4349_p2 = pneg %p4348_p1 }
 0x572   : > { %p4354_p4 = pnand %p4352_p3, %p4349_p2 }
 0x574   : > { %4357 = shalt.err (!%p4354_p4)
}
 0x575   : > { %4316 = dma.vmem_to_hbm [thread:$0]  (%p4319_p6), %s3622_s18, 16, %s7318_s6, [#allocation4]  }
 0x576   : > { %4363 = dma.done.wait (%p4319_p6), [#allocation4], 16  }
 0x577   : > { %4365 = vsyncadd (%p4319_p6), [#allocation4], 4294967280 }
 0x578 PF: > { %s18_s21 = sadd.s32 1, %s4368_s21  }
 0x579   : > { %p15_p5 = scmp.ge.s32.totalorder %s18_s21, 4  }
 0x57b   :  { %17 = sbr.rel (!%p15_p5) target bundleno = 1 (0x1), region = 91 }
 0x582   :  { %3645 = vsyncpa [#allocation4], 1 }
 0x583   :  { %3647 = vsyncpa [#allocation4 + $0x1], 1 }

</bundles_post_ra>
